<compile_context>
chip_gen: v6e
topology: v6e:2x2x1
jax: 0.10.0
libtpu: 0.0.40
codegen_flags: <defaults>
</compile_context>

<pallas_src>
from functools import partial

import jax
import jax.numpy as jnp
from jax.experimental import pallas as pl
from jax.experimental.pallas import tpu as pltpu


def _bilinear_up2x_matrix(n):
    """(2n, n) matrix implementing PyTorch bilinear 2x upsampling along one axis
    (align_corners=False, the F.upsample/F.interpolate default)."""
    out = jnp.arange(2 * n, dtype=jnp.float32)
    src = (out + 0.5) * 0.5 - 0.5
    i0 = jnp.floor(src)
    frac = src - i0
    lo = jnp.clip(i0, 0, n - 1).astype(jnp.int32)
    hi = jnp.clip(i0 + 1.0, 0, n - 1).astype(jnp.int32)
    return (jax.nn.one_hot(lo, n, dtype=jnp.float32) * (1.0 - frac)[:, None]
            + jax.nn.one_hot(hi, n, dtype=jnp.float32) * frac[:, None])


def _psp_kernel(x_ref, upwt_ref, uph_ref, w_ref, b_ref, o_ref, p_ref, acc_ref):
    # x_ref:    (1, tci, H, W)          VMEM in   (one C_in tile of one batch element)
    # upwt_ref: (W, 2W+2)               VMEM in   width-upsample matrix, zero pad cols baked in
    # uph_ref:  (2H+2, H)               VMEM in   height-upsample matrix, zero pad rows baked in
    # w_ref:    (1, 9, C_out, tci)      VMEM in   BN-folded conv weights, tap-major
    # b_ref:    (C_out, 1)              VMEM in   folded BN bias
    # o_ref:    (1, C_out, 4*H*W)       VMEM out  flattened spatial (lane-dense stores)
    # p_ref:    (tci, 2H+2, 2W+2)       VMEM scratch: padded upsampled activation tile
    # acc_ref:  (C_out, 4*H*W)          VMEM scratch: f32 conv accumulator (lives across ci)
    ci = pl.program_id(1)
    n_ci = pl.num_programs(1)

    tci = x_ref.shape[1]
    h, wdt = x_ref.shape[2], x_ref.shape[3]
    h2p, wp = p_ref.shape[1], p_ref.shape[2]
    h2, w2 = h2p - 2, wp - 2
    c_out, sp = acc_ref.shape

    @pl.when(ci == 0)
    def _init():
        acc_ref[...] = jnp.zeros_like(acc_ref)

    # ---- bilinear 2x upsample + zero halo, entirely on the MXU -------------------
    # Width pass: one (tci*H, W) @ (W, 2W+2) matmul (leading-dim merge is layout-free).
    xw = x_ref[0].astype(jnp.float32).reshape(tci * h, wdt)
    qw = jnp.dot(xw, upwt_ref[...], preferred_element_type=jnp.float32)  # (tci*H, 2W+2)
    q3 = qw.reshape(tci, h, wp)
    # Height pass: batched matmul over the channel tile (padding rows baked in).
    uph_b = jnp.broadcast_to(uph_ref[...], (tci, h2p, h))
    p_ref[...] = jnp.einsum('cyh,chw->cyw', uph_b, q3,
                            preferred_element_type=jnp.float32)          # (tci, 2H+2, 2W+2)

    # ---- 3x3 conv (zero pad, no conv bias) as 9 accumulating MXU matmuls ---------
    acc = acc_ref[...]
    for dy in range(3):            # 9 static taps: short fixed trip count, fine to unroll
        for dx in range(3):
            win = p_ref[:, dy:dy + h2, dx:dx + w2].reshape(tci, sp)      # (tci, 4HW)
            w_tap = w_ref[0, dy * 3 + dx]                                # (C_out, tci)
            acc = acc + jnp.dot(w_tap, win, preferred_element_type=jnp.float32)
    acc_ref[...] = acc

    @pl.when(ci == n_ci - 1)
    def _finalize():
        o_ref[0] = (acc + b_ref[...]).astype(o_ref.dtype)


@partial(jax.jit, static_argnames=("eps", "ci_tile"))
def psp_upsampling_forward(x, conv_weight, bn_gamma, bn_beta, bn_mean, bn_var,
                           eps=1e-5, ci_tile=None):
    """x: (N, C_in, H, W) f32 -> (N, C_out, 2H, 2W) = BN(Conv3x3(Upsample2x(x)))."""
    n, c_in, h, w = x.shape
    c_out = conv_weight.shape[0]
    h2, w2 = 2 * h, 2 * w
    h2p, wp = h2 + 2, w2 + 2
    sp = h2 * w2

    if ci_tile is None:
        ci_tile = c_in
    assert c_in % ci_tile == 0, (c_in, ci_tile)
    n_ci = c_in // ci_tile

    # Fold eval-mode BatchNorm into the conv (tiny, done once on params).
    scale = bn_gamma / jnp.sqrt(bn_var + eps)                                 # (C_out,)
    w_eff = conv_weight.astype(jnp.float32) * scale[:, None, None, None]      # (C_out,C_in,3,3)
    b_eff = (bn_beta - bn_mean * scale).astype(jnp.float32).reshape(c_out, 1)

    # (C_out, C_in, 3, 3) -> (n_ci, 9, C_out, ci_tile): tap-major, C_in-tile-major.
    w_taps = (w_eff.transpose(2, 3, 0, 1)                 # (3, 3, C_out, C_in)
                   .reshape(9, c_out, n_ci, ci_tile)
                   .transpose(2, 0, 1, 3))                # (n_ci, 9, C_out, ci_tile)

    # Bilinear 2x matrices with the conv's zero halo (padding=1) baked in.
    upw = _bilinear_up2x_matrix(w)                                            # (2W, W)
    uph = _bilinear_up2x_matrix(h)                                            # (2H, H)
    upwt_pad = jnp.zeros((w, wp), jnp.float32).at[:, 1:1 + w2].set(upw.T)     # (W, 2W+2)
    uph_pad = jnp.zeros((h2p, h), jnp.float32).at[1:1 + h2, :].set(uph)       # (2H+2, H)

    flops = n * (2 * c_in * h * w * wp            # width upsample
                 + 2 * c_in * h2p * h * wp        # height upsample
                 + 2 * 9 * c_out * c_in * sp)     # 3x3 conv
    bytes_accessed = 4 * (n * c_in * h * w + n * c_out * sp
                          + 9 * c_out * c_in + c_out + w * wp + h2p * h)

    out_flat = pl.pallas_call(
        _psp_kernel,
        out_shape=jax.ShapeDtypeStruct((n, c_out, sp), x.dtype),
        grid_spec=pltpu.PrefetchScalarGridSpec(
            num_scalar_prefetch=0,
            grid=(n, n_ci),
            in_specs=[
                pl.BlockSpec((1, ci_tile, h, w), lambda b, ci: (b, ci, 0, 0)),
                pl.BlockSpec((w, wp), lambda b, ci: (0, 0)),
                pl.BlockSpec((h2p, h), lambda b, ci: (0, 0)),
                pl.BlockSpec((1, 9, c_out, ci_tile), lambda b, ci: (ci, 0, 0, 0)),
                pl.BlockSpec((c_out, 1), lambda b, ci: (0, 0)),
            ],
            out_specs=pl.BlockSpec((1, c_out, sp), lambda b, ci: (b, 0, 0)),
            scratch_shapes=[
                pltpu.VMEM((ci_tile, h2p, wp), jnp.float32),   # padded upsampled tile
                pltpu.VMEM((c_out, sp), jnp.float32),          # conv accumulator
            ]),
        compiler_params=pltpu.CompilerParams(
            dimension_semantics=("parallel", "arbitrary")),
        cost_estimate=pl.CostEstimate(
            flops=int(flops), transcendentals=0, bytes_accessed=int(bytes_accessed)),
    )(x, upwt_pad, uph_pad, w_taps, b_eff)

    # Free HBM reshape of the lane-dense flattened output back to NCHW.
    return out_flat.reshape(n, c_out, h2, w2)


def _reference(x, conv_weight, bn_gamma, bn_beta, bn_mean, bn_var, eps=1e-5):
    """Plain-JAX reference: separable bilinear 2x upsample -> 3x3 conv -> eval BN."""
    n, c_in, h, w = x.shape
    up_h = _bilinear_up2x_matrix(h)
    up_w = _bilinear_up2x_matrix(w)
    p = jnp.einsum('Hh,nchw,Ww->ncHW', up_h, x, up_w,
                   precision=jax.lax.Precision.HIGHEST)
    y = jax.lax.conv_general_dilated(
        p, conv_weight, window_strides=(1, 1), padding=((1, 1), (1, 1)),
        dimension_numbers=('NCHW', 'OIHW', 'NCHW'),
        precision=jax.lax.Precision.HIGHEST)
    scale = bn_gamma / jnp.sqrt(bn_var + eps)
    shift = bn_beta - bn_mean * scale
    return y * scale[None, :, None, None] + shift[None, :, None, None]


if __name__ == "__main__":
    key = jax.random.PRNGKey(0)
    k_x, k_w, k_g, k_b, k_m, k_v = jax.random.split(key, 6)

    # Small shapes consistent with the module (non-square spatial on purpose).
    n, c_in, c_out, h, w = 2, 4, 8, 16, 8
    x = jax.random.normal(k_x, (n, c_in, h, w), jnp.float32)

    # Conv2d weight, kaiming_normal_(a=1): gain=1, fan_in=c_in*3*3 -> std=1/sqrt(fan_in).
    conv_weight = jax.random.normal(k_w, (c_out, c_in, 3, 3), jnp.float32) / jnp.sqrt(
        jnp.float32(c_in * 9))
    # Non-trivial eval-mode BatchNorm2d parameters (exercises the folding).
    bn_gamma = 1.0 + 0.1 * jax.random.normal(k_g, (c_out,), jnp.float32)
    bn_beta = 0.1 * jax.random.normal(k_b, (c_out,), jnp.float32)
    bn_mean = 0.05 * jax.random.normal(k_m, (c_out,), jnp.float32)
    bn_var = jax.random.uniform(k_v, (c_out,), jnp.float32, 0.5, 1.5)

    # ci_tile=2 exercises the multi-step C_in reduction (grid = (N, C_in/ci_tile)).
    out = psp_upsampling_forward(x, conv_weight, bn_gamma, bn_beta, bn_mean, bn_var,
                                 ci_tile=2)
    jax.block_until_ready(out)

    assert out.shape == (n, c_out, 2 * h, 2 * w), out.shape
    ref = _reference(x, conv_weight, bn_gamma, bn_beta, bn_mean, bn_var)
    max_err = float(jnp.max(jnp.abs(out - ref)))
    assert jnp.allclose(out, ref, atol=1e-2, rtol=1e-2), max_err

    print("KERNEL_OK")
</pallas_src>

<mosaic_0001>
module attributes {stable_mosaic.version = 11 : i64} {
  func.func @_psp_kernel(%arg0: i32, %arg1: i32, %arg2: memref<1x2x16x8xf32, #tpu.memory_space<vmem>>, %arg3: memref<8x18xf32, #tpu.memory_space<vmem>>, %arg4: memref<34x16xf32, #tpu.memory_space<vmem>>, %arg5: memref<1x9x8x2xf32, #tpu.memory_space<vmem>>, %arg6: memref<8x1xf32, #tpu.memory_space<vmem>>, %arg7: memref<1x8x512xf32, #tpu.memory_space<vmem>>, %arg8: memref<2x34x18xf32, #tpu.memory_space<vmem>>, %arg9: memref<8x512xf32, #tpu.memory_space<vmem>>) attributes {dimension_semantics = [#tpu.dimension_semantics<parallel>, #tpu.dimension_semantics<arbitrary>], iteration_bounds = array<i64: 2, 2>, scalar_prefetch = 0 : i64, scratch_operands = 2 : i64, tpu.core_type = #tpu.core_type<tc>, window_params = [{transform_indices = @transform_0, window_bounds = array<i64: 1, 2, 16, 8>}, {pipeline_mode = #tpu.pipeline_mode<synchronous>, transform_indices = @transform_1, window_bounds = array<i64: 8, 18>}, {pipeline_mode = #tpu.pipeline_mode<synchronous>, transform_indices = @transform_2, window_bounds = array<i64: 34, 16>}, {transform_indices = @transform_3, window_bounds = array<i64: 1, 9, 8, 2>}, {pipeline_mode = #tpu.pipeline_mode<synchronous>, transform_indices = @transform_4, window_bounds = array<i64: 8, 1>}, {transform_indices = @transform_5, window_bounds = array<i64: 1, 8, 512>}]} {
    %c0_i32 = arith.constant 0 : i32
    %0 = arith.cmpi eq, %arg1, %c0_i32 : i32
    %1 = arith.extui %0 : i1 to i32
    %c0_i32_0 = arith.constant 0 : i32
    %2 = arith.cmpi ne, %1, %c0_i32_0 : i32
    scf.if %2 {
      %cst_81 = arith.constant 0.000000e+00 : f32
      %73 = vector.broadcast %cst_81 : f32 to vector<8x512xf32>
      %c0_82 = arith.constant 0 : index
      %c0_83 = arith.constant 0 : index
      %74 = vector.load %arg9[%c0_82, %c0_83] : memref<8x512xf32, #tpu.memory_space<vmem>>, vector<8x512xf32>
      tpu.vector_store %arg9[%c0_82, %c0_83], %73 {strides = array<i32>} : memref<8x512xf32, #tpu.memory_space<vmem>>, vector<8x512xf32>,
    } else {
    }
    %c0 = arith.constant 0 : index
    %c0_1 = arith.constant 0 : index
    %c0_2 = arith.constant 0 : index
    %c0_3 = arith.constant 0 : index
    %3 = vector.load %arg2[%c0, %c0_1, %c0_2, %c0_3] : memref<1x2x16x8xf32, #tpu.memory_space<vmem>>, vector<1x2x16x8xf32>
    %4 = vector.shape_cast %3 : vector<1x2x16x8xf32> to vector<2x16x8xf32>
    %5 = vector.shape_cast %4 : vector<2x16x8xf32> to vector<32x8xf32>
    %c0_4 = arith.constant 0 : index
    %c0_5 = arith.constant 0 : index
    %6 = vector.load %arg3[%c0_4, %c0_5] : memref<8x18xf32, #tpu.memory_space<vmem>>, vector<8x18xf32>
    %cst = arith.constant dense<0.000000e+00> : vector<32x18xf32>
    %7 = tpu.matmul %5, %6, %cst {dimension_numbers = #tpu.dot_dimension_numbers<[1], [0], [0], [1], [0, 0, 1, 1], [], []>} : vector<32x8xf32>, vector<8x18xf32>, vector<32x18xf32> -> vector<32x18xf32>
    %8 = vector.shape_cast %7 : vector<32x18xf32> to vector<2x16x18xf32>
    %c0_6 = arith.constant 0 : index
    %c0_7 = arith.constant 0 : index
    %9 = vector.load %arg4[%c0_6, %c0_7] : memref<34x16xf32, #tpu.memory_space<vmem>>, vector<34x16xf32>
    %10 = vector.shape_cast %9 : vector<34x16xf32> to vector<1x34x16xf32>
    %11 = vector.broadcast %10 : vector<1x34x16xf32> to vector<2x34x16xf32>
    "tpu.trace_start"() <{level = 10 : i32, message = "cyh,chw->cyw"}> : () -> ()
    %cst_8 = arith.constant dense<0.000000e+00> : vector<2x34x18xf32>
    %12 = tpu.matmul %11, %8, %cst_8 {dimension_numbers = #tpu.dot_dimension_numbers<[2], [1], [1], [2], [0, 0, 0, 1, 1, 2], [0], [0]>} : vector<2x34x16xf32>, vector<2x16x18xf32>, vector<2x34x18xf32> -> vector<2x34x18xf32>
    "tpu.trace_stop"() : () -> ()
    %c0_9 = arith.constant 0 : index
    %c0_10 = arith.constant 0 : index
    %c0_11 = arith.constant 0 : index
    %13 = vector.load %arg8[%c0_9, %c0_10, %c0_11] : memref<2x34x18xf32, #tpu.memory_space<vmem>>, vector<2x34x18xf32>
    tpu.vector_store %arg8[%c0_9, %c0_10, %c0_11], %12 {strides = array<i32>} : memref<2x34x18xf32, #tpu.memory_space<vmem>>, vector<2x34x18xf32>,
    %c0_12 = arith.constant 0 : index
    %c0_13 = arith.constant 0 : index
    %14 = vector.load %arg9[%c0_12, %c0_13] : memref<8x512xf32, #tpu.memory_space<vmem>>, vector<8x512xf32>
    %c0_14 = arith.constant 0 : index
    %c0_15 = arith.constant 0 : index
    %c0_16 = arith.constant 0 : index
    %15 = vector.load %arg8[%c0_14, %c0_15, %c0_16] : memref<2x34x18xf32, #tpu.memory_space<vmem>>, vector<2x32x16xf32>
    %16 = vector.shape_cast %15 : vector<2x32x16xf32> to vector<2x512xf32>
    %c0_17 = arith.constant 0 : index
    %c0_18 = arith.constant 0 : index
    %c0_19 = arith.constant 0 : index
    %c0_20 = arith.constant 0 : index
    %17 = vector.load %arg5[%c0_17, %c0_18, %c0_19, %c0_20] : memref<1x9x8x2xf32, #tpu.memory_space<vmem>>, vector<1x1x8x2xf32>
    %18 = vector.shape_cast %17 : vector<1x1x8x2xf32> to vector<8x2xf32>
    %cst_21 = arith.constant dense<0.000000e+00> : vector<8x512xf32>
    %19 = tpu.matmul %18, %16, %cst_21 {dimension_numbers = #tpu.dot_dimension_numbers<[1], [0], [0], [1], [0, 0, 1, 1], [], []>} : vector<8x2xf32>, vector<2x512xf32>, vector<8x512xf32> -> vector<8x512xf32>
    %20 = arith.addf %14, %19 : vector<8x512xf32>
    %c0_22 = arith.constant 0 : index
    %c0_23 = arith.constant 0 : index
    %c1 = arith.constant 1 : index
    %21 = vector.load %arg8[%c0_22, %c0_23, %c1] : memref<2x34x18xf32, #tpu.memory_space<vmem>>, vector<2x32x16xf32>
    %22 = vector.shape_cast %21 : vector<2x32x16xf32> to vector<2x512xf32>
    %c0_24 = arith.constant 0 : index
    %c1_25 = arith.constant 1 : index
    %c0_26 = arith.constant 0 : index
    %c0_27 = arith.constant 0 : index
    %23 = vector.load %arg5[%c0_24, %c1_25, %c0_26, %c0_27] : memref<1x9x8x2xf32, #tpu.memory_space<vmem>>, vector<1x1x8x2xf32>
    %24 = vector.shape_cast %23 : vector<1x1x8x2xf32> to vector<8x2xf32>
    %cst_28 = arith.constant dense<0.000000e+00> : vector<8x512xf32>
    %25 = tpu.matmul %24, %22, %cst_28 {dimension_numbers = #tpu.dot_dimension_numbers<[1], [0], [0], [1], [0, 0, 1, 1], [], []>} : vector<8x2xf32>, vector<2x512xf32>, vector<8x512xf32> -> vector<8x512xf32>
    %26 = arith.addf %20, %25 : vector<8x512xf32>
    %c0_29 = arith.constant 0 : index
    %c0_30 = arith.constant 0 : index
    %c2 = arith.constant 2 : index
    %27 = vector.load %arg8[%c0_29, %c0_30, %c2] : memref<2x34x18xf32, #tpu.memory_space<vmem>>, vector<2x32x16xf32>
    %28 = vector.shape_cast %27 : vector<2x32x16xf32> to vector<2x512xf32>
    %c0_31 = arith.constant 0 : index
    %c2_32 = arith.constant 2 : index
    %c0_33 = arith.constant 0 : index
    %c0_34 = arith.constant 0 : index
    %29 = vector.load %arg5[%c0_31, %c2_32, %c0_33, %c0_34] : memref<1x9x8x2xf32, #tpu.memory_space<vmem>>, vector<1x1x8x2xf32>
    %30 = vector.shape_cast %29 : vector<1x1x8x2xf32> to vector<8x2xf32>
    %cst_35 = arith.constant dense<0.000000e+00> : vector<8x512xf32>
    %31 = tpu.matmul %30, %28, %cst_35 {dimension_numbers = #tpu.dot_dimension_numbers<[1], [0], [0], [1], [0, 0, 1, 1], [], []>} : vector<8x2xf32>, vector<2x512xf32>, vector<8x512xf32> -> vector<8x512xf32>
    %32 = arith.addf %26, %31 : vector<8x512xf32>
    %c0_36 = arith.constant 0 : index
    %c1_37 = arith.constant 1 : index
    %c0_38 = arith.constant 0 : index
    %33 = vector.load %arg8[%c0_36, %c1_37, %c0_38] : memref<2x34x18xf32, #tpu.memory_space<vmem>>, vector<2x32x16xf32>
    %34 = vector.shape_cast %33 : vector<2x32x16xf32> to vector<2x512xf32>
    %c0_39 = arith.constant 0 : index
    %c3 = arith.constant 3 : index
    %c0_40 = arith.constant 0 : index
    %c0_41 = arith.constant 0 : index
    %35 = vector.load %arg5[%c0_39, %c3, %c0_40, %c0_41] : memref<1x9x8x2xf32, #tpu.memory_space<vmem>>, vector<1x1x8x2xf32>
    %36 = vector.shape_cast %35 : vector<1x1x8x2xf32> to vector<8x2xf32>
    %cst_42 = arith.constant dense<0.000000e+00> : vector<8x512xf32>
    %37 = tpu.matmul %36, %34, %cst_42 {dimension_numbers = #tpu.dot_dimension_numbers<[1], [0], [0], [1], [0, 0, 1, 1], [], []>} : vector<8x2xf32>, vector<2x512xf32>, vector<8x512xf32> -> vector<8x512xf32>
    %38 = arith.addf %32, %37 : vector<8x512xf32>
    %c0_43 = arith.constant 0 : index
    %c1_44 = arith.constant 1 : index
    %c1_45 = arith.constant 1 : index
    %39 = vector.load %arg8[%c0_43, %c1_44, %c1_45] : memref<2x34x18xf32, #tpu.memory_space<vmem>>, vector<2x32x16xf32>
    %40 = vector.shape_cast %39 : vector<2x32x16xf32> to vector<2x512xf32>
    %c0_46 = arith.constant 0 : index
    %c4 = arith.constant 4 : index
    %c0_47 = arith.constant 0 : index
    %c0_48 = arith.constant 0 : index
    %41 = vector.load %arg5[%c0_46, %c4, %c0_47, %c0_48] : memref<1x9x8x2xf32, #tpu.memory_space<vmem>>, vector<1x1x8x2xf32>
    %42 = vector.shape_cast %41 : vector<1x1x8x2xf32> to vector<8x2xf32>
    %cst_49 = arith.constant dense<0.000000e+00> : vector<8x512xf32>
    %43 = tpu.matmul %42, %40, %cst_49 {dimension_numbers = #tpu.dot_dimension_numbers<[1], [0], [0], [1], [0, 0, 1, 1], [], []>} : vector<8x2xf32>, vector<2x512xf32>, vector<8x512xf32> -> vector<8x512xf32>
    %44 = arith.addf %38, %43 : vector<8x512xf32>
    %c0_50 = arith.constant 0 : index
    %c1_51 = arith.constant 1 : index
    %c2_52 = arith.constant 2 : index
    %45 = vector.load %arg8[%c0_50, %c1_51, %c2_52] : memref<2x34x18xf32, #tpu.memory_space<vmem>>, vector<2x32x16xf32>
    %46 = vector.shape_cast %45 : vector<2x32x16xf32> to vector<2x512xf32>
    %c0_53 = arith.constant 0 : index
    %c5 = arith.constant 5 : index
    %c0_54 = arith.constant 0 : index
    %c0_55 = arith.constant 0 : index
    %47 = vector.load %arg5[%c0_53, %c5, %c0_54, %c0_55] : memref<1x9x8x2xf32, #tpu.memory_space<vmem>>, vector<1x1x8x2xf32>
    %48 = vector.shape_cast %47 : vector<1x1x8x2xf32> to vector<8x2xf32>
    %cst_56 = arith.constant dense<0.000000e+00> : vector<8x512xf32>
    %49 = tpu.matmul %48, %46, %cst_56 {dimension_numbers = #tpu.dot_dimension_numbers<[1], [0], [0], [1], [0, 0, 1, 1], [], []>} : vector<8x2xf32>, vector<2x512xf32>, vector<8x512xf32> -> vector<8x512xf32>
    %50 = arith.addf %44, %49 : vector<8x512xf32>
    %c0_57 = arith.constant 0 : index
    %c2_58 = arith.constant 2 : index
    %c0_59 = arith.constant 0 : index
    %51 = vector.load %arg8[%c0_57, %c2_58, %c0_59] : memref<2x34x18xf32, #tpu.memory_space<vmem>>, vector<2x32x16xf32>
    %52 = vector.shape_cast %51 : vector<2x32x16xf32> to vector<2x512xf32>
    %c0_60 = arith.constant 0 : index
    %c6 = arith.constant 6 : index
    %c0_61 = arith.constant 0 : index
    %c0_62 = arith.constant 0 : index
    %53 = vector.load %arg5[%c0_60, %c6, %c0_61, %c0_62] : memref<1x9x8x2xf32, #tpu.memory_space<vmem>>, vector<1x1x8x2xf32>
    %54 = vector.shape_cast %53 : vector<1x1x8x2xf32> to vector<8x2xf32>
    %cst_63 = arith.constant dense<0.000000e+00> : vector<8x512xf32>
    %55 = tpu.matmul %54, %52, %cst_63 {dimension_numbers = #tpu.dot_dimension_numbers<[1], [0], [0], [1], [0, 0, 1, 1], [], []>} : vector<8x2xf32>, vector<2x512xf32>, vector<8x512xf32> -> vector<8x512xf32>
    %56 = arith.addf %50, %55 : vector<8x512xf32>
    %c0_64 = arith.constant 0 : index
    %c2_65 = arith.constant 2 : index
    %c1_66 = arith.constant 1 : index
    %57 = vector.load %arg8[%c0_64, %c2_65, %c1_66] : memref<2x34x18xf32, #tpu.memory_space<vmem>>, vector<2x32x16xf32>
    %58 = vector.shape_cast %57 : vector<2x32x16xf32> to vector<2x512xf32>
    %c0_67 = arith.constant 0 : index
    %c7 = arith.constant 7 : index
    %c0_68 = arith.constant 0 : index
    %c0_69 = arith.constant 0 : index
    %59 = vector.load %arg5[%c0_67, %c7, %c0_68, %c0_69] : memref<1x9x8x2xf32, #tpu.memory_space<vmem>>, vector<1x1x8x2xf32>
    %60 = vector.shape_cast %59 : vector<1x1x8x2xf32> to vector<8x2xf32>
    %cst_70 = arith.constant dense<0.000000e+00> : vector<8x512xf32>
    %61 = tpu.matmul %60, %58, %cst_70 {dimension_numbers = #tpu.dot_dimension_numbers<[1], [0], [0], [1], [0, 0, 1, 1], [], []>} : vector<8x2xf32>, vector<2x512xf32>, vector<8x512xf32> -> vector<8x512xf32>
    %62 = arith.addf %56, %61 : vector<8x512xf32>
    %c0_71 = arith.constant 0 : index
    %c2_72 = arith.constant 2 : index
    %c2_73 = arith.constant 2 : index
    %63 = vector.load %arg8[%c0_71, %c2_72, %c2_73] : memref<2x34x18xf32, #tpu.memory_space<vmem>>, vector<2x32x16xf32>
    %64 = vector.shape_cast %63 : vector<2x32x16xf32> to vector<2x512xf32>
    %c0_74 = arith.constant 0 : index
    %c8 = arith.constant 8 : index
    %c0_75 = arith.constant 0 : index
    %c0_76 = arith.constant 0 : index
    %65 = vector.load %arg5[%c0_74, %c8, %c0_75, %c0_76] : memref<1x9x8x2xf32, #tpu.memory_space<vmem>>, vector<1x1x8x2xf32>
    %66 = vector.shape_cast %65 : vector<1x1x8x2xf32> to vector<8x2xf32>
    %cst_77 = arith.constant dense<0.000000e+00> : vector<8x512xf32>
    %67 = tpu.matmul %66, %64, %cst_77 {dimension_numbers = #tpu.dot_dimension_numbers<[1], [0], [0], [1], [0, 0, 1, 1], [], []>} : vector<8x2xf32>, vector<2x512xf32>, vector<8x512xf32> -> vector<8x512xf32>
    %68 = arith.addf %62, %67 : vector<8x512xf32>
    %c0_78 = arith.constant 0 : index
    %c0_79 = arith.constant 0 : index
    %69 = vector.load %arg9[%c0_78, %c0_79] : memref<8x512xf32, #tpu.memory_space<vmem>>, vector<8x512xf32>
    tpu.vector_store %arg9[%c0_78, %c0_79], %68 {strides = array<i32>} : memref<8x512xf32, #tpu.memory_space<vmem>>, vector<8x512xf32>,
    %c1_i32 = arith.constant 1 : i32
    %70 = arith.cmpi eq, %arg1, %c1_i32 : i32
    %71 = arith.extui %70 : i1 to i32
    %c0_i32_80 = arith.constant 0 : i32
    %72 = arith.cmpi ne, %71, %c0_i32_80 : i32
    scf.if %72 {
      %c0_81 = arith.constant 0 : index
      %c0_82 = arith.constant 0 : index
      %73 = vector.load %arg6[%c0_81, %c0_82] : memref<8x1xf32, #tpu.memory_space<vmem>>, vector<8x1xf32>
      %74 = vector.broadcast %73 : vector<8x1xf32> to vector<8x512xf32>
      %75 = arith.addf %68, %74 : vector<8x512xf32>
      %c0_83 = arith.constant 0 : index
      %c0_84 = arith.constant 0 : index
      %c0_85 = arith.constant 0 : index
      %76 = vector.load %arg7[%c0_83, %c0_84, %c0_85] : memref<1x8x512xf32, #tpu.memory_space<vmem>>, vector<1x8x512xf32>
      %77 = vector.shape_cast %76 : vector<1x8x512xf32> to vector<8x512xf32>
      %78 = vector.shape_cast %75 : vector<8x512xf32> to vector<1x8x512xf32>
      tpu.vector_store %arg7[%c0_83, %c0_84, %c0_85], %78 {strides = array<i32>} : memref<1x8x512xf32, #tpu.memory_space<vmem>>, vector<1x8x512xf32>,
    } else {
    }
    return
  }
  func.func @transform_0(%arg0: i32, %arg1: i32) -> (i32, i32, i32, i32) {
    %c0_i32 = arith.constant 0 : i32
    %c0_i32_0 = arith.constant 0 : i32
    %c0_i32_1 = arith.constant 0 : i32
    return %arg0, %arg1, %c0_i32, %c0_i32_0 : i32, i32, i32, i32
  }
  func.func @transform_1(%arg0: i32, %arg1: i32) -> (i32, i32) {
    %c0_i32 = arith.constant 0 : i32
    %c0_i32_0 = arith.constant 0 : i32
    %c0_i32_1 = arith.constant 0 : i32
    return %c0_i32, %c0_i32_0 : i32, i32
  }
  func.func @transform_2(%arg0: i32, %arg1: i32) -> (i32, i32) {
    %c0_i32 = arith.constant 0 : i32
    %c0_i32_0 = arith.constant 0 : i32
    %c0_i32_1 = arith.constant 0 : i32
    return %c0_i32, %c0_i32_0 : i32, i32
  }
  func.func @transform_3(%arg0: i32, %arg1: i32) -> (i32, i32, i32, i32) {
    %c0_i32 = arith.constant 0 : i32
    %c0_i32_0 = arith.constant 0 : i32
    %c0_i32_1 = arith.constant 0 : i32
    %c0_i32_2 = arith.constant 0 : i32
    return %arg1, %c0_i32, %c0_i32_0, %c0_i32_1 : i32, i32, i32, i32
  }
  func.func @transform_4(%arg0: i32, %arg1: i32) -> (i32, i32) {
    %c0_i32 = arith.constant 0 : i32
    %c0_i32_0 = arith.constant 0 : i32
    %c0_i32_1 = arith.constant 0 : i32
    return %c0_i32, %c0_i32_0 : i32, i32
  }
  func.func @transform_5(%arg0: i32, %arg1: i32) -> (i32, i32, i32) {
    %c0_i32 = arith.constant 0 : i32
    %c0_i32_0 = arith.constant 0 : i32
    %c0_i32_1 = arith.constant 0 : i32
    return %arg0, %c0_i32, %c0_i32_0 : i32, i32, i32
  }
}

</mosaic_0001>

<bundles_post_ra>
// kernel: psp_upsampling_forward.1
= control target key start
LH: loop header
LB: loop body
LE: loop exit
PB: predicated region body
PF: predicated region fallthrough
CT: control target
= control target key end

     0   :  { %s6387_s18 = smov 0   ;;  %s6389_s19 = smov 0   ;;  %s9157_s0 = inlined_call_operand.vmem [shape: f32[2,4,16,8], index: 0, kind: input, shape index: {}]   ;;  %s9158_s1 = inlined_call_operand.vmem [shape: f32[8,18], index: 1, kind: input, shape index: {}]   ;;  %s9159_s2 = inlined_call_operand.vmem [shape: f32[34,16], index: 2, kind: input, shape index: {}]   ;;  %s9160_s3 = inlined_call_operand.vmem [shape: f32[2,9,8,2], index: 3, kind: input, shape index: {}]   ;;  %s9161_s4 = inlined_call_operand.vmem [shape: f32[8,1], index: 4, kind: input, shape index: {}]   ;;  %s9162_s5 = inlined_call_operand.vmem [shape: f32[2,8,512], index: 5, kind: output, shape index: {}]  }
   0x1   :  { %s6391_s20 = smov 0   ;;  %s6393_s21 = smov 0  }
   0x2   :  { %s6395_s22 = smov 0  }
   0x3 LB: > { %s24_s23 = sadd.s32 1, %s6332_s20  ;;  %s27_s24 = sadd.s32 1, %s6336_s21  ;;  %s6340_s22 = sphi %s6395_s22, %s15_s22   ;;  %s6336_s21 = sphi %s6393_s21, %s9537_s21   ;;  %s6332_s20 = sphi %s6391_s20, %s9536_s20   ;;  %s6328_s19 = sphi %s6389_s19, %s9535_s19   ;;  %s6324_s18 = sphi %s6387_s18, %s9534_s18  }
   0x4   : > { %p25_p0 = scmp.ge.s32.totalorder %s24_s23, 2  ;;  %p6091_p1 = scmp.ge.s32.totalorder %s6340_s22, 1 }
   0x5   : > { %p217_p2 = scmp.lt.s32.totalorder %s6340_s22, 5 }
   0x6   : > { %s9539_s23 = smov (%p25_p0, %s24_s23), 0  ;;  %s9541_s24 = smov (!%p25_p0, %s27_s24), %s6336_s21 }
   0x7   : > { %p218_p3 = pnand %p6091_p1, %p217_p2  ;;  %p29_p4 = scmp.ge.s32.totalorder %s9541_s24, 2 }
   0x9   : > { %s9543_s24 = smov (%p29_p4, %s9541_s24), 0  ;;  %221 = sbr.rel (%p218_p3) target bundleno = 1478 (0x5c6), region = 40 }
   0xe   : > { %s6092_s25 = sshll.u32 %s6324_s18, 1  ;;  %p256_p5 = scmp.lt.s32.totalorder %s6328_s19, 1 }
   0xf   : > { %p258_p6 = scmp.lt.s32.totalorder %s6092_s25, 3  ;;  %p266_p7 = scmp.lt.s32.totalorder %s6324_s18, 1 }
  0x10   : > { %s9545_s19 = smov (!%p256_p5, %s6328_s19), 1  ;;  %p6099_p8 = scmp.ne.s32.totalorder %s6324_s18, 0 }
  0x11   : > { %s9547_s25 = smov (!%p258_p6, %s6092_s25), 3  ;;  %s6094_s26 = sshll.u32 %s9545_s19, 3 }
  0x12   : > { %s6179_s27 = sshll.u32 %s9545_s19, 5  ;;  %s6093_s28 = sshll.u32 %s9547_s25, 1 }
  0x13   : > { %s6424_s6 = scalar_lea.vmem %s9162_s5, %s6179_s27  ;;  %s262_s7 = sadd.s32 %s6094_s26, %s6093_s28 }
  0x14   : > { %s6095_s8 = sshll.u32 %s262_s7, 3 }
  0x15   : > { %s264_s11 = scalar_lea.vmem %s9157_s0, %s6095_s8 }
  0x16   : > { %s267_s12 = scalar_select %p266_p7, %s6324_s18, 1 }
  0x17   : > { %279 = sbr.rel (%p6099_p8) target bundleno = 31 (0x1f), region = 44 }
  0x18   : > { %s6245_s13 = smul.u32 72, %s267_s12 }
  0x1a   : > { %s6433_s16 = scalar_lea.vmem %s9160_s3, %s6245_s13 }
  0x1c   : > { %v6342_v0 = vmov 0.0  }
  0x1d   : > { %280 = vst [vmem:[#allocation3 + $0x10] sm:$0xff] %v6342_v0  ;;  %281 = vst [vmem:[#allocation3] sm:$0xff] %v6342_v0 }
  0x1e   : > { %282 = vst [vmem:[#allocation3 + $0x18] sm:$0xff] %v6342_v0  ;;  %283 = vst [vmem:[#allocation3 + $0x8] sm:$0xff] %v6342_v0 }
  0x1f PF: > { %v288_v1 = vld [vmem:[%s9158_s1] sm:$0xff]  ;;  %vm289_vm0 = vcmask 64512   ;;  %v285_v3 = vld [vmem:[%s264_s11 + $0x8] sm:$0xff]  ;;  %v286_v4 = vld [vmem:[%s264_s11 + $0x10] sm:$0xff]  ;;  %v9167_v6 = vmov 0.0   ;;  %vm6344_vm1 = vmmov 0   ;;  %v616_v32 = vlaneseq }
  0x20   : > { %v284_v2 = vld [vmem:[%s264_s11] sm:$0xff]  ;;  %6199 = vmatprep.subr.mxu0 %v288_v1  ;;  %v287_v5 = vld [vmem:[%s264_s11 + $0x18] sm:$0xff]  ;;  %6207 = vmatprep.subr.mxu1 %v9167_v6  ;;  %vm392_vm2 = vcmask 130048   ;;  %v388_v11 = vld [vmem:[%s9159_s2 + $0x8] sm:$0xff]  ;;  %vm588_vm3 = vcmask 146432   ;;  %s6345_s11 = smov 127  }
  0x21   : > { %6201 = vmatprep.mubr.msk.f32.mxu0 %vm289_vm0, %v284_v2  ;;  %6200 = vmatpush3.msra.mxu0 %v288_v1  ;;  %v387_v8 = vld [vmem:[%s9159_s2] sm:$0xff]  ;;  %v389_v13 = vld [vmem:[%s9159_s2 + $0x10] sm:$0xff]  ;;  %v390_v14 = vld [vmem:[%s9159_s2 + $0x18] sm:$0xff]  ;;  %s6346_s12 = smov 126   ;;  %v6347_v30 = vmov 1983009808  }
  0x22   : > { %6202 = vmatmul.mubr.msk.f32.vlgmr.msra.gmra.mxu0 %vm289_vm0, %v285_v3  ;;  %6226 = vmatprep.subr.mxu0 %v9167_v6  ;;  %v391_v15 = vld [vmem:[%s9159_s2 + $0x20] sm:$0x3]  ;;  %v614_v31 = vunpack.c.l.s4 %v6347_v30  ;;  %vm593_vm4 = vcmask 140288   ;;  %v617_v39 = vshrl.u32 %v616_v32, 7  ;;  %v6348_v40 = vmov 1934713408  }
  0x23   : > { %6204 = vmatprep.mubr.msk.f32.mxu0 %vm289_vm0, %v286_v4  ;;  %6211 = vmatprep.mubr.msk.f32.mxu1 %vm6344_vm1, %v9167_v6  ;;  %v645_v41 = vunpack.c.l.s4 %v6348_v40  ;;  %s6349_s13 = smov 32   ;;  %s6350_s14 = smov 16   ;;  %vm989_vm5 = vcmask 261120   ;;  %vm991_vm6 = vcmask 392192   ;;  %vm993_vm7 = vcmask 523264  }
  0x24   : > { %v615_v38 = vunpack.c.0.s8 %v614_v31  ;;  %s6351_s15 = smov 80   ;;  %s6352_s17 = smov 112   ;;  %vm995_vm8 = vcmask 654336   ;;  %vm997_vm9 = vcmask 785408   ;;  %vm999_vm10 = vcmask 916480  }
  0x25   : > { %v646_v49 = vunpack.c.0.s8 %v645_v41  ;;  %s6353_s19 = smov 48   ;;  %s6354_s25 = smov 64   ;;  %vm1027_vm11 = vcmask 1041408   ;;  %vm1023_vm12 = vcmask 15360  }
  0x26   : > { %6205 = vmatmul.mubr.msk.f32.gmra.mxu0 %vm289_vm0, %v287_v5  ;;  %v6521_v46 = vsub.s32 %v615_v38, %v617_v39  ;;  %s6355_s26 = smov 96   ;;  %p6176_p9 = scmp.ne.s32.totalorder %s6324_s18, 1 }
  0x27   : > { %6230 = vmatprep.mubr.msk.f32.mxu0 %vm6344_vm1, %v9167_v6  ;;  %v6541_v58 = vsub.s32 %v646_v49, %v617_v39 }
  0xe2   : > { %v6203_v7 = vpop.f32.mrf.mxu0 }
  0xe3   : > { %6208 = vmatpush3.msra.mxu1 %v6203_v7 }
  0xe4   : > { %v368_v9 = vpop.f32.mrf.mxu0  ;;  %6209 = vmatprep.subr.mxu1 %v9167_v6 }
  0xe5   : > { %6210 = vmatpush3.msra.mxu1 %v368_v9 }
  0xe6   : > { %v6206_v10 = vpop.f32.mrf.mxu0  ;;  %6212 = vmatmul.mubr.msk.f32.vlgmr.msra.gmra.mxu1 %vm392_vm2, %v387_v8 }
  0xe7   : > { %6227 = vmatpush3.msra.mxu0 %v6206_v10  ;;  %6214 = vmatprep.mubr.msk.f32.mxu1 %vm6344_vm1, %v9167_v6 }
  0xe8   : > { %v378_v12 = vpop.f32.mrf.mxu0  ;;  %6228 = vmatprep.subr.mxu0 %v9167_v6 }
  0xe9   : > { %6229 = vmatpush3.msra.mxu0 %v378_v12 }
  0xea   : > { %6215 = vmatmul.mubr.msk.f32.gmra.mxu1 %vm392_vm2, %v388_v11  ;;  %6231 = vmatmul.mubr.msk.f32.vlgmr.msra.gmra.mxu0 %vm392_vm2, %v387_v8 }
  0xeb   : > { %6217 = vmatprep.mubr.msk.f32.mxu1 %vm6344_vm1, %v9167_v6  ;;  %6233 = vmatprep.mubr.msk.f32.mxu0 %vm6344_vm1, %v9167_v6 }
  0xee   : > { %6218 = vmatmul.mubr.msk.f32.gmra.mxu1 %vm392_vm2, %v389_v13  ;;  %6234 = vmatmul.mubr.msk.f32.gmra.mxu0 %vm392_vm2, %v388_v11 }
  0xef   : > { %6236 = vmatprep.mubr.msk.f32.mxu0 %vm6344_vm1, %v9167_v6  ;;  %6220 = vmatprep.mubr.msk.f32.mxu1 %vm6344_vm1, %v9167_v6 }
  0xf2   : > { %6237 = vmatmul.mubr.msk.f32.gmra.mxu0 %vm392_vm2, %v389_v13  ;;  %6221 = vmatmul.mubr.msk.f32.gmra.mxu1 %vm392_vm2, %v390_v14 }
  0xf3   : > { %6239 = vmatprep.mubr.msk.f32.mxu0 %vm6344_vm1, %v9167_v6  ;;  %6223 = vmatprep.mubr.msk.f32.mxu1 %vm6344_vm1, %v9167_v6 }
  0xf6   : > { %6240 = vmatmul.mubr.msk.f32.gmra.mxu0 %vm392_vm2, %v390_v14  ;;  %6224 = vmatmul.mubr.msk.f32.gmra.mxu1 %vm392_vm2, %v391_v15 }
  0xf7   : > { %6242 = vmatprep.mubr.msk.f32.mxu0 %vm6344_vm1, %v9167_v6  ;;  %1104 = vmatprep.mubr.f32.mxu1 %v9167_v6 }
  0xfa   : > { %6243 = vmatmul.mubr.msk.f32.gmra.mxu0 %vm392_vm2, %v391_v15 }
  0xfb   : > { %1711 = vmatprep.mubr.f32.mxu0 %v9167_v6 }
 0x1a6   : > { %v474_v16 = vpop.f32.mrf.mxu1 }
 0x1a7   : > { %589 = vst.msk [vmem:[#allocation2] sm:$0xff] %vm588_vm3, %v474_v16 }
 0x1a8   : > { %v6213_v17 = vpop.f32.mrf.mxu1 }
 0x1aa   : > { %v479_v18 = vpop.f32.mrf.mxu1  ;;  %v564_v19 = vpop.f32.mrf.mxu0 }
 0x1ab   : > { %590 = vst.msk [vmem:[#allocation2 + $0x8] sm:$0xff] %vm588_vm3, %v479_v18  ;;  %595 = vst.msk [vmem:[#allocation2 + $0x28] sm:$0xff] %vm588_vm3, %v564_v19 }
 0x1ac   : > { %v6216_v20 = vpop.f32.mrf.mxu1  ;;  %v6232_v21 = vpop.f32.mrf.mxu0 }
 0x1ae   : > { %v484_v22 = vpop.f32.mrf.mxu1  ;;  %v569_v23 = vpop.f32.mrf.mxu0  ;;  %v6493_v24 = vld [vmem:[#allocation2] sm:$0xff] }
 0x1af   : > { %591 = vst.msk [vmem:[#allocation2 + $0x10] sm:$0xff] %vm588_vm3, %v484_v22  ;;  %596 = vst.msk [vmem:[#allocation2 + $0x30] sm:$0xff] %vm588_vm3, %v569_v23  ;;  %1202 = vrot.lane.b32.xlu0 %v6493_v24, %s6345_s11  ;;  %v619_v55 = vrot.slane %v6493_v24, %v6521_v46 }
 0x1b0   : > { %v6235_v25 = vpop.f32.mrf.mxu0  ;;  %v6219_v26 = vpop.f32.mrf.mxu1 }
 0x1b1   : > { %v612_v26 = vcombine.high %v6493_v24, %v9167_v6 }
 0x1b2   : > { %v574_v27 = vpop.f32.mrf.mxu0  ;;  %v6499_v28 = vld [vmem:[#allocation2 + $0x8] sm:$0xff]  ;;  %v489_v29 = vpop.f32.mrf.mxu1 }
 0x1b3   : > { %597 = vst.msk [vmem:[#allocation2 + $0x38] sm:$0xff] %vm588_vm3, %v574_v27  ;;  %1809 = vrot.lane.b32.xlu0 %v6493_v24, %s6346_s12  ;;  %1204 = vrot.lane.b32.xlu1 %v6499_v28, %s6345_s11  ;;  %592 = vst.msk [vmem:[#allocation2 + $0x18] sm:$0xff] %vm588_vm3, %v489_v29  ;;  %v6507_v35 = vld [vmem:[#allocation2 + $0x28] sm:$0xff]  ;;  %v626_v29 = vrot.slane %v612_v26, %v6521_v46 }
 0x1b4   : > { %v6238_v33 = vpop.f32.mrf.mxu0  ;;  %v6222_v34 = vpop.f32.mrf.mxu1  ;;  %v6515_v44 = vld [vmem:[#allocation2 + $0x1] sm:$0xff]  ;;  %v634_v51 = vrot.slane %v6507_v35, %v6521_v46  ;;  %v627_v23 = vcombine.high %v6507_v35, %v9167_v6 }
 0x1b5   : > { %v6524_v48 = vld [vmem:[#allocation2 + $0x2] sm:$0xff]  ;;  %v2408_v54 = vcombine.high %v6515_v44, %v9167_v6 }
 0x1b6   : > { %v579_v36 = vpop.f32.mrf.mxu0  ;;  %v494_v37 = vpop.f32.mrf.mxu1  ;;  %v1188_v47 = vld [vmem:[#allocation2 + $0x10] sm:$0xff]  ;;  %v4197_v57 = vcombine.high %v6524_v48, %v9167_v6  ;;  %v643_v60 = vcombine.high %v619_v55, %v634_v51  ;;  %v642_v61 = vcombine.low %v619_v55, %v634_v51  ;;  %v641_v27 = vrot.slane %v627_v23, %v6521_v46 }
 0x1b7   : > { %1811 = vrot.lane.b32.xlu1 %v6499_v28, %s6346_s12  ;;  %1210 = vrot.lane.b32.xlu0 %v6507_v35, %s6345_s11  ;;  %598 = vst.msk [vmem:[#allocation2 + $0x40] sm:$0xff] %vm588_vm3, %v579_v36  ;;  %v6528_v52 = vld [vmem:[#allocation2 + $0x29] sm:$0xff]  ;;  %v6548_v63 = vrot.slane %v1188_v47, %v6521_v46  ;;  %v6551_v0 = vrot.slane %v2408_v54, %v6521_v46 }
 0x1b8   : > { %594 = vst.msk [vmem:[#allocation2 + $0x20] sm:$0x3] %vm593_vm4, %v494_v37  ;;  %v6241_v42 = vpop.f32.mrf.mxu0  ;;  %v6225_v43 = vpop.f32.mrf.mxu1  ;;  %v6530_v53 = vld [vmem:[#allocation2 + $0x2a] sm:$0xff]  ;;  %v2423_v59 = vcombine.high %v6528_v52, %v9167_v6  ;;  %v6563_v3 = vrot.slane %v4197_v57, %v6521_v46  ;;  %v6575_v9 = vrot.slane %v643_v60, %v6541_v58  ;;  %v6578_v10 = vrot.slane %v642_v61, %v6541_v58 }
 0x1b9   : > { %v4212_v62 = vcombine.high %v6530_v53, %v9167_v6  ;;  %v744_v13 = vcombine.high %v1188_v47, %v9167_v6  ;;  %v1191_v18 = vld [vmem:[#allocation2 + $0x30] sm:$0xff]  ;;  %v658_v30 = vcombine.low %v626_v29, %v641_v27  ;;  %v659_v32 = vcombine.high %v626_v29, %v641_v27 }
 0x1ba   : > { %v584_v45 = vpop.f32.mrf.mxu0  ;;  %v1192_v56 = vld [vmem:[#allocation2 + $0x38] sm:$0xff]  ;;  %v6554_v1 = vrot.slane %v2423_v59, %v6521_v46  ;;  %v674_v14 = vcombine.high %v6578_v10, %v9167_v6  ;;  %v6608_v22 = vld [vmem:[#allocation2 + $0x9] sm:$0xff]  ;;  %v700_v36 = vrot.slane %v1191_v18, %v6521_v46  ;;  %v685_v37 = vrot.slane %v6499_v28, %v6521_v46 }
 0x1bb   : > { %2991 = vrot.lane.b32.xlu1 %v6515_v44, %s6345_s11  ;;  %1817 = vrot.lane.b32.xlu0 %v6507_v35, %s6346_s12  ;;  %599 = vst.msk [vmem:[#allocation2 + $0x48] sm:$0x3] %vm593_vm4, %v584_v45  ;;  %v6557_v2 = vrot.slane %v1192_v56, %v6521_v46  ;;  %v6566_v4 = vrot.slane %v4212_v62, %v6521_v46  ;;  %v6615_v25 = vld [vmem:[#allocation2 + $0x11] sm:$0xff] }
 0x1bc   : > { %v6244_v50 = vpop.f32.mrf.mxu0  ;;  %v2454_v5 = vcombine.low %v6551_v0, %v6554_v1  ;;  %v2455_v7 = vcombine.high %v6551_v0, %v6554_v1  ;;  %v6592_v15 = vrot.slane %v744_v13, %v6521_v46  ;;  %v759_v16 = vcombine.high %v1192_v56, %v9167_v6  ;;  %v6629_v31 = vld [vmem:[#allocation2 + $0x12] sm:$0xff]  ;;  %v6636_v33 = vld [vmem:[#allocation2 + $0xa] sm:$0xff] }
 0x1bd   : > { %v775_v8 = vcombine.high %v6548_v63, %v6557_v2  ;;  %v4243_v11 = vcombine.low %v6563_v3, %v6566_v4  ;;  %v4244_v12 = vcombine.high %v6563_v3, %v6566_v4  ;;  %v774_v17 = vcombine.low %v6548_v63, %v6557_v2  ;;  %v6703_v62 = vld [vmem:[#allocation2 + $0x18] sm:$0xff] }
 0x1be   : > { %v6600_v19 = vrot.slane %v759_v16, %v6521_v46  ;;  %v666_v24 = vrot.slane %v658_v30, %v6541_v58  ;;  %v673_v35 = vrot.slane %v659_v32, %v6541_v58  ;;  %v709_v39 = vcombine.high %v685_v37, %v700_v36  ;;  %v6712_v13 = vld [vmem:[#allocation2 + $0x31] sm:$0xff]  ;;  %v6717_v16 = vld [vmem:[#allocation2 + $0x39] sm:$0xff] }
 0x1bf   : > { %3598 = vrot.lane.b32.xlu1 %v6515_v44, %s6346_s12  ;;  %1206 = vrot.lane.b32.xlu0 %v1188_v47, %s6345_s11  ;;  %v6653_v40 = vrot.slane %v6530_v53, %v6521_v46  ;;  %v693_v41 = vcombine.high %v1191_v18, %v9167_v6  ;;  %v6661_v42 = vrot.slane %v6524_v48, %v6521_v46  ;;  %v6735_v27 = vld [vmem:[#allocation2 + $0x1a] sm:$0xff] }
 0x1c0   : > { %v790_v20 = vcombine.low %v6592_v15, %v6600_v19  ;;  %v791_v21 = vcombine.high %v6592_v15, %v6600_v19  ;;  %v676_v34 = vcombine.high %v666_v24, %v9167_v6  ;;  %v677_v38 = vcombine.high %v673_v35, %v9167_v6  ;;  %v6742_v30 = vld [vmem:[#allocation2 + $0x3a] sm:$0xff] }
 0x1c1   : > { %v678_v43 = vcombine.high %v6499_v28, %v9167_v6  ;;  %v723_v45 = vrot.slane %v709_v39, %v6541_v58  ;;  %v707_v49 = vrot.slane %v693_v41, %v6521_v46  ;;  %v2430_v54 = vrot.slane %v6528_v52, %v6521_v46 }
 0x1c2   : > { %v708_v23 = vcombine.low %v685_v37, %v700_v36  ;;  %v4227_v32 = vcombine.low %v6661_v42, %v6653_v40  ;;  %v6758_v36 = vld [vmem:[#allocation2 + $0x40] sm:$0xff] }
 0x1c3   : > { %4780 = vrot.lane.b32.xlu1 %v6524_v48, %s6345_s11  ;;  %1813 = vrot.lane.b32.xlu0 %v1188_v47, %s6346_s12  ;;  %v4228_v47 = vcombine.high %v6661_v42, %v6653_v40  ;;  %v692_v50 = vrot.slane %v678_v43, %v6521_v46  ;;  %v2462_v43 = vrot.slane %v2454_v5, %v6541_v58 }
 0x1c4   : > { %v6733_v26 = vrot.slane %v708_v23, %v6541_v58 }
 0x1c5   : > { %v6676_v51 = vrot.slane %v4228_v47, %v6541_v58  ;;  %v724_v28 = vcombine.low %v692_v50, %v707_v49 }
 0x1c6   : > { %v740_v29 = vcombine.high %v6733_v26, %v9167_v6 }
 0x1c7   : > { %5387 = vrot.lane.b32.xlu1 %v6524_v48, %s6346_s12  ;;  %881 = vrot.lane.b32.xlu0 %v6575_v9, %s6349_s13  ;;  %v675_v48 = vcombine.high %v6575_v9, %v9167_v6  ;;  %v6686_v55 = vrot.slane %v724_v28, %v6541_v58  ;;  %v4260_v42 = vcombine.high %v6676_v51, %v9167_v6 }
 0x1c8   : > { %v2496_v28 = vrot.slane %v6712_v13, %v6521_v46 }
 0x1cb   : > { %877 = vrot.lane.b32.xlu0 %v674_v14, %s6350_s14  ;;  %1212 = vrot.lane.b32.xlu1 %v1191_v18, %s6345_s11  ;;  %v2978_v14 = vld [vmem:[#allocation2 + $0x19] sm:$0xff] }
 0x1cf   : > { %1819 = vrot.lane.b32.xlu1 %v1191_v18, %s6346_s12  ;;  %1214 = vrot.lane.b32.xlu0 %v1192_v56, %s6345_s11  ;;  %v6723_v18 = vld [vmem:[#allocation2 + $0x32] sm:$0xff] }
 0x1d0   : > { %v6822_v4 = vrot.slane %v6723_v18, %v6521_v46 }
 0x1d3   : > { %2993 = vrot.lane.b32.xlu1 %v6608_v22, %s6345_s11  ;;  %1821 = vrot.lane.b32.xlu0 %v1192_v56, %s6346_s12  ;;  %v725_v56 = vcombine.high %v692_v50, %v707_v49  ;;  %v4251_v49 = vrot.slane %v4243_v11, %v6541_v58  ;;  %v2469_v50 = vrot.slane %v2455_v7, %v6541_v58 }
 0x1d4   : > { %v742_v11 = vcombine.high %v6686_v55, %v9167_v6  ;;  %v2472_v7 = vcombine.high %v2462_v43, %v9167_v6 }
 0x1d7   : > { %2999 = vrot.lane.b32.xlu1 %v6528_v52, %s6345_s11  ;;  %2995 = vrot.lane.b32.xlu0 %v6615_v25, %s6345_s11 }
 0x1db   : > { %3600 = vrot.lane.b32.xlu1 %v6608_v22, %s6346_s12  ;;  %3602 = vrot.lane.b32.xlu0 %v6615_v25, %s6346_s12 }
 0x1df   : > { %3606 = vrot.lane.b32.xlu1 %v6528_v52, %s6346_s12  ;;  %4784 = vrot.lane.b32.xlu0 %v6629_v31, %s6345_s11  ;;  %v6692_v52 = vrot.slane %v725_v56, %v6541_v58  ;;  %v2473_v56 = vcombine.high %v2469_v50, %v9167_v6 }
 0x1e1   : > { %v743_v3 = vcombine.high %v6692_v52, %v9167_v6 }
 0x1e3   : > { %4782 = vrot.lane.b32.xlu1 %v6636_v33, %s6345_s11  ;;  %5391 = vrot.lane.b32.xlu0 %v6629_v31, %s6346_s12 }
 0x1e7   : > { %4788 = vrot.lane.b32.xlu1 %v6530_v53, %s6345_s11  ;;  %893 = vrot.lane.b32.xlu0 %v676_v34, %s6351_s15 }
 0x1eb   : > { %5389 = vrot.lane.b32.xlu1 %v6636_v33, %s6346_s12  ;;  %901 = vrot.lane.b32.xlu0 %v677_v38, %s6352_s17 }
 0x1ef   : > { %5395 = vrot.lane.b32.xlu1 %v6530_v53, %s6346_s12  ;;  %909 = vrot.lane.b32.xlu0 %v723_v45, %s6349_s13  ;;  %v2415_v53 = vrot.slane %v6515_v44, %v6521_v46 }
 0x1f1   : > { %v2438_v57 = vcombine.low %v2415_v53, %v2430_v54  ;;  %v2439_v60 = vcombine.high %v2415_v53, %v2430_v54  ;;  %v6830_v54 = vrot.slane %v6636_v33, %v6521_v46 }
 0x1f3   : > { %885 = vrot.lane.b32.xlu1 %v675_v48, %s6353_s19  ;;  %4466 = vrot.lane.b32.xlu0 %v6676_v51, %s6349_s13  ;;  %v6695_v59 = vrot.slane %v2438_v57, %v6541_v58  ;;  %v2453_v61 = vrot.slane %v2439_v60, %v6541_v58  ;;  %v4258_v51 = vrot.slane %v4244_v12, %v6541_v58 }
 0x1f4   : > { %v2481_v12 = vrot.slane %v6608_v22, %v6521_v46  ;;  %v4294_v60 = vcombine.high %v6830_v54, %v6822_v4 }
 0x1f5   : > { %9249 = vst [vmem:[#allocation4_spill] sm:$0xff] %v6695_v59  ;;  %v2470_v44 = vcombine.high %v6695_v59, %v9167_v6  ;;  %v2471_v9 = vcombine.high %v2453_v61, %v9167_v6 }
 0x1f6   : > { %v2505_v57 = vcombine.high %v2481_v12, %v2496_v28 }
 0x1f7   : > { %889 = vrot.lane.b32.xlu1 %v666_v24, %s6354_s25  ;;  %917 = vrot.lane.b32.xlu0 %v6686_v55, %s6354_s25  ;;  %v741_v24 = vcombine.high %v723_v45, %v9167_v6 }
 0x1fb   : > { %897 = vrot.lane.b32.xlu1 %v673_v35, %s6355_s26  ;;  %925 = vrot.lane.b32.xlu0 %v6692_v52, %s6355_s26  ;;  %v6756_v35 = vrot.slane %v4227_v32, %v6541_v58  ;;  %v789_v52 = vrot.slane %v775_v8, %v6541_v58  ;;  %v2504_v32 = vcombine.low %v2481_v12, %v2496_v28 }
 0x1fc   : > { %v6894_v28 = vrot.slane %v791_v21, %v6541_v58  ;;  %v4278_v12 = vcombine.high %v6723_v18, %v9167_v6 }
 0x1fd   : > { %9250 = vst [vmem:[#allocation5_spill] sm:$0xff] %v6756_v35  ;;  %v4259_v39 = vcombine.high %v6756_v35, %v9167_v6 }
 0x1ff   : > { %1208 = vrot.lane.b32.xlu1 %v6703_v62, %s6345_s11  ;;  %2673 = vrot.lane.b32.xlu0 %v2470_v44, %s6350_s14 }
 0x203   : > { %1815 = vrot.lane.b32.xlu1 %v6703_v62, %s6346_s12  ;;  %2681 = vrot.lane.b32.xlu0 %v2471_v9, %s6353_s19  ;;  %v2519_v9 = vrot.slane %v2505_v57, %v6541_v58  ;;  %v4263_v57 = vcombine.high %v6636_v33, %v9167_v6 }
 0x207   : > { %3001 = vrot.lane.b32.xlu1 %v6712_v13, %s6345_s11  ;;  %2997 = vrot.lane.b32.xlu0 %v2978_v14, %s6345_s11 }
 0x20b   : > { %3608 = vrot.lane.b32.xlu1 %v6712_v13, %s6346_s12  ;;  %3003 = vrot.lane.b32.xlu0 %v6717_v16, %s6345_s11 }
 0x20f   : > { %4790 = vrot.lane.b32.xlu1 %v6723_v18, %s6345_s11  ;;  %3604 = vrot.lane.b32.xlu0 %v2978_v14, %s6346_s12  ;;  %v4308_v14 = vrot.slane %v4294_v60, %v6541_v58 }
 0x213   : > { %5397 = vrot.lane.b32.xlu1 %v6723_v18, %s6346_s12  ;;  %3610 = vrot.lane.b32.xlu0 %v6717_v16, %s6346_s12  ;;  %v4292_v18 = vrot.slane %v4278_v12, %v6521_v46 }
 0x217   : > { %2677 = vrot.lane.b32.xlu1 %v2453_v61, %s6349_s13  ;;  %4786 = vrot.lane.b32.xlu0 %v6735_v27, %s6345_s11 }
 0x21b   : > { %905 = vrot.lane.b32.xlu1 %v740_v29, %s6350_s14  ;;  %4792 = vrot.lane.b32.xlu0 %v6742_v30, %s6345_s11  ;;  %v4261_v29 = vcombine.high %v4251_v49, %v9167_v6 }
 0x21f   : > { %913 = vrot.lane.b32.xlu1 %v741_v24, %s6353_s19  ;;  %5393 = vrot.lane.b32.xlu0 %v6735_v27, %s6346_s12  ;;  %v6862_v24 = vrot.slane %v790_v20, %v6541_v58 }
 0x221   : > { %v6753_v34 = vpop.permute.xlu0 %1202 }
 0x223   : > { %5399 = vrot.lane.b32.xlu0 %v6742_v30, %s6346_s12  ;;  %1216 = vrot.lane.b32.xlu1 %v6758_v36, %s6345_s11 }
 0x225   : > { %v6764_v37 = vpop.permute.xlu0 %1809  ;;  %v6766_v38 = vpop.permute.xlu1 %1204 }
 0x227   : > { %4462 = vrot.lane.b32.xlu0 %v4259_v39, %s6350_s14  ;;  %1823 = vrot.lane.b32.xlu1 %v6758_v36, %s6346_s12 }
 0x229   : > { %v6773_v40 = vpop.permute.xlu1 %1811  ;;  %v6775_v41 = vpop.permute.xlu0 %1210 }
 0x22b   : > { %4470 = vrot.lane.b32.xlu0 %v4260_v42, %s6353_s19  ;;  %2685 = vrot.lane.b32.xlu1 %v2462_v43, %s6354_s25 }
 0x22d   : > { %v6785_v45 = vpop.permute.xlu1 %2991  ;;  %v6787_v47 = vpop.permute.xlu0 %1817 }
 0x22f   : > { %4474 = vrot.lane.b32.xlu0 %v4251_v49, %s6354_s25  ;;  %2693 = vrot.lane.b32.xlu1 %v2469_v50, %s6355_s26  ;;  %v4262_v50 = vcombine.high %v4258_v51, %v9167_v6 }
 0x231   : > { %v6799_v5 = vpop.permute.xlu1 %3598  ;;  %v6801_v48 = vpop.permute.xlu0 %1206 }
 0x232   : > { %9251 = vst [vmem:[#allocation6_spill] sm:$0xff] %v6801_v48  ;;  %v6866_v39 = vrot.slane %v6801_v48, %v6521_v46 }
 0x233   : > { %4482 = vrot.lane.b32.xlu0 %v4258_v51, %s6355_s26  ;;  %921 = vrot.lane.b32.xlu1 %v742_v11, %s6351_s15  ;;  %v6886_v11 = vrot.slane %v774_v17, %v6541_v58  ;;  %v2474_v51 = vcombine.high %v6608_v22, %v9167_v6 }
 0x235   : > { %v6811_v0 = vpop.permute.xlu1 %4780  ;;  %v6813_v1 = vpop.permute.xlu0 %1813  ;;  %v806_v19 = vcombine.high %v6886_v11, %v9167_v6 }
 0x236   : > { %9252 = vst [vmem:[#allocation7_spill] sm:$0xff] %v6813_v1  ;;  %v6904_v63 = vrot.slane %v6813_v1, %v6521_v46 }
 0x237   : > { %2689 = vrot.lane.b32.xlu0 %v2472_v7, %s6351_s15  ;;  %929 = vrot.lane.b32.xlu1 %v743_v3, %s6352_s17  ;;  %v2489_v7 = vcombine.high %v6712_v13, %v9167_v6  ;;  %v6897_v3 = vrot.slane %v2504_v32, %v6541_v58  ;;  %v807_v32 = vcombine.high %v789_v52, %v9167_v6 }
 0x239   : > { %v6832_v53 = vpop.permute.xlu1 %5387  ;;  %v6834_v55 = vpop.permute.xlu0 %881  ;;  %9257 = vst [vmem:[#allocation12_spill] sm:$0xff] %v6897_v3  ;;  %v2503_v21 = vrot.slane %v2489_v7, %v6521_v46  ;;  %v2536_v13 = vcombine.high %v6897_v3, %v9167_v6  ;;  %v2537_v7 = vcombine.high %v2519_v9, %v9167_v6  ;;  %v9270_v3 = vmov 0.0  }
 0x23a   : > { %9253 = vst [vmem:[#allocation8_spill] sm:$0xff] %v6832_v53 }
 0x23b   : > { %2697 = vrot.lane.b32.xlu0 %v2473_v56, %s6352_s17  ;;  %937 = vrot.lane.b32.xlu1 %v789_v52, %s6349_s13  ;;  %v2488_v56 = vrot.slane %v2474_v51, %v6521_v46  ;;  %v4277_v51 = vrot.slane %v4263_v57, %v6521_v46  ;;  %v4326_v52 = vcombine.high %v4308_v14, %v9167_v6 }
 0x23d   : > { %v6845_v44 = vpop.permute.xlu0 %877  ;;  %v6847_v61 = vpop.permute.xlu1 %1212  ;;  %v2521_v22 = vcombine.high %v2488_v56, %v2503_v21  ;;  %v4309_v43 = vcombine.low %v4277_v51, %v4292_v18 }
 0x23f   : > { %2705 = vrot.lane.b32.xlu0 %v2519_v9, %s6349_s13  ;;  %4494 = vrot.lane.b32.xlu1 %v4308_v14, %s6349_s13  ;;  %v2535_v57 = vrot.slane %v2521_v22, %v6541_v58  ;;  %v6965_v22 = vld [vmem:[#allocation2 + $0x41] sm:$0xff] }
 0x241   : > { %v6853_v8 = vpop.permute.xlu1 %1819  ;;  %v6855_v23 = vpop.permute.xlu0 %1214  ;;  %v2539_v59 = vcombine.high %v2535_v57, %v9270_v3 }
 0x242   : > { %9254 = vst [vmem:[#allocation9_spill] sm:$0xff] %v6855_v23  ;;  %v6870_v42 = vrot.slane %v6855_v23, %v6521_v46 }
 0x243   : > { %4478 = vrot.lane.b32.xlu0 %v4261_v29, %s6351_s15  ;;  %945 = vrot.lane.b32.xlu1 %v6862_v24, %s6354_s25 }
 0x245   : > { %v6877_v49 = vpop.permute.xlu1 %2993  ;;  %v6879_v20 = vpop.permute.xlu0 %1821 }
 0x246   : > { %9255 = vst [vmem:[#allocation10_spill] sm:$0xff] %v6877_v49  ;;  %9256 = vst [vmem:[#allocation11_spill] sm:$0xff] %v6879_v20  ;;  %v6908_v2 = vrot.slane %v6879_v20, %v6521_v46  ;;  %v808_v20 = vcombine.high %v6862_v24, %v9270_v3  ;;  %v825_v24 = vcombine.high %v6758_v36, %v9270_v3 }
 0x247   : > { %4486 = vrot.lane.b32.xlu0 %v4262_v50, %s6352_s17  ;;  %953 = vrot.lane.b32.xlu1 %v6894_v28, %s6355_s26  ;;  %v2520_v50 = vcombine.low %v2488_v56, %v2503_v21  ;;  %v4804_v21 = vcombine.high %v6811_v0, %v9167_v6 }
 0x249   : > { %v6912_v15 = vpop.permute.xlu1 %2999  ;;  %v6914_v17 = vpop.permute.xlu0 %2995 }
 0x24a   : > { %9258 = vst [vmem:[#allocation13_spill] sm:$0xff] %v6914_v17  ;;  %v7009_v17 = vld [vmem:[#allocation2 + $0x42] sm:$0xff] }
 0x24b   : > { %933 = vrot.lane.b32.xlu0 %v806_v19, %s6350_s14  ;;  %2701 = vrot.lane.b32.xlu1 %v2536_v13, %s6350_s14  ;;  %v2528_v13 = vrot.slane %v2520_v50, %v6541_v58 }
 0x24d   : > { %v6930_v60 = vpop.permute.xlu1 %3600  ;;  %v6932_v29 = vpop.permute.xlu0 %3602 }
 0x24e   : > { %9259 = vst [vmem:[#allocation14_spill] sm:$0xff] %v6930_v60  ;;  %9260 = vst [vmem:[#allocation15_spill] sm:$0xff] %v6932_v29 }
 0x24f   : > { %941 = vrot.lane.b32.xlu0 %v807_v32, %s6353_s19  ;;  %2709 = vrot.lane.b32.xlu1 %v2537_v7, %s6353_s19  ;;  %v4317_v32 = vrot.slane %v4309_v43, %v6541_v58  ;;  %v4310_v7 = vcombine.high %v4277_v51, %v4292_v18  ;;  %v6970_v43 = vrot.slane %v4804_v21, %v6521_v46 }
 0x250   : > { %v6989_v21 = vrot.slane %v6717_v16, %v6521_v46 }
 0x251   : > { %v6940_v19 = vpop.permute.xlu1 %3606  ;;  %v6942_v33 = vpop.permute.xlu0 %4784  ;;  %9264 = vst [vmem:[#allocation19_spill] sm:$0xff] %v6970_v43  ;;  %v817_v43 = vrot.slane %v6703_v62, %v6521_v46 }
 0x252   : > { %9261 = vst [vmem:[#allocation16_spill] sm:$0xff] %v6942_v33  ;;  %v6985_v33 = vrot.slane %v6615_v25, %v6521_v46 }
 0x253   : > { %2713 = vrot.lane.b32.xlu0 %v2528_v13, %s6354_s25  ;;  %4498 = vrot.lane.b32.xlu1 %v4326_v52, %s6353_s19  ;;  %v4324_v52 = vrot.slane %v4310_v7, %v6541_v58  ;;  %v7002_v7 = vrot.slane %v6832_v53, %v6521_v46 }
 0x255   : > { %v6948_v9 = vpop.permute.xlu1 %4782  ;;  %v6950_v12 = vpop.permute.xlu0 %5391  ;;  %9268 = vst [vmem:[#allocation23_spill] sm:$0xff] %v7002_v7  ;;  %v2540_v7 = vcombine.high %v6615_v25, %v9270_v3  ;;  %v809_v25 = vcombine.high %v6894_v28, %v9270_v3 }
 0x256   : > { %9262 = vst [vmem:[#allocation17_spill] sm:$0xff] %v6948_v9  ;;  %9263 = vst [vmem:[#allocation18_spill] sm:$0xff] %v6950_v12  ;;  %v2538_v12 = vcombine.high %v2528_v13, %v9167_v6  ;;  %v4293_v13 = vcombine.low %v6830_v54, %v6822_v4 }
 0x257   : > { %2721 = vrot.lane.b32.xlu0 %v2535_v57, %s6355_s26  ;;  %4502 = vrot.lane.b32.xlu1 %v4317_v32, %s6354_s25 }
 0x259   : > { %v6958_v14 = vpop.permute.xlu1 %4788  ;;  %v6960_v56 = vpop.permute.xlu0 %893 }
 0x25a   : > { %v4819_v50 = vcombine.high %v6958_v14, %v9167_v6 }
 0x25b   : > { %3005 = vrot.lane.b32.xlu0 %v6965_v22, %s6345_s11  ;;  %4510 = vrot.lane.b32.xlu1 %v4324_v52, %s6355_s26 }
 0x25c   : > { %v6973_v18 = vrot.slane %v4819_v50, %v6521_v46 }
 0x25d   : > { %v6976_v51 = vpop.permute.xlu1 %5389  ;;  %v6978_v35 = vpop.permute.xlu0 %901 }
 0x25e   : > { %9265 = vst [vmem:[#allocation20_spill] sm:$0xff] %v6973_v18  ;;  %9266 = vst [vmem:[#allocation21_spill] sm:$0xff] %v6976_v51  ;;  %v832_v18 = vrot.slane %v6758_v36, %v6521_v46 }
 0x25f   : > { %3612 = vrot.lane.b32.xlu0 %v6965_v22, %s6346_s12  ;;  %2717 = vrot.lane.b32.xlu1 %v2538_v12, %s6351_s15  ;;  %v2571_v12 = vcombine.high %v6985_v33, %v6989_v21 }
 0x261   : > { %v6994_v50 = vpop.permute.xlu1 %5395  ;;  %v6996_v29 = vpop.permute.xlu0 %909  ;;  %v7026_v57 = vrot.slane %v2571_v12, %v6541_v58  ;;  %v4327_v12 = vcombine.high %v4317_v32, %v9270_v3  ;;  %v4328_v32 = vcombine.high %v4324_v52, %v9270_v3 }
 0x262   : > { %9267 = vst [vmem:[#allocation22_spill] sm:$0xff] %v6994_v50  ;;  %v7006_v6 = vrot.slane %v6994_v50, %v6521_v46  ;;  %v7023_v50 = vrot.slane %v4293_v13, %v6541_v58 }
 0x263   : > { %4794 = vrot.lane.b32.xlu0 %v7009_v17, %s6345_s11  ;;  %2725 = vrot.lane.b32.xlu1 %v2539_v59, %s6352_s17 }
 0x264   : > { %9269 = vst [vmem:[#allocation24_spill] sm:$0xff] %v7006_v6  ;;  %9272 = vst [vmem:[#allocation26_spill] sm:$0xff] %v7023_v50  ;;  %v4325_v13 = vcombine.high %v7023_v50, %v9270_v3  ;;  %v2555_v50 = vcombine.high %v6717_v16, %v9270_v3  ;;  %v810_v16 = vcombine.high %v6703_v62, %v9270_v3 }
 0x265   : > { %v7018_v54 = vpop.permute.xlu1 %885  ;;  %v7020_v53 = vpop.permute.xlu0 %4466 }
 0x266   : > { %9271 = vst [vmem:[#allocation25_spill] sm:$0xff] %v7020_v53  ;;  %v840_v53 = vcombine.low %v817_v43, %v832_v18  ;;  %v2569_v62 = vrot.slane %v2555_v50, %v6521_v46 }
 0x267   : > { %5401 = vrot.lane.b32.xlu0 %v7009_v17, %s6346_s12  ;;  %2733 = vrot.lane.b32.xlu1 %v7026_v57, %s6349_s13 }
 0x268   : > { %v7057_v48 = vrot.slane %v840_v53, %v6541_v58  ;;  %v7073_v53 = vrot.slane %v6629_v31, %v6521_v46 }
 0x269   : > { %v7036_v59 = vpop.permute.xlu1 %889  ;;  %v7038_v4 = vpop.permute.xlu0 %917 }
 0x26a   : > { %v872_v28 = vcombine.high %v7057_v48, %v9270_v3 }
 0x26b   : > { %4490 = vrot.lane.b32.xlu0 %v4325_v13, %s6350_s14  ;;  %4506 = vrot.lane.b32.xlu1 %v4327_v12, %s6351_s15  ;;  %v841_v13 = vcombine.high %v817_v43, %v832_v18  ;;  %v2554_v43 = vrot.slane %v2540_v7, %v6521_v46 }
 0x26d   : > { %v7047_v6 = vpop.permute.xlu1 %897  ;;  %v7049_v1 = vpop.permute.xlu0 %925  ;;  %v855_v52 = vrot.slane %v841_v13, %v6541_v58  ;;  %v2586_v7 = vcombine.low %v2554_v43, %v2569_v62 }
 0x26f   : > { %949 = vrot.lane.b32.xlu0 %v808_v20, %s6351_s15  ;;  %4514 = vrot.lane.b32.xlu1 %v4328_v32, %s6352_s17  ;;  %v7077_v20 = vrot.slane %v6742_v30, %v6521_v46  ;;  %v873_v13 = vcombine.high %v855_v52, %v9270_v3 }
 0x271   : > { %v7063_v12 = vpop.permute.xlu1 %1208  ;;  %v7065_v23 = vpop.permute.xlu0 %2673  ;;  %v4360_v32 = vcombine.high %v7073_v53, %v7077_v20 }
 0x272   : > { %9273 = vst [vmem:[#allocation27_spill] sm:$0xff] %v7063_v12  ;;  %9274 = vst [vmem:[#allocation28_spill] sm:$0xff] %v7065_v23  ;;  %v824_v23 = vrot.slane %v810_v16, %v6521_v46  ;;  %v839_v12 = vrot.slane %v825_v24, %v6521_v46  ;;  %v7106_v16 = vrot.slane %v6877_v49, %v6521_v46 }
 0x273   : > { %957 = vrot.lane.b32.xlu0 %v809_v25, %s6352_s17  ;;  %961 = vrot.lane.b32.xlu1 %v872_v28, %s6350_s14  ;;  %v7102_v28 = vrot.slane %v4360_v32, %v6541_v58  ;;  %v2570_v32 = vcombine.low %v6985_v33, %v6989_v21  ;;  %v7137_v21 = vrot.slane %v6930_v60, %v6521_v46 }
 0x274   : > { %9279 = vst [vmem:[#allocation33_spill] sm:$0xff] %v7106_v16  ;;  %v2403_v16 = vld [vmem:[#allocation2 + $0x19] sm:$0xff] }
 0x275   : > { %v7086_v36 = vpop.permute.xlu1 %1815  ;;  %v7088_v18 = vpop.permute.xlu0 %2681  ;;  %9283 = vst [vmem:[#allocation37_spill] sm:$0xff] %v7137_v21  ;;  %v4359_v21 = vcombine.low %v7073_v53, %v7077_v20  ;;  %v2603_v53 = vcombine.high %v7026_v57, %v9270_v3 }
 0x276   : > { %9275 = vst [vmem:[#allocation29_spill] sm:$0xff] %v7086_v36  ;;  %9276 = vst [vmem:[#allocation30_spill] sm:$0xff] %v7088_v18  ;;  %v856_v18 = vcombine.low %v824_v23, %v839_v12  ;;  %v4329_v36 = vcombine.high %v6629_v31, %v9270_v3 }
 0x277   : > { %965 = vrot.lane.b32.xlu0 %v855_v52, %s6349_s13  ;;  %969 = vrot.lane.b32.xlu1 %v873_v13, %s6353_s19  ;;  %v7113_v52 = vrot.slane %v2586_v7, %v6541_v58  ;;  %v2587_v13 = vcombine.high %v2554_v43, %v2569_v62  ;;  %v4344_v7 = vcombine.high %v6742_v30, %v9270_v3 }
 0x278   : > { %v864_v62 = vrot.slane %v856_v18, %v6541_v58  ;;  %v7147_v30 = vrot.slane %v2570_v32, %v6541_v58  ;;  %v4343_v60 = vrot.slane %v4329_v36, %v6521_v46 }
 0x279   : > { %v7097_v50 = vpop.permute.xlu1 %3001  ;;  %v7099_v25 = vpop.permute.xlu0 %2997  ;;  %v7133_v33 = vrot.slane %v2587_v13, %v6541_v58  ;;  %v4358_v32 = vrot.slane %v4344_v7, %v6521_v46 }
 0x27a   : > { %9277 = vst [vmem:[#allocation31_spill] sm:$0xff] %v7097_v50  ;;  %9278 = vst [vmem:[#allocation32_spill] sm:$0xff] %v7099_v25  ;;  %v7110_v24 = vrot.slane %v7097_v50, %v6521_v46  ;;  %v857_v50 = vcombine.high %v824_v23, %v839_v12  ;;  %v4402_v23 = vrot.slane %v6735_v27, %v6521_v46 }
 0x27b   : > { %4522 = vrot.lane.b32.xlu0 %v7102_v28, %s6349_s13  ;;  %2741 = vrot.lane.b32.xlu1 %v7113_v52, %s6354_s25  ;;  %9285 = vst [vmem:[#allocation39_spill] sm:$0xff] %v7147_v30  ;;  %v4417_v12 = vrot.slane %v7009_v17, %v6521_v46  ;;  %v2602_v7 = vcombine.high %v7147_v30, %v9270_v3 }
 0x27c   : > { %9280 = vst [vmem:[#allocation34_spill] sm:$0xff] %v7110_v24  ;;  %v7166_v24 = vrot.slane %v6948_v9, %v6521_v46 }
 0x27d   : > { %v7127_v49 = vpop.permute.xlu1 %3608  ;;  %v7129_v43 = vpop.permute.xlu0 %3003 }
 0x27e   : > { %9281 = vst [vmem:[#allocation35_spill] sm:$0xff] %v7127_v49  ;;  %9282 = vst [vmem:[#allocation36_spill] sm:$0xff] %v7129_v43  ;;  %v7141_v31 = vrot.slane %v7127_v49, %v6521_v46  ;;  %v871_v43 = vrot.slane %v857_v50, %v6541_v58  ;;  %v874_v49 = vcombine.high %v864_v62, %v9270_v3 }
 0x27f   : > { %973 = vrot.lane.b32.xlu0 %v864_v62, %s6354_s25  ;;  %2749 = vrot.lane.b32.xlu1 %v7133_v33, %s6355_s26  ;;  %9288 = vst [vmem:[#allocation42_spill] sm:$0xff] %v7166_v24  ;;  %v4426_v62 = vcombine.high %v4402_v23, %v4417_v12 }
 0x280   : > { %9284 = vst [vmem:[#allocation38_spill] sm:$0xff] %v7141_v31  ;;  %v2613_v31 = vrot.slane %v2403_v16, %v6521_v46 }
 0x281   : > { %v7155_v13 = vpop.permute.xlu1 %4790  ;;  %v7157_v25 = vpop.permute.xlu0 %3604 }
 0x282   : > { %9286 = vst [vmem:[#allocation40_spill] sm:$0xff] %v7155_v13  ;;  %9287 = vst [vmem:[#allocation41_spill] sm:$0xff] %v7157_v25  ;;  %v7170_v18 = vrot.slane %v7155_v13, %v6521_v46  ;;  %v4376_v25 = vcombine.high %v4343_v60, %v4358_v32  ;;  %v875_v13 = vcombine.high %v871_v43, %v9270_v3 }
 0x283   : > { %981 = vrot.lane.b32.xlu0 %v871_v43, %s6355_s26  ;;  %977 = vrot.lane.b32.xlu1 %v874_v49, %s6351_s15  ;;  %v2628_v49 = vrot.slane %v6965_v22, %v6521_v46 }
 0x284   : > { %v4390_v24 = vrot.slane %v4376_v25, %v6541_v58 }
 0x285   : > { %v7173_v50 = vpop.permute.xlu1 %5397  ;;  %v7175_v36 = vpop.permute.xlu0 %3610 }
 0x286   : > { %9289 = vst [vmem:[#allocation43_spill] sm:$0xff] %v7173_v50  ;;  %9290 = vst [vmem:[#allocation44_spill] sm:$0xff] %v7175_v36  ;;  %v7189_v36 = vrot.slane %v6976_v51, %v6521_v46  ;;  %v7193_v30 = vrot.slane %v7173_v50, %v6521_v46  ;;  %v7206_v51 = vrot.slane %v4359_v21, %v6541_v58 }
 0x287   : > { %2729 = vrot.lane.b32.xlu0 %v2602_v7, %s6350_s14  ;;  %985 = vrot.lane.b32.xlu1 %v875_v13, %s6352_s17  ;;  %v4440_v50 = vrot.slane %v4426_v62, %v6541_v58  ;;  %v2636_v7 = vcombine.low %v2613_v31, %v2628_v49 }
 0x288   : > { %9291 = vst [vmem:[#allocation45_spill] sm:$0xff] %v7189_v36  ;;  %9292 = vst [vmem:[#allocation46_spill] sm:$0xff] %v7193_v30  ;;  %v4391_v20 = vcombine.high %v7206_v51, %v9270_v3  ;;  %v4425_v36 = vcombine.low %v4402_v23, %v4417_v12  ;;  %v4410_v23 = vcombine.high %v7009_v17, %v9270_v3 }
 0x289   : > { %v7201_v43 = vpop.permute.xlu1 %2677  ;;  %v7203_v9 = vpop.permute.xlu0 %4786  ;;  %9295 = vst [vmem:[#allocation49_spill] sm:$0xff] %v7206_v51  ;;  %v7218_v21 = vrot.slane %v2636_v7, %v6541_v58  ;;  %v2621_v17 = vcombine.high %v6965_v22, %v9270_v3 }
 0x28a   : > { %9293 = vst [vmem:[#allocation47_spill] sm:$0xff] %v7201_v43  ;;  %9294 = vst [vmem:[#allocation48_spill] sm:$0xff] %v7203_v9  ;;  %v4394_v9 = vcombine.high %v4390_v24, %v9270_v3  ;;  %v2637_v43 = vcombine.high %v2613_v31, %v2628_v49 }
 0x28b   : > { %2737 = vrot.lane.b32.xlu0 %v2603_v53, %s6353_s19  ;;  %4550 = vrot.lane.b32.xlu1 %v4440_v50, %s6349_s13  ;;  %9297 = vst [vmem:[#allocation51_spill] sm:$0xff] %v7218_v21  ;;  %v4392_v53 = vcombine.high %v7102_v28, %v9270_v3  ;;  %v2668_v51 = vcombine.high %v7218_v21, %v9270_v3 }
 0x28c   : > { %v2651_v30 = vrot.slane %v2637_v43, %v6541_v58  ;;  %v4395_v28 = vcombine.high %v6735_v27, %v9270_v3  ;;  %v4424_v43 = vrot.slane %v4410_v23, %v6521_v46  ;;  %v2606_v27 = vcombine.high %v2403_v16, %v9270_v3 }
 0x28d   : > { %v906_v57 = vpop.permute.xlu1 %905  ;;  %v7212_v13 = vpop.permute.xlu0 %4792  ;;  %v2635_v16 = vrot.slane %v2621_v17, %v6521_v46 }
 0x28e   : > { %9296 = vst [vmem:[#allocation50_spill] sm:$0xff] %v7212_v13  ;;  %v4375_v13 = vcombine.low %v4343_v60, %v4358_v32  ;;  %v2669_v60 = vcombine.high %v2651_v30, %v9270_v3  ;;  %v2620_v23 = vrot.slane %v2606_v27, %v6521_v46  ;;  %v1001_v22 = vsel %vm392_vm2, %v6733_v26, %v906_v57 }
 0x28f   : > { %4518 = vrot.lane.b32.xlu0 %v4391_v20, %s6350_s14  ;;  %4542 = vrot.lane.b32.xlu1 %v4394_v9, %s6352_s17  ;;  %v7237_v20 = vrot.slane %v4425_v36, %v6541_v58  ;;  %v4409_v36 = vrot.slane %v4395_v28, %v6521_v46 }
 0x290   : > { %v4383_v49 = vrot.slane %v4375_v13, %v6541_v58  ;;  %v2652_v17 = vcombine.low %v2620_v23, %v2635_v16 }
 0x291   : > { %v914_v25 = vpop.permute.xlu1 %913  ;;  %v7222_v62 = vpop.permute.xlu0 %5393  ;;  %9300 = vst [vmem:[#allocation54_spill] sm:$0xff] %v7237_v20  ;;  %v4457_v32 = vcombine.high %v7237_v20, %v9270_v3  ;;  %v4441_v28 = vcombine.low %v4409_v36, %v4424_v43  ;;  %v4442_v27 = vcombine.high %v4409_v36, %v4424_v43 }
 0x292   : > { %9298 = vst [vmem:[#allocation52_spill] sm:$0xff] %v7222_v62  ;;  %v2660_v43 = vrot.slane %v2652_v17, %v6541_v58  ;;  %v7507_v62 = vrot.slane %v6811_v0, %v6521_v46 }
 0x293   : > { %4526 = vrot.lane.b32.xlu0 %v4392_v53, %s6353_s19  ;;  %2757 = vrot.lane.b32.xlu1 %v2668_v51, %s6350_s14  ;;  %v2604_v53 = vcombine.high %v7113_v52, %v9270_v3  ;;  %v4449_v57 = vrot.slane %v4441_v28, %v6541_v58  ;;  %v4393_v28 = vcombine.high %v4383_v49, %v9270_v3 }
 0x295   : > { %v7231_v31 = vpop.permute.xlu0 %5399  ;;  %v7233_v9 = vpop.permute.xlu1 %1216 }
 0x296   : > { %9299 = vst [vmem:[#allocation53_spill] sm:$0xff] %v7231_v31 }
 0x297   : > { %4530 = vrot.lane.b32.xlu0 %v4383_v49, %s6354_s25  ;;  %2765 = vrot.lane.b32.xlu1 %v2669_v60, %s6353_s19  ;;  %v4458_v60 = vcombine.high %v4440_v50, %v9270_v3  ;;  %v2605_v50 = vcombine.high %v7133_v33, %v9270_v3  ;;  %v1233_v49 = vrot.slane %v6753_v34, %v6521_v46 }
 0x299   : > { %v7246_v51 = vpop.permute.xlu0 %4462  ;;  %v7248_v12 = vpop.permute.xlu1 %1823 }
 0x29a   : > { %9301 = vst [vmem:[#allocation55_spill] sm:$0xff] %v7246_v51 }
 0x29b   : > { %4538 = vrot.lane.b32.xlu0 %v4390_v24, %s6355_s26  ;;  %4546 = vrot.lane.b32.xlu1 %v4457_v32, %s6350_s14  ;;  %v988_v24 = vsel %vm392_vm2, %v6578_v10, %v6845_v44  ;;  %v1002_v32 = vsel %vm989_vm5, %v1001_v22, %v6996_v29 }
 0x29c   : > { %v990_v10 = vsel %vm989_vm5, %v988_v24, %v6834_v55  ;;  %v1003_v44 = vsel %vm991_vm6, %v1002_v32, %v914_v25  ;;  %v4456_v25 = vrot.slane %v4442_v27, %v6541_v58  ;;  %v7320_v32 = vld [vmem:[%s6433_s16] sm:$0xff] }
 0x29d   : > { %v7259_v7 = vpop.permute.xlu0 %4470  ;;  %v7261_v13 = vpop.permute.xlu1 %2685  ;;  %v1004_v36 = vsel %vm993_vm7, %v1003_v44, %v7038_v4  ;;  %v1248_v4 = vrot.slane %v6775_v41, %v6521_v46 }
 0x29e   : > { %9302 = vst [vmem:[#allocation56_spill] sm:$0xff] %v7259_v7 }
 0x29f   : > { %2745 = vrot.lane.b32.xlu0 %v2604_v53, %s6351_s15  ;;  %4554 = vrot.lane.b32.xlu1 %v4458_v60, %s6353_s19  ;;  %v992_v53 = vsel %vm991_vm6, %v990_v10, %v7018_v54  ;;  %v2653_v60 = vcombine.high %v2620_v23, %v2635_v16 }
 0x2a0   : > { %v994_v29 = vsel %vm993_vm7, %v992_v53, %v7036_v59  ;;  %v1855_v53 = vrot.slane %v6787_v47, %v6521_v46 }
 0x2a1   : > { %v7275_v52 = vpop.permute.xlu0 %4474  ;;  %v7281_v26 = vpop.permute.xlu1 %2693  ;;  %v996_v59 = vsel %vm995_vm8, %v994_v29, %v6960_v56  ;;  %v2670_v56 = vcombine.high %v2660_v43, %v9270_v3  ;;  %v2667_v24 = vrot.slane %v2653_v60, %v6541_v58  ;;  %v1241_v60 = vcombine.high %v6775_v41, %v9270_v3 }
 0x2a2   : > { %9303 = vst [vmem:[#allocation57_spill] sm:$0xff] %v7275_v52  ;;  %v998_v22 = vsel %vm997_vm9, %v996_v59, %v7047_v6 }
 0x2a3   : > { %2753 = vrot.lane.b32.xlu0 %v2605_v50, %s6352_s17  ;;  %4558 = vrot.lane.b32.xlu1 %v4449_v57, %s6354_s25  ;;  %v1000_v6 = vsel %vm999_vm10, %v998_v22, %v6978_v35  ;;  %v2671_v10 = vcombine.high %v2667_v24, %v9270_v3  ;;  %v1257_v35 = vcombine.high %v1233_v49, %v1248_v4 }
 0x2a4   : > { %v1255_v41 = vrot.slane %v1241_v60, %v6521_v46 }
 0x2a5   : > { %v7293_v33 = vpop.permute.xlu0 %4482  ;;  %v922_v55 = vpop.permute.xlu1 %921 }
 0x2a6   : > { %9304 = vst [vmem:[#allocation58_spill] sm:$0xff] %v7293_v33  ;;  %v1005_v54 = vsel %vm995_vm8, %v1004_v36, %v922_v55  ;;  %v4459_v55 = vcombine.high %v4449_v57, %v9270_v3  ;;  %v4460_v57 = vcombine.high %v4456_v25, %v9270_v3 }
 0x2a7   : > { %2761 = vrot.lane.b32.xlu0 %v2651_v30, %s6349_s13  ;;  %4566 = vrot.lane.b32.xlu1 %v4456_v25, %s6355_s26  ;;  %v1006_v30 = vsel %vm997_vm9, %v1005_v54, %v7049_v1  ;;  %v1256_v1 = vcombine.low %v1233_v49, %v1248_v4  ;;  %v1271_v54 = vrot.slane %v1257_v35, %v6541_v58 }
 0x2a8   : > { %v1848_v35 = vcombine.high %v6787_v47, %v9270_v3 }
 0x2a9   : > { %v7309_v23 = vpop.permute.xlu0 %2689  ;;  %v930_v16 = vpop.permute.xlu1 %929  ;;  %v7338_v44 = vrot.slane %v1256_v1, %v6541_v58  ;;  %v1289_v49 = vcombine.high %v1271_v54, %v9270_v3 }
 0x2aa   : > { %v1007_v50 = vsel %vm999_vm10, %v1006_v30, %v930_v16  ;;  %v1226_v30 = vcombine.high %v6753_v34, %v9270_v3 }
 0x2ab   : > { %4534 = vrot.lane.b32.xlu0 %v4393_v28, %s6351_s15  ;;  %6114 = vmatprep.subr.msk.mxu1 %vm1027_vm11, %v1007_v50  ;;  %v1288_v4 = vcombine.high %v7338_v44, %v9270_v3 }
 0x2ac   : > { %2773 = vrot.lane.b32.xlu1 %v2670_v56, %s6351_s15  ;;  %6115 = vmatpush1.msk.msra.mxu1 %vm1027_vm11, %v1000_v6  ;;  %v1240_v25 = vrot.slane %v1226_v30, %v6521_v46 }
 0x2ad   : > { %v7327_v27 = vpop.permute.xlu0 %2697  ;;  %v7329_v17 = vpop.permute.xlu1 %937  ;;  %6116 = vmatmul.mubr.msk.f32.vlgmr.msra.gmra.mxu1 %vm1023_vm12, %v7320_v32 }
 0x2ae   : > { %9305 = vst [vmem:[#allocation59_spill] sm:$0xff] %v7327_v27  ;;  %1175 = vmatprep.mubr.f32.mxu1 %v9270_v3  ;;  %v1272_v34 = vcombine.low %v1240_v25, %v1255_v41 }
 0x2af   : > { %2769 = vrot.lane.b32.xlu0 %v2660_v43, %s6354_s25  ;;  %v1840_v43 = vrot.slane %v6764_v37, %v6521_v46 }
 0x2b0   : > { %2781 = vrot.lane.b32.xlu1 %v2671_v10, %s6352_s17 }
 0x2b1   : > { %v7342_v29 = vpop.permute.xlu0 %2705  ;;  %v7344_v36 = vpop.permute.xlu1 %4494  ;;  %v1863_v59 = vcombine.low %v1840_v43, %v1855_v53  ;;  %v1864_v16 = vcombine.high %v1840_v43, %v1855_v53  ;;  %v1273_v43 = vcombine.high %v1240_v25, %v1255_v41 }
 0x2b2   : > { %9306 = vst [vmem:[#allocation60_spill] sm:$0xff] %v7344_v36 }
 0x2b3   : > { %2777 = vrot.lane.b32.xlu0 %v2667_v24, %s6355_s26  ;;  %v7367_v56 = vrot.slane %v1863_v59, %v6541_v58  ;;  %v1878_v10 = vrot.slane %v1864_v16, %v6541_v58  ;;  %v1280_v59 = vrot.slane %v1272_v34, %v6541_v58  ;;  %v1287_v16 = vrot.slane %v1273_v43, %v6541_v58 }
 0x2b4   : > { %4562 = vrot.lane.b32.xlu1 %v4459_v55, %s6351_s15  ;;  %v1833_v55 = vcombine.high %v6764_v37, %v9270_v3  ;;  %v1314_v37 = vrot.slane %v6847_v61, %v6521_v46  ;;  %v1299_v34 = vrot.slane %v6766_v38, %v6521_v46 }
 0x2b5   : > { %v7354_v28 = vpop.permute.xlu0 %4478  ;;  %v7358_v22 = vpop.permute.xlu1 %945  ;;  %v1895_v1 = vcombine.high %v7367_v56, %v9270_v3  ;;  %v1290_v41 = vcombine.high %v1280_v59, %v9270_v3 }
 0x2b6   : > { %9307 = vst [vmem:[#allocation61_spill] sm:$0xff] %v7354_v28  ;;  %v1847_v47 = vrot.slane %v1833_v55, %v6521_v46 }
 0x2b7   : > { %1491 = vrot.lane.b32.xlu0 %v1288_v4, %s6350_s14  ;;  %v1862_v4 = vrot.slane %v1848_v35, %v6521_v46  ;;  %v1291_v35 = vcombine.high %v1287_v16, %v9270_v3 }
 0x2b8   : > { %4570 = vrot.lane.b32.xlu1 %v4460_v57, %s6352_s17 }
 0x2b9   : > { %v7369_v24 = vpop.permute.xlu0 %4486  ;;  %v7372_v50 = vpop.permute.xlu1 %953  ;;  %v1880_v55 = vcombine.high %v1847_v47, %v1862_v4 }
 0x2ba   : > { %9308 = vst [vmem:[#allocation62_spill] sm:$0xff] %v7369_v24  ;;  %v1292_v24 = vcombine.high %v6766_v38, %v9270_v3 }
 0x2bb   : > { %1499 = vrot.lane.b32.xlu0 %v1289_v49, %s6353_s19  ;;  %v1879_v49 = vcombine.low %v1847_v47, %v1862_v4  ;;  %v1894_v47 = vrot.slane %v1880_v55, %v6541_v58 }
 0x2bc   : > { %1495 = vrot.lane.b32.xlu1 %v1271_v54, %s6349_s13  ;;  %v1896_v54 = vcombine.high %v1878_v10, %v9270_v3 }
 0x2bd   : > { %v7377_v6 = vpop.permute.xlu0 %933  ;;  %v7384_v53 = vpop.permute.xlu1 %2701  ;;  %v1887_v43 = vrot.slane %v1879_v49, %v6541_v58 }
 0x2bf   : > { %2098 = vrot.lane.b32.xlu0 %v1895_v1, %s6350_s14  ;;  %v1323_v1 = vcombine.high %v1299_v34, %v1314_v37 }
 0x2c0   : > { %2102 = vrot.lane.b32.xlu1 %v1878_v10, %s6349_s13 }
 0x2c1   : > { %v7390_v60 = vpop.permute.xlu0 %941  ;;  %v7395_v57 = vpop.permute.xlu1 %2709 }
 0x2c3   : > { %2106 = vrot.lane.b32.xlu0 %v1896_v54, %s6353_s19  ;;  %v1322_v54 = vcombine.low %v1299_v34, %v1314_v37  ;;  %v1906_v37 = vrot.slane %v6773_v40, %v6521_v46  ;;  %v1897_v34 = vcombine.high %v1887_v43, %v9270_v3 }
 0x2c4   : > { %1503 = vrot.lane.b32.xlu1 %v1280_v59, %s6354_s25 }
 0x2c5   : > { %v7402_v30 = vpop.permute.xlu0 %2713  ;;  %v7406_v25 = vpop.permute.xlu1 %4498  ;;  %v7424_v21 = vrot.slane %v1322_v54, %v6541_v58 }
 0x2c6   : > { %9309 = vst [vmem:[#allocation63_spill] sm:$0xff] %v7406_v25  ;;  %v1914_v25 = vcombine.high %v6853_v8, %v9270_v3 }
 0x2c7   : > { %1507 = vrot.lane.b32.xlu0 %v1290_v41, %s6351_s15  ;;  %v1337_v41 = vrot.slane %v1323_v1, %v6541_v58  ;;  %v1307_v1 = vcombine.high %v6847_v61, %v9270_v3  ;;  %v1354_v55 = vcombine.high %v7424_v21, %v9270_v3  ;;  %v1898_v61 = vcombine.high %v1894_v47, %v9270_v3 }
 0x2c8   : > { %1511 = vrot.lane.b32.xlu1 %v1287_v16, %s6355_s26  ;;  %v1921_v16 = vrot.slane %v6853_v8, %v6521_v46 }
 0x2c9   : > { %v7412_v10 = vpop.permute.xlu0 %2721  ;;  %v7415_v59 = vpop.permute.xlu1 %4502  ;;  %v1355_v38 = vcombine.high %v1337_v41, %v9270_v3 }
 0x2ca   : > { %9310 = vst [vmem:[#allocation64_spill] sm:$0xff] %v7415_v59  ;;  %v1930_v33 = vcombine.high %v1906_v37, %v1921_v16 }
 0x2cb   : > { %1515 = vrot.lane.b32.xlu0 %v1291_v35, %s6352_s17  ;;  %v1929_v35 = vcombine.low %v1906_v37, %v1921_v16  ;;  %v7464_v16 = vrot.slane %v6785_v45, %v6521_v46  ;;  %v1306_v37 = vrot.slane %v1292_v24, %v6521_v46  ;;  %v7484_v24 = vrot.slane %v6799_v5, %v6521_v46 }
 0x2cc   : > { %2110 = vrot.lane.b32.xlu1 %v1887_v43, %s6354_s25  ;;  %v7450_v43 = vrot.slane %v6912_v15, %v6521_v46 }
 0x2cd   : > { %v7420_v20 = vpop.permute.xlu0 %3005  ;;  %v7428_v4 = vpop.permute.xlu1 %4510  ;;  %v7457_v52 = vrot.slane %v1929_v35, %v6541_v58 }
 0x2ce   : > { %9311 = vst [vmem:[#allocation65_spill] sm:$0xff] %v7428_v4  ;;  %v1321_v4 = vrot.slane %v1307_v1, %v6521_v46  ;;  %v7473_v1 = vrot.slane %v6940_v19, %v6521_v46 }
 0x2cf   : > { %1523 = vrot.lane.b32.xlu0 %v1337_v41, %s6349_s13  ;;  %v1944_v41 = vrot.slane %v1930_v33, %v6541_v58  ;;  %v7492_v33 = vrot.slane %v6958_v14, %v6521_v46  ;;  %v1899_v14 = vcombine.high %v6773_v40, %v9270_v3 }
 0x2d0   : > { %2118 = vrot.lane.b32.xlu1 %v1894_v47, %s6355_s26  ;;  %v3046_v47 = vcombine.high %v7464_v16, %v7450_v43  ;;  %v1339_v51 = vcombine.high %v1306_v37, %v1321_v4 }
 0x2d1   : > { %v7435_v49 = vpop.permute.xlu0 %3612  ;;  %v7440_v54 = vpop.permute.xlu1 %2717  ;;  %v4835_v8 = vcombine.high %v7507_v62, %v7492_v33  ;;  %v1913_v40 = vrot.slane %v1899_v14, %v6521_v46 }
 0x2d2   : > { %9312 = vst [vmem:[#allocation66_spill] sm:$0xff] %v7435_v49 }
 0x2d3   : > { %2114 = vrot.lane.b32.xlu0 %v1897_v34, %s6351_s15 }
 0x2d4   : > { %1519 = vrot.lane.b32.xlu1 %v1354_v55, %s6350_s14  ;;  %v1338_v55 = vcombine.low %v1306_v37, %v1321_v4 }
 0x2d5   : > { %v7452_v28 = vpop.permute.xlu0 %4794  ;;  %v7459_v34 = vpop.permute.xlu1 %2725 }
 0x2d6   : > { %9313 = vst [vmem:[#allocation67_spill] sm:$0xff] %v7452_v28  ;;  %v1346_v31 = vrot.slane %v1338_v55, %v6541_v58  ;;  %v1353_v55 = vrot.slane %v1339_v51, %v6541_v58 }
 0x2d7   : > { %2122 = vrot.lane.b32.xlu0 %v1898_v61, %s6352_s17  ;;  %v1961_v61 = vcombine.high %v7457_v52, %v9270_v3 }
 0x2d8   : > { %1527 = vrot.lane.b32.xlu1 %v1355_v38, %s6353_s19  ;;  %v3653_v38 = vcombine.high %v7484_v24, %v7473_v1  ;;  %v1356_v0 = vcombine.high %v1346_v31, %v9270_v3 }
 0x2d9   : > { %v7475_v35 = vpop.permute.xlu0 %5401  ;;  %v7478_v7 = vpop.permute.xlu1 %2733 }
 0x2da   : > { %9314 = vst [vmem:[#allocation68_spill] sm:$0xff] %v7475_v35  ;;  %9315 = vst [vmem:[#allocation69_spill] sm:$0xff] %v7478_v7  ;;  %v7497_v7 = vrot.slane %v3046_v47, %v6541_v58  ;;  %v7517_v37 = vrot.slane %v3653_v38, %v6541_v58  ;;  %v1928_v47 = vrot.slane %v1914_v25, %v6521_v46 }
 0x2db   : > { %2130 = vrot.lane.b32.xlu0 %v1944_v41, %s6349_s13  ;;  %v1389_v25 = vcombine.high %v6866_v39, %v6870_v42 }
 0x2dc   : > { %2126 = vrot.lane.b32.xlu1 %v1961_v61, %s6350_s14  ;;  %v1962_v61 = vcombine.high %v1944_v41, %v9270_v3  ;;  %v1945_v38 = vcombine.low %v1913_v40, %v1928_v47  ;;  %v1946_v14 = vcombine.high %v1913_v40, %v1928_v47  ;;  %v1008_v47 = vsel %vm392_vm2, %v6886_v11, %v7377_v6 }
 0x2dd   : > { %v7494_v59 = vpop.permute.xlu0 %4490  ;;  %v7501_v36 = vpop.permute.xlu1 %4506  ;;  %v1009_v11 = vsel %vm989_vm5, %v1008_v47, %v7329_v17 }
 0x2de   : > { %9316 = vst [vmem:[#allocation70_spill] sm:$0xff] %v7494_v59  ;;  %9317 = vst [vmem:[#allocation71_spill] sm:$0xff] %v7501_v36  ;;  %v7529_v36 = vrot.slane %v4835_v8, %v6541_v58  ;;  %v1357_v59 = vcombine.high %v1353_v55, %v9270_v3  ;;  %v1953_v8 = vrot.slane %v1945_v38, %v6541_v58 }
 0x2df   : > { %3284 = vrot.lane.b32.xlu0 %v7497_v7, %s6349_s13 }
 0x2e0   : > { %2134 = vrot.lane.b32.xlu1 %v1962_v61, %s6353_s19  ;;  %v1963_v27 = vcombine.high %v1953_v8, %v9270_v3 }
 0x2e1   : > { %v950_v4 = vpop.permute.xlu0 %949  ;;  %v7520_v41 = vpop.permute.xlu1 %4514 }
 0x2e2   : > { %9318 = vst [vmem:[#allocation72_spill] sm:$0xff] %v7520_v41 }
 0x2e3   : > { %3891 = vrot.lane.b32.xlu0 %v7517_v37, %s6349_s13 }
 0x2e4   : > { %1535 = vrot.lane.b32.xlu1 %v1356_v0, %s6351_s15  ;;  %v7538_v0 = vrot.slane %v1389_v25, %v6541_v58  ;;  %v1996_v25 = vcombine.high %v6904_v63, %v6908_v2 }
 0x2e5   : > { %v958_v61 = vpop.permute.xlu0 %957  ;;  %v962_v41 = vpop.permute.xlu1 %961 }
 0x2e6   : > { %v1015_v40 = vsel %vm392_vm2, %v7057_v48, %v962_v41  ;;  %v3030_v48 = vcombine.high %v6912_v15, %v9270_v3  ;;  %v9323_v41 = vld [vmem:[#allocation34_spill] sm:$0xff]  ;;  %v7581_v47 = vrot.slane %v1996_v25, %v6541_v58 }
 0x2e7   : > { %5073 = vrot.lane.b32.xlu0 %v7529_v36, %s6349_s13 }
 0x2e8   : > { %1543 = vrot.lane.b32.xlu1 %v1357_v59, %s6352_s17  ;;  %v1960_v59 = vrot.slane %v1946_v14, %v6541_v58 }
 0x2e9   : > { %v966_v51 = vpop.permute.xlu0 %965  ;;  %v970_v35 = vpop.permute.xlu1 %969 }
 0x2ea   : > { %v1016_v14 = vsel %vm989_vm5, %v1015_v40, %v966_v51  ;;  %v9324_v51 = vld [vmem:[#allocation33_spill] sm:$0xff] }
 0x2eb   : > { %1531 = vrot.lane.b32.xlu0 %v1346_v31, %s6354_s25  ;;  %v3045_v31 = vcombine.low %v7464_v16, %v7450_v43  ;;  %v1017_v43 = vsel %vm991_vm6, %v1016_v14, %v970_v35  ;;  %v3112_v40 = vcombine.high %v9324_v51, %v9323_v41 }
 0x2ec   : > { %1551 = vrot.lane.b32.xlu1 %v7538_v0, %s6349_s13 }
 0x2ed   : > { %v7544_v28 = vpop.permute.xlu0 %4522  ;;  %v7546_v49 = vpop.permute.xlu1 %2741  ;;  %v7574_v6 = vrot.slane %v3045_v31, %v6541_v58 }
 0x2ee   : > { %9319 = vst [vmem:[#allocation73_spill] sm:$0xff] %v7544_v28  ;;  %9320 = vst [vmem:[#allocation74_spill] sm:$0xff] %v7546_v49 }
 0x2ef   : > { %1539 = vrot.lane.b32.xlu0 %v1353_v55, %s6355_s26  ;;  %v1964_v55 = vcombine.high %v1960_v59, %v9270_v3  ;;  %9322 = vst [vmem:[#allocation76_spill] sm:$0xff] %v7574_v6  ;;  %v3077_v25 = vcombine.high %v7574_v6, %v9270_v3 }
 0x2f0   : > { %2142 = vrot.lane.b32.xlu1 %v1963_v27, %s6351_s15  ;;  %v1010_v27 = vsel %vm991_vm6, %v1009_v11, %v7390_v60  ;;  %v3015_v60 = vcombine.high %v6785_v45, %v9270_v3  ;;  %v9326_v45 = vld [vmem:[#allocation38_spill] sm:$0xff] }
 0x2f1   : > { %v974_v38 = vpop.permute.xlu0 %973  ;;  %v7562_v28 = vpop.permute.xlu1 %2749  ;;  %v1011_v15 = vsel %vm993_vm7, %v1010_v27, %v7358_v22 }
 0x2f2   : > { %9321 = vst [vmem:[#allocation75_spill] sm:$0xff] %v7562_v28  ;;  %v1018_v17 = vsel %vm993_vm7, %v1017_v43, %v974_v38  ;;  %v1012_v35 = vsel %vm995_vm8, %v1011_v15, %v950_v4  ;;  %v3044_v38 = vrot.slane %v3030_v48, %v6521_v46  ;;  %v3029_v4 = vrot.slane %v3015_v60, %v6521_v46  ;;  %v9329_v60 = vld [vmem:[#allocation9_spill] sm:$0xff] }
 0x2f3   : > { %2138 = vrot.lane.b32.xlu0 %v1953_v8, %s6354_s25  ;;  %v1013_v43 = vsel %vm997_vm9, %v1012_v35, %v7372_v50  ;;  %v3078_v50 = vcombine.high %v7497_v7, %v9270_v3  ;;  %v1373_v15 = vcombine.high %v9329_v60, %v9270_v3  ;;  %v9332_v7 = vld [vmem:[#allocation6_spill] sm:$0xff]  ;;  %v3637_v60 = vcombine.high %v6940_v19, %v9270_v3  ;;  %v9342_v19 = vld [vmem:[#allocation7_spill] sm:$0xff] }
 0x2f4   : > { %2150 = vrot.lane.b32.xlu1 %v1964_v55, %s6352_s17  ;;  %v9327_v55 = vld [vmem:[#allocation37_spill] sm:$0xff] }
 0x2f5   : > { %v982_v16 = vpop.permute.xlu0 %981  ;;  %v978_v8 = vpop.permute.xlu1 %977  ;;  %v3719_v11 = vcombine.high %v9327_v55, %v9326_v45 }
 0x2f6   : > { %v1019_v31 = vsel %vm995_vm8, %v1018_v17, %v978_v8  ;;  %v1014_v17 = vsel %vm999_vm10, %v1013_v43, %v958_v61  ;;  %v9330_v61 = vld [vmem:[#allocation42_spill] sm:$0xff]  ;;  %v9336_v43 = vld [vmem:[#allocation45_spill] sm:$0xff] }
 0x2f7   : > { %2146 = vrot.lane.b32.xlu0 %v1960_v59, %s6355_s26  ;;  %v1020_v22 = vsel %vm997_vm9, %v1019_v31, %v982_v16  ;;  %v7601_v59 = vrot.slane %v3112_v40, %v6541_v58  ;;  %v3061_v16 = vcombine.low %v3029_v4, %v3044_v38  ;;  %v3652_v40 = vcombine.low %v7484_v24, %v7473_v1 }
 0x2f8   : > { %2158 = vrot.lane.b32.xlu1 %v7581_v47, %s6349_s13  ;;  %v4901_v31 = vcombine.high %v9330_v61, %v7170_v18  ;;  %v1358_v1 = vcombine.high %v9332_v7, %v9270_v3 }
 0x2f9   : > { %v7593_v14 = vpop.permute.xlu0 %2729  ;;  %v986_v27 = vpop.permute.xlu1 %985  ;;  %v7637_v24 = vrot.slane %v3652_v40, %v6541_v58 }
 0x2fa   : > { %9325 = vst [vmem:[#allocation34_spill] sm:$0xff] %v7593_v14  ;;  %v1021_v48 = vsel %vm999_vm10, %v1020_v22, %v986_v27  ;;  %v9335_v27 = vld [vmem:[#allocation46_spill] sm:$0xff]  ;;  %v1372_v40 = vrot.slane %v1358_v1, %v6521_v46 }
 0x2fb   : > { %3280 = vrot.lane.b32.xlu0 %v3077_v25, %s6350_s14  ;;  %6117 = vmatprep.subr.msk.mxu1 %vm1027_vm11, %v1021_v48  ;;  %v7626_v25 = vrot.slane %v3719_v11, %v6541_v58  ;;  %9333 = vst [vmem:[#allocation37_spill] sm:$0xff] %v7637_v24  ;;  %v7642_v11 = vrot.slane %v3061_v16, %v6541_v58 }
 0x2fc   : > { %3312 = vrot.lane.b32.xlu1 %v7601_v59, %s6349_s13  ;;  %6118 = vmatpush1.msk.msra.mxu1 %vm1027_vm11, %v1014_v17  ;;  %v5508_v48 = vcombine.high %v9336_v43, %v9335_v27  ;;  %v3062_v16 = vcombine.high %v3029_v4, %v3044_v38  ;;  %v3684_v7 = vcombine.high %v7637_v24, %v9270_v3 }
 0x2fd   : > { %v7615_v8 = vpop.permute.xlu0 %2737  ;;  %v7623_v35 = vpop.permute.xlu1 %4550  ;;  %6119 = vmatmul.mubr.msk.f32.vlgmr.msra.gmra.mxu1 %vm1023_vm12, %v7320_v32  ;;  %v1387_v32 = vrot.slane %v1373_v15, %v6521_v46  ;;  %v3622_v38 = vcombine.high %v6799_v5, %v9270_v3  ;;  %v1965_v4 = vcombine.high %v9342_v19, %v9270_v3 }
 0x2fe   : > { %9328 = vst [vmem:[#allocation33_spill] sm:$0xff] %v7615_v8  ;;  %9331 = vst [vmem:[#allocation38_spill] sm:$0xff] %v7623_v35  ;;  %1782 = vmatprep.mubr.f32.mxu1 %v9270_v3  ;;  %v7668_v1 = vrot.slane %v5508_v48, %v6541_v58 }
 0x2ff   : > { %3288 = vrot.lane.b32.xlu0 %v3078_v50, %s6353_s19  ;;  %v7650_v50 = vrot.slane %v4901_v31, %v6541_v58  ;;  %v9339_v31 = vld [vmem:[#allocation11_spill] sm:$0xff]  ;;  %v1405_v48 = vcombine.high %v1372_v40, %v1387_v32 }
 0x300   : > { %3919 = vrot.lane.b32.xlu1 %v7626_v25, %s6349_s13  ;;  %v1980_v35 = vcombine.high %v9339_v31, %v9270_v3  ;;  %9341 = vst [vmem:[#allocation45_spill] sm:$0xff] %v7668_v1  ;;  %v7681_v31 = vrot.slane %v3062_v16, %v6541_v58 }
 0x301   : > { %v7639_v22 = vpop.permute.xlu0 %4518  ;;  %v7647_v17 = vpop.permute.xlu1 %4542 }
 0x302   : > { %9334 = vst [vmem:[#allocation9_spill] sm:$0xff] %v7639_v22  ;;  %9337 = vst [vmem:[#allocation42_spill] sm:$0xff] %v7647_v17  ;;  %v1404_v17 = vcombine.low %v1372_v40, %v1387_v32  ;;  %v1994_v49 = vrot.slane %v1980_v35, %v6521_v46  ;;  %v3685_v35 = vcombine.high %v7517_v37, %v9270_v3 }
 0x303   : > { %3292 = vrot.lane.b32.xlu0 %v7642_v11, %s6354_s25 }
 0x304   : > { %5101 = vrot.lane.b32.xlu1 %v7650_v50, %s6349_s13  ;;  %v7687_v5 = vrot.slane %v1404_v17, %v6541_v58  ;;  %v7702_v17 = vrot.slane %v1405_v48, %v6541_v58 }
 0x305   : > { %v7659_v15 = vpop.permute.xlu0 %4526  ;;  %v7665_v22 = vpop.permute.xlu1 %2757 }
 0x306   : > { %9338 = vst [vmem:[#allocation6_spill] sm:$0xff] %v7659_v15  ;;  %9340 = vst [vmem:[#allocation46_spill] sm:$0xff] %v7665_v22  ;;  %v3651_v15 = vrot.slane %v3637_v60, %v6521_v46  ;;  %v1979_v60 = vrot.slane %v1965_v4, %v6521_v46  ;;  %v4834_v4 = vcombine.low %v7507_v62, %v7492_v33 }
 0x307   : > { %3887 = vrot.lane.b32.xlu0 %v3684_v7, %s6350_s14  ;;  %v3636_v7 = vrot.slane %v3622_v38, %v6521_v46 }
 0x308   : > { %5708 = vrot.lane.b32.xlu1 %v7668_v1, %s6349_s13  ;;  %v2011_v32 = vcombine.low %v1979_v60, %v1994_v49  ;;  %v2012_v37 = vcombine.high %v1979_v60, %v1994_v49  ;;  %v7728_v33 = vrot.slane %v4834_v4, %v6541_v58 }
 0x309   : > { %v7678_v28 = vpop.permute.xlu0 %4530  ;;  %v7684_v8 = vpop.permute.xlu1 %2765  ;;  %v3668_v16 = vcombine.low %v3636_v7, %v3651_v15  ;;  %v3669_v38 = vcombine.high %v3636_v7, %v3651_v15  ;;  %v9350_v15 = vld [vmem:[#allocation10_spill] sm:$0xff] }
 0x30a   : > { %9343 = vst [vmem:[#allocation11_spill] sm:$0xff] %v7678_v28  ;;  %9344 = vst [vmem:[#allocation7_spill] sm:$0xff] %v7684_v8  ;;  %v3081_v62 = vcombine.high %v9350_v15, %v9270_v3 }
 0x30b   : > { %3300 = vrot.lane.b32.xlu0 %v7681_v31, %s6355_s26  ;;  %9351 = vst [vmem:[#allocation10_spill] sm:$0xff] %v7728_v33  ;;  %v7733_v7 = vrot.slane %v3669_v38, %v6541_v58  ;;  %v4866_v38 = vcombine.high %v7728_v33, %v9270_v3  ;;  %v4867_v33 = vcombine.high %v7529_v36, %v9270_v3 }
 0x30c   : > { %1559 = vrot.lane.b32.xlu1 %v7687_v5, %s6354_s25 }
 0x30d   : > { %v7695_v19 = vpop.permute.xlu0 %4538  ;;  %v7699_v40 = vpop.permute.xlu1 %4546 }
 0x30e   : > { %9345 = vst [vmem:[#allocation77_spill] sm:$0xff] %v7695_v19  ;;  %9346 = vst [vmem:[#allocation78_spill] sm:$0xff] %v7699_v40  ;;  %v7712_v19 = vrot.slane %v3668_v16, %v6541_v58  ;;  %v9348_v40 = vld [vmem:[#allocation31_spill] sm:$0xff] }
 0x30f   : > { %3895 = vrot.lane.b32.xlu0 %v3685_v35, %s6353_s19  ;;  %v3096_v8 = vcombine.high %v9348_v40, %v9270_v3  ;;  %v7719_v35 = vrot.slane %v2011_v32, %v6541_v58  ;;  %v7739_v32 = vrot.slane %v2012_v37, %v6541_v58  ;;  %v3095_v40 = vrot.slane %v3081_v62, %v6521_v46  ;;  %v9357_v62 = vld [vmem:[#allocation19_spill] sm:$0xff] }
 0x310   : > { %1567 = vrot.lane.b32.xlu1 %v7702_v17, %s6355_s26  ;;  %v3144_v37 = vcombine.high %v7601_v59, %v9270_v3 }
 0x311   : > { %v7709_v28 = vpop.permute.xlu0 %2745  ;;  %v7716_v48 = vpop.permute.xlu1 %4554  ;;  %v3110_v60 = vrot.slane %v3096_v8, %v6521_v46 }
 0x312   : > { %9347 = vst [vmem:[#allocation79_spill] sm:$0xff] %v7709_v28  ;;  %9349 = vst [vmem:[#allocation31_spill] sm:$0xff] %v7716_v48  ;;  %v9359_v28 = vld [vmem:[#allocation23_spill] sm:$0xff] }
 0x313   : > { %3899 = vrot.lane.b32.xlu0 %v7712_v19, %s6354_s25  ;;  %v3127_v15 = vcombine.low %v3095_v40, %v3110_v60  ;;  %v3128_v14 = vcombine.high %v3095_v40, %v3110_v60 }
 0x314   : > { %2166 = vrot.lane.b32.xlu1 %v7719_v35, %s6354_s25 }
 0x315   : > { %v7730_v49 = vpop.permute.xlu0 %2753  ;;  %v7736_v16 = vpop.permute.xlu1 %4558 }
 0x316   : > { %9352 = vst [vmem:[#allocation80_spill] sm:$0xff] %v7730_v49  ;;  %9353 = vst [vmem:[#allocation81_spill] sm:$0xff] %v7736_v16  ;;  %v9356_v16 = vld [vmem:[#allocation20_spill] sm:$0xff] }
 0x317   : > { %3907 = vrot.lane.b32.xlu0 %v7733_v7, %s6355_s26  ;;  %v4850_v48 = vcombine.low %v9357_v62, %v9356_v16  ;;  %v9358_v49 = vld [vmem:[#allocation24_spill] sm:$0xff]  ;;  %v2028_v62 = vcombine.high %v7581_v47, %v9270_v3 }
 0x318   : > { %2174 = vrot.lane.b32.xlu1 %v7739_v32, %s6355_s26  ;;  %v5441_v22 = vcombine.low %v9359_v28, %v9358_v49 }
 0x319   : > { %v7746_v4 = vpop.permute.xlu0 %2761  ;;  %v7750_v8 = vpop.permute.xlu1 %4566  ;;  %v4858_v36 = vrot.slane %v4850_v48, %v6541_v58  ;;  %v3079_v48 = vcombine.high %v7642_v11, %v9270_v3  ;;  %v3080_v11 = vcombine.high %v7681_v31, %v9270_v3  ;;  %v4933_v31 = vcombine.high %v7650_v50, %v9270_v3 }
 0x31a   : > { %9354 = vst [vmem:[#allocation82_spill] sm:$0xff] %v7746_v4  ;;  %9355 = vst [vmem:[#allocation83_spill] sm:$0xff] %v7750_v8  ;;  %v9361_v8 = vld [vmem:[#allocation35_spill] sm:$0xff]  ;;  %v9372_v50 = vcombine.low %v6866_v39, %v6870_v42 }
 0x31b   : > { %5069 = vrot.lane.b32.xlu0 %v4866_v38, %s6350_s14  ;;  %v3703_v1 = vcombine.high %v9361_v8, %v9270_v3  ;;  %v3135_v38 = vrot.slane %v3127_v15, %v6541_v58  ;;  %v3142_v15 = vrot.slane %v3128_v14, %v6541_v58  ;;  %v4868_v28 = vcombine.high %v4858_v36, %v9270_v3 }
 0x31c   : > { %3316 = vrot.lane.b32.xlu1 %v3144_v37, %s6353_s19  ;;  %v9363_v37 = vld [vmem:[#allocation14_spill] sm:$0xff] }
 0x31d   : > { %v7760_v4 = vpop.permute.xlu0 %4534  ;;  %v3688_v16 = vcombine.high %v9363_v37, %v9270_v3  ;;  %v3717_v60 = vrot.slane %v3703_v1, %v6521_v46  ;;  %v3751_v1 = vcombine.high %v7626_v25, %v9270_v3  ;;  %v9371_v25 = vld [vmem:[#allocation17_spill] sm:$0xff] }
 0x31e   : > { %9360 = vst [vmem:[#allocation84_spill] sm:$0xff] %v7760_v4  ;;  %v7766_v59 = vpop.permute.xlu1 %2773  ;;  %v7774_v4 = vrot.slane %v5441_v22, %v6541_v58 }
 0x31f   : > { %9362 = vst [vmem:[#allocation35_spill] sm:$0xff] %v7766_v59  ;;  %5077 = vrot.lane.b32.xlu0 %v4867_v33, %s6353_s19  ;;  %v3702_v33 = vrot.slane %v3688_v16, %v6521_v46 }
 0x320   : > { %3320 = vrot.lane.b32.xlu1 %v3135_v38, %s6354_s25  ;;  %9364 = vst [vmem:[#allocation14_spill] sm:$0xff] %v7774_v4  ;;  %v5473_v22 = vcombine.high %v7774_v4, %v9270_v3 }
 0x321   : > { %v7776_v49 = vpop.permute.xlu0 %2769  ;;  %v3734_v37 = vcombine.low %v3702_v33, %v3717_v60  ;;  %v3735_v16 = vcombine.high %v3702_v33, %v3717_v60 }
 0x322   : > { %9365 = vst [vmem:[#allocation85_spill] sm:$0xff] %v7776_v49  ;;  %v7780_v40 = vpop.permute.xlu1 %2781 }
 0x323   : > { %9366 = vst [vmem:[#allocation86_spill] sm:$0xff] %v7780_v40  ;;  %5081 = vrot.lane.b32.xlu0 %v4858_v36, %s6354_s25  ;;  %v9369_v40 = vld [vmem:[#allocation40_spill] sm:$0xff] }
 0x324   : > { %3328 = vrot.lane.b32.xlu1 %v3142_v15, %s6355_s26 }
 0x325   : > { %v7786_v8 = vpop.permute.xlu0 %2777 }
 0x326   : > { %9367 = vst [vmem:[#allocation87_spill] sm:$0xff] %v7786_v8  ;;  %v7790_v59 = vpop.permute.xlu1 %4562  ;;  %v4885_v8 = vcombine.high %v9369_v40, %v9270_v3  ;;  %v3749_v40 = vrot.slane %v3735_v16, %v6541_v58  ;;  %v3687_v16 = vcombine.high %v7733_v7, %v9270_v3 }
 0x327   : > { %9368 = vst [vmem:[#allocation88_spill] sm:$0xff] %v7790_v59  ;;  %5676 = vrot.lane.b32.xlu0 %v5473_v22, %s6350_s14  ;;  %v3742_v59 = vrot.slane %v3734_v37, %v6541_v58  ;;  %v4870_v22 = vcombine.high %v9371_v25, %v9270_v3  ;;  %v3686_v25 = vcombine.high %v7712_v19, %v9270_v3 }
 0x328   : > { %3923 = vrot.lane.b32.xlu1 %v3751_v1, %s6353_s19  ;;  %v4899_v60 = vrot.slane %v4885_v8, %v6521_v46 }
 0x329   : > { %v7796_v14 = vpop.permute.xlu0 %1491  ;;  %v4884_v37 = vrot.slane %v4870_v22, %v6521_v46 }
 0x32a   : > { %v7802_v4 = vpop.permute.xlu1 %4570 }
 0x32b   : > { %9370 = vst [vmem:[#allocation40_spill] sm:$0xff] %v7802_v4  ;;  %3296 = vrot.lane.b32.xlu0 %v3079_v48, %s6351_s15  ;;  %v4916_v4 = vcombine.low %v4884_v37, %v4899_v60  ;;  %v4917_v22 = vcombine.high %v4884_v37, %v4899_v60  ;;  %v3145_v37 = vcombine.high %v3135_v38, %v9270_v3 }
 0x32c   : > { %3927 = vrot.lane.b32.xlu1 %v3742_v59, %s6354_s25 }
 0x32d   : > { %v7809_v1 = vpop.permute.xlu0 %1499  ;;  %v4924_v19 = vrot.slane %v4916_v4, %v6541_v58  ;;  %v7851_v60 = vrot.slane %v4917_v22, %v6541_v58  ;;  %v1421_v22 = vcombine.high %v7538_v0, %v9270_v3  ;;  %v9376_v0 = vld [vmem:[#allocation27_spill] sm:$0xff] }
 0x32e   : > { %v7814_v33 = vpop.permute.xlu1 %1495 }
 0x32f   : > { %3304 = vrot.lane.b32.xlu0 %v3080_v11, %s6352_s17 }
 0x330   : > { %3935 = vrot.lane.b32.xlu1 %v3749_v40, %s6355_s26 }
 0x331   : > { %v7820_v48 = vpop.permute.xlu0 %2098 }
 0x332   : > { %v7824_v49 = vpop.permute.xlu1 %2102 }
 0x333   : > { %3903 = vrot.lane.b32.xlu0 %v3686_v25, %s6351_s15  ;;  %v7843_v25 = vrot.slane %v9372_v50, %v6541_v58 }
 0x334   : > { %5105 = vrot.lane.b32.xlu1 %v4933_v31, %s6353_s19 }
 0x335   : > { %v7830_v8 = vpop.permute.xlu0 %2106  ;;  %9373 = vst [vmem:[#allocation17_spill] sm:$0xff] %v7843_v25  ;;  %v1420_v39 = vcombine.high %v7843_v25, %v9270_v3  ;;  %v3146_v25 = vcombine.high %v3142_v15, %v9270_v3  ;;  %v1431_v15 = vrot.slane %v9376_v0, %v6521_v46 }
 0x336   : > { %v7834_v11 = vpop.permute.xlu1 %1503 }
 0x337   : > { %3911 = vrot.lane.b32.xlu0 %v3687_v16, %s6352_s17 }
 0x338   : > { %5109 = vrot.lane.b32.xlu1 %v4924_v19, %s6354_s25 }
 0x339   : > { %v7845_v31 = vpop.permute.xlu0 %1507 }
 0x33a   : > { %v7848_v7 = vpop.permute.xlu1 %1511 }
 0x33b   : > { %5085 = vrot.lane.b32.xlu0 %v4868_v28, %s6351_s15  ;;  %v9374_v28 = vcombine.low %v6904_v63, %v6908_v2  ;;  %v1446_v2 = vrot.slane %v7233_v9, %v6521_v46 }
 0x33c   : > { %5117 = vrot.lane.b32.xlu1 %v7851_v60, %s6355_s26 }
 0x33d   : > { %v7856_v4 = vpop.permute.xlu0 %1515  ;;  %v7869_v36 = vrot.slane %v9374_v28, %v6541_v58  ;;  %v1454_v24 = vcombine.low %v1431_v15, %v1446_v2  ;;  %v1455_v47 = vcombine.high %v1431_v15, %v1446_v2  ;;  %v9383_v2 = vcombine.low %v9330_v61, %v7170_v18 }
 0x33e   : > { %v7860_v42 = vpop.permute.xlu1 %2110  ;;  %v1424_v18 = vcombine.high %v9376_v0, %v9270_v3 }
 0x33f   : > { %1547 = vrot.lane.b32.xlu0 %v1420_v39, %s6350_s14  ;;  %9375 = vst [vmem:[#allocation89_spill] sm:$0xff] %v7869_v36  ;;  %v2027_v63 = vcombine.high %v7869_v36, %v9270_v3  ;;  %v7915_v6 = vrot.slane %v1454_v24, %v6541_v58  ;;  %v7928_v15 = vrot.slane %v9383_v2, %v6541_v58 }
 0x340   : > { %3324 = vrot.lane.b32.xlu1 %v3145_v37, %s6351_s15  ;;  %v3752_v37 = vcombine.high %v3742_v59, %v9270_v3  ;;  %v1439_v24 = vcombine.high %v7233_v9, %v9270_v3  ;;  %v9385_v9 = vcombine.low %v9336_v43, %v9335_v27 }
 0x341   : > { %v7871_v16 = vpop.permute.xlu0 %1523  ;;  %9381 = vst [vmem:[#allocation91_spill] sm:$0xff] %v7915_v6 }
 0x342   : > { %v7875_v50 = vpop.permute.xlu1 %2118  ;;  %v7951_v61 = vrot.slane %v9385_v9, %v6541_v58 }
 0x343   : > { %1555 = vrot.lane.b32.xlu0 %v1421_v22, %s6353_s19 }
 0x344   : > { %3332 = vrot.lane.b32.xlu1 %v3146_v25, %s6352_s17  ;;  %v9377_v25 = vcombine.low %v9324_v51, %v9323_v41  ;;  %9386 = vst [vmem:[#allocation92_spill] sm:$0xff] %v7951_v61 }
 0x345   : > { %v7880_v38 = vpop.permute.xlu0 %2114 }
 0x346   : > { %v1520_v39 = vpop.permute.xlu1 %1519  ;;  %v7895_v28 = vrot.slane %v9377_v25, %v6541_v58 }
 0x347   : > { %2154 = vrot.lane.b32.xlu0 %v2027_v63, %s6350_s14  ;;  %v3753_v63 = vcombine.high %v3749_v40, %v9270_v3  ;;  %v1609_v43 = vsel %vm392_vm2, %v7424_v21, %v1520_v39 }
 0x348   : > { %3931 = vrot.lane.b32.xlu1 %v3752_v37, %s6351_s15  ;;  %9378 = vst [vmem:[#allocation27_spill] sm:$0xff] %v7895_v28  ;;  %v9379_v37 = vcombine.low %v9327_v55, %v9326_v45  ;;  %v3143_v25 = vcombine.high %v7895_v28, %v9270_v3  ;;  %v9382_v45 = vld [vmem:[#allocation29_spill] sm:$0xff] }
 0x349   : > { %v7897_v22 = vpop.permute.xlu0 %2122  ;;  %v2038_v55 = vrot.slane %v9382_v45, %v6521_v46  ;;  %v2031_v39 = vcombine.high %v9382_v45, %v9270_v3 }
 0x34a   : > { %v1528_v59 = vpop.permute.xlu1 %1527  ;;  %v7908_v41 = vrot.slane %v9379_v37, %v6541_v58 }
 0x34b   : > { %2162 = vrot.lane.b32.xlu0 %v2028_v62, %s6353_s19  ;;  %v2053_v62 = vrot.slane %v7248_v12, %v6521_v46 }
 0x34c   : > { %3939 = vrot.lane.b32.xlu1 %v3753_v63, %s6352_s17  ;;  %9380 = vst [vmem:[#allocation90_spill] sm:$0xff] %v7908_v41  ;;  %v4934_v63 = vcombine.high %v4924_v19, %v9270_v3  ;;  %v3750_v19 = vcombine.high %v7908_v41, %v9270_v3 }
 0x34d   : > { %v7910_v51 = vpop.permute.xlu0 %2130  ;;  %v2061_v28 = vcombine.low %v2038_v55, %v2053_v62  ;;  %v2062_v41 = vcombine.high %v2038_v55, %v2053_v62  ;;  %v2046_v62 = vcombine.high %v7248_v12, %v9270_v3  ;;  %v1610_v12 = vsel %vm989_vm5, %v1609_v43, %v7871_v16 }
 0x34e   : > { %v2127_v40 = vpop.permute.xlu1 %2126  ;;  %v1423_v43 = vcombine.high %v7702_v17, %v9270_v3 }
 0x34f   : > { %3308 = vrot.lane.b32.xlu0 %v3143_v25, %s6350_s14  ;;  %v7937_v25 = vrot.slane %v1455_v47, %v6541_v58  ;;  %v1453_v47 = vrot.slane %v1439_v24, %v6521_v46  ;;  %v7959_v0 = vrot.slane %v2061_v28, %v6541_v58  ;;  %v5539_v28 = vcombine.high %v7951_v61, %v9270_v3 }
 0x350   : > { %5113 = vrot.lane.b32.xlu1 %v4934_v63, %s6351_s15  ;;  %v1486_v63 = vcombine.high %v7915_v6, %v9270_v3  ;;  %v4932_v6 = vcombine.high %v7928_v15, %v9270_v3  ;;  %v7975_v55 = vrot.slane %v2062_v41, %v6541_v58 }
 0x351   : > { %v7932_v37 = vpop.permute.xlu0 %3284  ;;  %9387 = vst [vmem:[#allocation93_spill] sm:$0xff] %v7959_v0  ;;  %v2093_v9 = vcombine.high %v7959_v0, %v9270_v3 }
 0x352   : > { %9384 = vst [vmem:[#allocation29_spill] sm:$0xff] %v7932_v37  ;;  %v7939_v36 = vpop.permute.xlu1 %2134  ;;  %v1438_v37 = vrot.slane %v1424_v18, %v6521_v46 }
 0x353   : > { %3915 = vrot.lane.b32.xlu0 %v3750_v19, %s6350_s14 }
 0x354   : > { %1575 = vrot.lane.b32.xlu1 %v1486_v63, %s6350_s14  ;;  %v1487_v63 = vcombine.high %v7937_v25, %v9270_v3  ;;  %v1470_v27 = vcombine.low %v1438_v37, %v1453_v47  ;;  %v1471_v41 = vcombine.high %v1438_v37, %v1453_v47  ;;  %v2094_v37 = vcombine.high %v7975_v55, %v9270_v3 }
 0x355   : > { %v7954_v2 = vpop.permute.xlu0 %3891 }
 0x356   : > { %v1536_v19 = vpop.permute.xlu1 %1535  ;;  %v7994_v61 = vrot.slane %v1470_v27, %v6541_v58  ;;  %v2045_v27 = vrot.slane %v2031_v39, %v6521_v46 }
 0x357   : > { %5097 = vrot.lane.b32.xlu0 %v4932_v6, %s6350_s14  ;;  %v1602_v6 = vsel %vm392_vm2, %v7338_v44, %v7796_v14  ;;  %v1611_v44 = vsel %vm991_vm6, %v1610_v12, %v1528_v59 }
 0x358   : > { %1583 = vrot.lane.b32.xlu1 %v1487_v63, %s6353_s19  ;;  %v1603_v21 = vsel %vm989_vm5, %v1602_v6, %v7814_v33  ;;  %v1422_v63 = vcombine.high %v7687_v5, %v9270_v3  ;;  %v2060_v33 = vrot.slane %v2046_v62, %v6521_v46  ;;  %v9390_v5 = vld [vmem:[#allocation13_spill] sm:$0xff] }
 0x359   : > { %v7968_v24 = vpop.permute.xlu0 %5073  ;;  %v1604_v45 = vsel %vm991_vm6, %v1603_v21, %v7809_v1  ;;  %v8009_v47 = vcombine.high %v9390_v5, %v9270_v3  ;;  %v2029_v21 = vcombine.high %v7719_v35, %v9270_v3 }
 0x35a   : > { %9388 = vst [vmem:[#allocation94_spill] sm:$0xff] %v7968_v24  ;;  %v1544_v18 = vpop.permute.xlu1 %1543  ;;  %v1605_v59 = vsel %vm993_vm7, %v1604_v45, %v7834_v11  ;;  %v2216_v11 = vsel %vm392_vm2, %v7457_v52, %v2127_v40  ;;  %v2077_v39 = vcombine.low %v2045_v27, %v2060_v33  ;;  %v1488_v52 = vcombine.high %v7994_v61, %v9270_v3  ;;  %v9391_v40 = vld [vmem:[#allocation28_spill] sm:$0xff] }
 0x35b   : > { %5704 = vrot.lane.b32.xlu0 %v5539_v28, %s6350_s14  ;;  %v1606_v1 = vsel %vm995_vm8, %v1605_v59, %v7845_v31  ;;  %v2209_v31 = vsel %vm392_vm2, %v7367_v56, %v7820_v48  ;;  %v8042_v48 = vld [vmem:[%s6433_s16 + $0x8] sm:$0xff]  ;;  %v9414_v24 = vld [vmem:[#allocation52_spill] sm:$0xff] }
 0x35c   : > { %2182 = vrot.lane.b32.xlu1 %v2093_v9, %s6350_s14  ;;  %v8021_v9 = vrot.slane %v1471_v41, %v6541_v58  ;;  %v9393_v41 = vld [vmem:[#allocation12_spill] sm:$0xff]  ;;  %v1607_v35 = vsel %vm997_vm9, %v1606_v1, %v7848_v7  ;;  %9394 = vst [vmem:[#allocation13_spill] sm:$0xff] %v8042_v48  ;;  %v2210_v7 = vsel %vm989_vm5, %v2209_v31, %v7824_v49 }
 0x35d   : > { %v1532_v14 = vpop.permute.xlu0 %1531  ;;  %v2211_v1 = vsel %vm991_vm6, %v2210_v7, %v7830_v8  ;;  %v8065_v49 = vrot.slane %v2077_v39, %v6541_v58  ;;  %v9396_v8 = vld [vmem:[#allocation36_spill] sm:$0xff]  ;;  %v9402_v7 = vld [vmem:[#allocation66_spill] sm:$0xff] }
 0x35e   : > { %v1612_v28 = vsel %vm993_vm7, %v1611_v44, %v1532_v14  ;;  %v8000_v16 = vpop.permute.xlu1 %1551  ;;  %v9392_v44 = vld [vmem:[#allocation4_spill] sm:$0xff]  ;;  %v2791_v14 = vsel %vm392_vm2, %v9393_v41, %v7384_v53  ;;  %v2078_v53 = vcombine.high %v2045_v27, %v2060_v33 }
 0x35f   : > { %9389 = vst [vmem:[#allocation95_spill] sm:$0xff] %v8000_v16  ;;  %1563 = vrot.lane.b32.xlu0 %v1422_v63, %s6351_s15  ;;  %v1613_v6 = vsel %vm995_vm8, %v1612_v28, %v1536_v19  ;;  %v2784_v19 = vsel %vm392_vm2, %v9392_v44, %v9391_v40  ;;  %v9395_v63 = vld [vmem:[#allocation47_spill] sm:$0xff]  ;;  %v1608_v28 = vsel %vm999_vm10, %v1607_v35, %v7856_v4  ;;  %v8119_v41 = vld [vmem:[%s6433_s16 + $0x10] sm:$0xff] }
 0x360   : > { %2190 = vrot.lane.b32.xlu1 %v2094_v37, %s6353_s19  ;;  %v2785_v45 = vsel %vm989_vm5, %v2784_v19, %v9395_v63  ;;  %v2217_v37 = vsel %vm989_vm5, %v2216_v11, %v7910_v51  ;;  %v1489_v4 = vcombine.high %v8021_v9, %v9270_v3  ;;  %v2792_v51 = vsel %vm989_vm5, %v2791_v14, %v7342_v29 }
 0x361   : > { %v1540_v62 = vpop.permute.xlu0 %1539  ;;  %v2030_v29 = vcombine.high %v7739_v32, %v9270_v3  ;;  %v3162_v11 = vcombine.high %v9396_v8, %v9270_v3  ;;  %v8112_v44 = vrot.slane %v9396_v8, %v6521_v46  ;;  %9399 = vst [vmem:[#allocation28_spill] sm:$0xff] %v8119_v41 }
 0x362   : > { %v1614_v17 = vsel %vm997_vm9, %v1613_v6, %v1540_v62  ;;  %v2143_v12 = vpop.permute.xlu1 %2142  ;;  %v9397_v62 = vld [vmem:[#allocation30_spill] sm:$0xff] }
 0x363   : > { %1571 = vrot.lane.b32.xlu0 %v1423_v43, %s6352_s17  ;;  %v1615_v56 = vsel %vm999_vm10, %v1614_v17, %v1544_v18  ;;  %v2218_v18 = vsel %vm991_vm6, %v2217_v37, %v7939_v36  ;;  %v2793_v36 = vsel %vm991_vm6, %v2792_v51, %v7395_v57  ;;  %v2212_v43 = vsel %vm993_vm7, %v2211_v1, %v7860_v42  ;;  %v9404_v51 = vld [vmem:[#allocation15_spill] sm:$0xff] }
 0x364   : > { %1591 = vrot.lane.b32.xlu1 %v1488_v52, %s6351_s15  ;;  %6121 = vmatprep.subr.msk.mxu0 %vm1027_vm11, %v1615_v56  ;;  %v2786_v6 = vsel %vm991_vm6, %v2785_v45, %v9397_v62  ;;  %v2794_v57 = vsel %vm993_vm7, %v2793_v36, %v7402_v30  ;;  %v2213_v42 = vsel %vm995_vm8, %v2212_v43, %v7880_v38 }
 0x365   : > { %v2139_v59 = vpop.permute.xlu0 %2138  ;;  %6122 = vmatpush1.msk.msra.mxu0 %vm1027_vm11, %v1608_v28  ;;  %v2795_v32 = vsel %vm995_vm8, %v2794_v57, %v7440_v54  ;;  %v8093_v17 = vrot.slane %v2078_v53, %v6541_v58  ;;  %v8099_v38 = vrot.slane %v7420_v20, %v6521_v46  ;;  %v9398_v54 = vld [vmem:[#allocation32_spill] sm:$0xff]  ;;  %v8122_v14 = vrot.slane %v3162_v11, %v6521_v46 }
 0x366   : > { %v2219_v33 = vsel %vm993_vm7, %v2218_v18, %v2139_v59  ;;  %v2151_v27 = vpop.permute.xlu1 %2150  ;;  %6123 = vmatmul.mubr.msk.f32.vlgmr.msra.gmra.mxu0 %vm1023_vm12, %v8042_v48  ;;  %v2796_v35 = vsel %vm997_vm9, %v2795_v32, %v7412_v10  ;;  %v8147_v18 = vrot.slane %v9402_v7, %v6521_v46  ;;  %v8161_v59 = vld [vmem:[%s6433_s16 + $0x18] sm:$0xff]  ;;  %v3754_v1 = vcombine.high %v9404_v51, %v9270_v3 }
 0x367   : > { %1579 = vrot.lane.b32.xlu0 %v7937_v25, %s6349_s13  ;;  %2318 = vmatprep.mubr.f32.mxu0 %v9270_v3  ;;  %v2787_v25 = vsel %vm993_vm7, %v2786_v6, %v7261_v13  ;;  %v2220_v31 = vsel %vm995_vm8, %v2219_v33, %v2143_v12  ;;  %v2095_v13 = vcombine.high %v8065_v49, %v9270_v3  ;;  %v9405_v33 = vld [vmem:[#allocation41_spill] sm:$0xff] }
 0x368   : > { %1599 = vrot.lane.b32.xlu1 %v1489_v4, %s6352_s17  ;;  %v2788_v30 = vsel %vm995_vm8, %v2787_v25, %v7309_v23  ;;  %v8108_v12 = vrot.slane %v9398_v54, %v6521_v46  ;;  %v2214_v23 = vsel %vm997_vm9, %v2213_v42, %v7875_v50  ;;  %v9400_v50 = vld [vmem:[#allocation44_spill] sm:$0xff]  ;;  %v2797_v45 = vsel %vm999_vm10, %v2796_v35, %v7459_v34  ;;  %v9406_v25 = vld [vmem:[#allocation50_spill] sm:$0xff] }
 0x369   : > { %v2147_v39 = vpop.permute.xlu0 %2146  ;;  %v2215_v56 = vsel %vm999_vm10, %v2214_v23, %v7897_v22  ;;  %v2789_v63 = vsel %vm997_vm9, %v2788_v30, %v7281_v26  ;;  %v2096_v10 = vcombine.high %v8093_v17, %v9270_v3  ;;  %v9401_v22 = vld [vmem:[#allocation59_spill] sm:$0xff]  ;;  %v8156_v34 = vrot.slane %v9390_v5, %v6521_v46  ;;  %9403 = vst [vmem:[#allocation4_spill] sm:$0xff] %v8161_v59  ;;  %v9407_v23 = vld [vmem:[#allocation16_spill] sm:$0xff] }
 0x36a   : > { %v2221_v52 = vsel %vm997_vm9, %v2220_v31, %v2147_v39  ;;  %v8102_v40 = vpop.permute.xlu1 %2158  ;;  %v2790_v37 = vsel %vm999_vm10, %v2789_v63, %v9401_v22  ;;  %v3244_v53 = vcombine.high %v8108_v12, %v8099_v38  ;;  %v8165_v4 = vrot.slane %v8009_v47, %v6521_v46 }
 0x36b   : > { %2170 = vrot.lane.b32.xlu0 %v2029_v21, %s6351_s15  ;;  %v2222_v19 = vsel %vm999_vm10, %v2221_v52, %v2151_v27  ;;  %v3769_v21 = vcombine.high %v9400_v50, %v9270_v3  ;;  %v8171_v27 = vrot.slane %v9405_v33, %v6521_v46  ;;  %v3178_v5 = vcombine.high %v8156_v34, %v8112_v44 }
 0x36c   : > { %2198 = vrot.lane.b32.xlu1 %v2095_v13, %s6351_s15  ;;  %6128 = vmatprep.subr.msk.mxu0 %vm1027_vm11, %v2222_v19  ;;  %v8179_v36 = vrot.slane %v9400_v50, %v6521_v46  ;;  %v3194_v43 = vcombine.high %v8165_v4, %v8122_v14  ;;  %v8193_v62 = vrot.slane %v3244_v53, %v6541_v58 }
 0x36d   : > { %v8136_v28 = vpop.permute.xlu0 %3280  ;;  %6129 = vmatpush1.msk.msra.mxu0 %vm1027_vm11, %v2215_v56  ;;  %v3851_v8 = vcombine.high %v8171_v27, %v8147_v18  ;;  %v8199_v6 = vrot.slane %v9404_v51, %v6521_v46  ;;  %v8205_v57 = vrot.slane %v3754_v1, %v6521_v46  ;;  %v8213_v32 = vrot.slane %v9406_v25, %v6521_v46 }
 0x36e   : > { %v8149_v26 = vpop.permute.xlu1 %3312  ;;  %6135 = vmatprep.subr.msk.mxu0 %vm1027_vm11, %v2797_v45  ;;  %6130 = vmatmul.mubr.msk.f32.vlgmr.msra.gmra.mxu0 %vm1023_vm12, %v8119_v41  ;;  %v8218_v31 = vrot.slane %v3178_v5, %v6541_v58  ;;  %v8228_v13 = vrot.slane %v3194_v43, %v6541_v58  ;;  %v8232_v19 = vrot.slane %v9407_v23, %v6521_v46 }
 0x36f   : > { %2178 = vrot.lane.b32.xlu0 %v2030_v29, %s6352_s17  ;;  %6136 = vmatpush1.msk.msra.mxu0 %vm1027_vm11, %v2790_v37  ;;  %v8186_v29 = vrot.slane %v3769_v21, %v6521_v46  ;;  %v3785_v42 = vcombine.high %v8199_v6, %v8179_v36  ;;  %v8225_v52 = vrot.slane %v3851_v8, %v6541_v58  ;;  %v9408_v21 = vld [vmem:[#allocation67_spill] sm:$0xff]  ;;  %v9410_v37 = vld [vmem:[#allocation48_spill] sm:$0xff] }
 0x370   : > { %2206 = vrot.lane.b32.xlu1 %v2096_v10, %s6352_s17  ;;  %2893 = vmatprep.mubr.f32.mxu0 %v9270_v3  ;;  %v4967_v35 = vcombine.high %v8232_v19, %v8213_v32  ;;  %v8247_v63 = vrot.slane %v9408_v21, %v6521_v46  ;;  %v3212_v10 = vcombine.high %v8228_v13, %v9270_v3 }
 0x371   : > { %v8181_v47 = vpop.permute.xlu0 %3288  ;;  %v8243_v50 = vrot.slane %v3785_v42, %v6541_v58  ;;  %v8260_v53 = vrot.slane %v9410_v37, %v6521_v46  ;;  %v3243_v41 = vcombine.low %v8108_v12, %v8099_v38  ;;  %v3228_v38 = vcombine.high %v7420_v20, %v9270_v3 }
 0x372   : > { %v8190_v11 = vpop.permute.xlu1 %3919  ;;  %6137 = vmatmul.mubr.msk.f32.vlgmr.msra.gmra.mxu0 %vm1023_vm12, %v8161_v59  ;;  %v8266_v1 = vrot.slane %v4967_v35, %v6541_v58  ;;  %v8292_v59 = vrot.slane %v9414_v24, %v6521_v46 }
 0x373   : > { %2186 = vrot.lane.b32.xlu0 %v7975_v55, %s6349_s13  ;;  %3500 = vmatprep.mubr.f32.mxu0 %v9270_v3  ;;  %v3801_v55 = vcombine.high %v8205_v57, %v8186_v29  ;;  %v5033_v5 = vcombine.high %v8260_v53, %v8247_v63  ;;  %v8316_v12 = vrot.slane %v3243_v41, %v6541_v58 }
 0x374   : > { %3368 = vrot.lane.b32.xlu1 %v8193_v62, %s6349_s13  ;;  %v3242_v41 = vrot.slane %v3228_v38, %v6521_v46  ;;  %v3850_v38 = vcombine.low %v8171_v27, %v8147_v18  ;;  %v3210_v18 = vcombine.high %v8218_v31, %v9270_v3 }
 0x375   : > { %v8215_v39 = vpop.permute.xlu0 %3292  ;;  %v8254_v22 = vrot.slane %v3801_v55, %v6541_v58  ;;  %v9412_v55 = vld [vmem:[#allocation68_spill] sm:$0xff]  ;;  %9416 = vst [vmem:[#allocation32_spill] sm:$0xff] %v8316_v12 }
 0x376   : > { %v8222_v30 = vpop.permute.xlu1 %5101  ;;  %v8364_v27 = vrot.slane %v3850_v38, %v6541_v58 }
 0x377   : > { %3340 = vrot.lane.b32.xlu0 %v8218_v31, %s6349_s13  ;;  %v3819_v8 = vcombine.high %v8254_v22, %v9270_v3  ;;  %v3835_v31 = vcombine.high %v9402_v7, %v9270_v3 }
 0x378   : > { %3975 = vrot.lane.b32.xlu1 %v8225_v52, %s6349_s13  ;;  %9422 = vst [vmem:[#allocation50_spill] sm:$0xff] %v8364_v27 }
 0x379   : > { %v8240_v56 = vpop.permute.xlu0 %3887  ;;  %v3849_v7 = vrot.slane %v3835_v31, %v6521_v46  ;;  %v3883_v31 = vcombine.high %v8225_v52, %v9270_v3 }
 0x37a   : > { %v8249_v45 = vpop.permute.xlu1 %5708 }
 0x37b   : > { %9409 = vst [vmem:[#allocation12_spill] sm:$0xff] %v8249_v45  ;;  %3947 = vrot.lane.b32.xlu0 %v8243_v50, %s6349_s13  ;;  %v8286_v45 = vrot.slane %v5033_v5, %v6541_v58 }
 0x37c   : > { %3360 = vrot.lane.b32.xlu1 %v3212_v10, %s6352_s17  ;;  %v8281_v10 = vrot.slane %v9412_v55, %v6521_v46 }
 0x37d   : > { %v8263_v51 = vpop.permute.xlu0 %3300 }
 0x37e   : > { %v8270_v43 = vpop.permute.xlu1 %1559  ;;  %v5640_v48 = vcombine.high %v8292_v59, %v8281_v10 }
 0x37f   : > { %9411 = vst [vmem:[#allocation47_spill] sm:$0xff] %v8270_v43  ;;  %5129 = vrot.lane.b32.xlu0 %v8266_v1, %s6349_s13 }
 0x380   : > { %3967 = vrot.lane.b32.xlu1 %v3819_v8, %s6352_s17 }
 0x381   : > { %v8277_v42 = vpop.permute.xlu0 %3895 }
 0x382   : > { %v8283_v35 = vpop.permute.xlu1 %1567 }
 0x383   : > { %9413 = vst [vmem:[#allocation36_spill] sm:$0xff] %v8283_v35  ;;  %1587 = vrot.lane.b32.xlu0 %v7994_v61, %s6354_s25  ;;  %v4935_v61 = vcombine.high %v7851_v60, %v9270_v3  ;;  %v3177_v35 = vcombine.low %v8156_v34, %v8112_v44  ;;  %v8321_v60 = vrot.slane %v5640_v48, %v6541_v58 }
 0x384   : > { %5157 = vrot.lane.b32.xlu1 %v8286_v45, %s6349_s13  ;;  %v3275_v48 = vcombine.high %v8316_v12, %v9270_v3  ;;  %v3276_v12 = vcombine.high %v8193_v62, %v9270_v3 }
 0x385   : > { %v8296_v8 = vpop.permute.xlu0 %3899  ;;  %v8330_v44 = vrot.slane %v3177_v35, %v6541_v58 }
 0x386   : > { %v8302_v5 = vpop.permute.xlu1 %2166 }
 0x387   : > { %9415 = vst [vmem:[#allocation30_spill] sm:$0xff] %v8302_v5  ;;  %1595 = vrot.lane.b32.xlu0 %v8021_v9, %s6355_s26  ;;  %v3213_v9 = vcombine.high %v9398_v54, %v9270_v3  ;;  %9418 = vst [vmem:[#allocation59_spill] sm:$0xff] %v8330_v44  ;;  %v3209_v35 = vcombine.high %v8330_v44, %v9270_v3 }
 0x388   : > { %5121 = vrot.lane.b32.xlu1 %v4935_v61, %s6352_s17 }
 0x389   : > { %v8311_v0 = vpop.permute.xlu0 %3907 }
 0x38a   : > { %v8318_v5 = vpop.permute.xlu1 %2174 }
 0x38b   : > { %9417 = vst [vmem:[#allocation44_spill] sm:$0xff] %v8318_v5  ;;  %2194 = vrot.lane.b32.xlu0 %v8065_v49, %s6354_s25  ;;  %v3227_v49 = vrot.slane %v3213_v9, %v6521_v46  ;;  %v3784_v9 = vcombine.low %v8199_v6, %v8179_v36 }
 0x38c   : > { %5764 = vrot.lane.b32.xlu1 %v8321_v60, %s6349_s13 }
 0x38d   : > { %v8332_v20 = vpop.permute.xlu0 %5069  ;;  %v3259_v61 = vcombine.low %v3227_v49, %v3242_v41  ;;  %v3260_v6 = vcombine.high %v3227_v49, %v3242_v41 }
 0x38e   : > { %9419 = vst [vmem:[#allocation66_spill] sm:$0xff] %v8332_v20  ;;  %v8335_v34 = vpop.permute.xlu1 %3316 }
 0x38f   : > { %2202 = vrot.lane.b32.xlu0 %v8093_v17, %s6355_s26  ;;  %v3193_v17 = vcombine.low %v8165_v4, %v8122_v14  ;;  %v8369_v62 = vrot.slane %v3259_v61, %v6541_v58  ;;  %v8375_v14 = vrot.slane %v3784_v9, %v6541_v58  ;;  %v3820_v61 = vcombine.high %v9405_v33, %v9270_v3 }
 0x390   : > { %3364 = vrot.lane.b32.xlu1 %v3275_v48, %s6350_s14 }
 0x391   : > { %v8343_v54 = vpop.permute.xlu0 %5077  ;;  %9423 = vst [vmem:[#allocation16_spill] sm:$0xff] %v8375_v14  ;;  %v8380_v36 = vrot.slane %v3193_v17, %v6541_v58  ;;  %v3816_v41 = vcombine.high %v8375_v14, %v9270_v3  ;;  %v8401_v17 = vrot.slane %v3260_v6, %v6541_v58  ;;  %v3834_v9 = vrot.slane %v3820_v61, %v6521_v46 }
 0x392   : > { %9420 = vst [vmem:[#allocation15_spill] sm:$0xff] %v8343_v54  ;;  %v8349_v20 = vpop.permute.xlu1 %3320  ;;  %v3800_v6 = vcombine.low %v8205_v57, %v8186_v29  ;;  %v4966_v29 = vcombine.low %v8232_v19, %v8213_v32  ;;  %v5002_v32 = vcombine.high %v9410_v37, %v9270_v3  ;;  %v4951_v19 = vcombine.high %v9406_v25, %v9270_v3 }
 0x393   : > { %3336 = vrot.lane.b32.xlu0 %v3209_v35, %s6350_s14  ;;  %v3882_v35 = vcombine.high %v8364_v27, %v9270_v3  ;;  %v4936_v37 = vcombine.high %v9407_v23, %v9270_v3  ;;  %v3277_v16 = vcombine.high %v8369_v62, %v9270_v3 }
 0x394   : > { %3372 = vrot.lane.b32.xlu1 %v3276_v12, %s6353_s19  ;;  %v5016_v25 = vrot.slane %v5002_v32, %v6521_v46  ;;  %v5065_v32 = vcombine.high %v8286_v45, %v9270_v3  ;;  %v4999_v45 = vcombine.high %v8266_v1, %v9270_v3  ;;  %v9435_v1 = vld [vmem:[#allocation89_spill] sm:$0xff] }
 0x395   : > { %v8359_v48 = vpop.permute.xlu0 %5081 }
 0x396   : > { %9421 = vst [vmem:[#allocation41_spill] sm:$0xff] %v8359_v48  ;;  %v8366_v54 = vpop.permute.xlu1 %3328  ;;  %v5032_v48 = vcombine.low %v8260_v53, %v8247_v63 }
 0x397   : > { %3344 = vrot.lane.b32.xlu0 %v3210_v18, %s6353_s19  ;;  %v3866_v18 = vcombine.low %v3834_v9, %v3849_v7 }
 0x398   : > { %3376 = vrot.lane.b32.xlu1 %v8369_v62, %s6354_s25  ;;  %v8442_v63 = vrot.slane %v5032_v48, %v6541_v58 }
 0x399   : > { %v8377_v4 = vpop.permute.xlu0 %5676  ;;  %v8427_v52 = vrot.slane %v3866_v18, %v6541_v58 }
 0x39a   : > { %9424 = vst [vmem:[#allocation67_spill] sm:$0xff] %v8377_v4  ;;  %v8384_v12 = vpop.permute.xlu1 %3923  ;;  %v3867_v4 = vcombine.high %v3834_v9, %v3849_v7  ;;  %9425 = vst [vmem:[#allocation48_spill] sm:$0xff] %v8442_v63  ;;  %v5064_v18 = vcombine.high %v8442_v63, %v9270_v3 }
 0x39b   : > { %3348 = vrot.lane.b32.xlu0 %v8380_v36, %s6354_s25 }
 0x39c   : > { %3971 = vrot.lane.b32.xlu1 %v3882_v35, %s6350_s14  ;;  %v8447_v7 = vrot.slane %v3867_v4, %v6541_v58 }
 0x39d   : > { %v8393_v38 = vpop.permute.xlu0 %3296 }
 0x39e   : > { %v8398_v49 = vpop.permute.xlu1 %3927 }
 0x39f   : > { %3943 = vrot.lane.b32.xlu0 %v3816_v41, %s6350_s14  ;;  %v3817_v41 = vcombine.high %v8243_v50, %v9270_v3  ;;  %v5017_v50 = vcombine.high %v9408_v21, %v9270_v3  ;;  %v8458_v21 = vrot.slane %v4966_v29, %v6541_v58 }
 0x3a0   : > { %3384 = vrot.lane.b32.xlu1 %v8401_v17, %s6355_s26 }
 0x3a1   : > { %v8407_v33 = vpop.permute.xlu0 %3304  ;;  %9427 = vst [vmem:[#allocation52_spill] sm:$0xff] %v8458_v21  ;;  %v5031_v4 = vrot.slane %v5017_v50, %v6521_v46  ;;  %v4998_v50 = vcombine.high %v8458_v21, %v9270_v3 }
 0x3a2   : > { %v8409_v35 = vpop.permute.xlu1 %3935 }
 0x3a3   : > { %3356 = vrot.lane.b32.xlu0 %v8228_v13, %s6355_s26  ;;  %v8437_v13 = vrot.slane %v3800_v6, %v6541_v58  ;;  %v9430_v6 = vld [vmem:[#allocation53_spill] sm:$0xff]  ;;  %v5048_v23 = vcombine.low %v5016_v25, %v5031_v4 }
 0x3a4   : > { %3979 = vrot.lane.b32.xlu1 %v3883_v31, %s6353_s19  ;;  %v8474_v31 = vrot.slane %v4951_v19, %v6521_v46  ;;  %v8489_v19 = vrot.slane %v4936_v37, %v6521_v46 }
 0x3a5   : > { %v8418_v61 = vpop.permute.xlu0 %3903  ;;  %v8509_v44 = vrot.slane %v5048_v23, %v6541_v58 }
 0x3a6   : > { %v8424_v27 = vpop.permute.xlu1 %5105  ;;  %v4982_v21 = vcombine.low %v8489_v19, %v8474_v31 }
 0x3a7   : > { %3951 = vrot.lane.b32.xlu0 %v3817_v41, %s6353_s19  ;;  %v8478_v41 = vrot.slane %v9430_v6, %v6521_v46 }
 0x3a8   : > { %3983 = vrot.lane.b32.xlu1 %v8427_v52, %s6354_s25  ;;  %v4990_v5 = vrot.slane %v4982_v21, %v6541_v58 }
 0x3a9   : > { %v8434_v57 = vpop.permute.xlu0 %3911 }
 0x3aa   : > { %v8444_v53 = vpop.permute.xlu1 %5109 }
 0x3ab   : > { %9426 = vst [vmem:[#allocation68_spill] sm:$0xff] %v8444_v53  ;;  %3955 = vrot.lane.b32.xlu0 %v8437_v13, %s6354_s25 }
 0x3ac   : > { %3991 = vrot.lane.b32.xlu1 %v8447_v7, %s6355_s26 }
 0x3ad   : > { %v8460_v48 = vpop.permute.xlu0 %5085 }
 0x3ae   : > { %9428 = vst [vmem:[#allocation96_spill] sm:$0xff] %v8460_v48  ;;  %v8463_v9 = vpop.permute.xlu1 %5117 }
 0x3af   : > { %9429 = vst [vmem:[#allocation97_spill] sm:$0xff] %v8463_v9  ;;  %3963 = vrot.lane.b32.xlu0 %v8254_v22, %s6355_s26  ;;  %v5639_v22 = vcombine.low %v8292_v59, %v8281_v10  ;;  %v5049_v9 = vcombine.high %v5016_v25, %v5031_v4  ;;  %v9438_v25 = vld [vmem:[#allocation60_spill] sm:$0xff] }
 0x3b0   : > { %5153 = vrot.lane.b32.xlu1 %v5064_v18, %s6350_s14  ;;  %v9431_v18 = vld [vmem:[#allocation18_spill] sm:$0xff] }
 0x3b1   : > { %v8480_v29 = vpop.permute.xlu0 %1547  ;;  %v8493_v63 = vrot.slane %v9431_v18, %v6521_v46  ;;  %v8506_v37 = vrot.slane %v5639_v22, %v6541_v58 }
 0x3b2   : > { %v3325_v48 = vpop.permute.xlu1 %3324 }
 0x3b3   : > { %5125 = vrot.lane.b32.xlu0 %v4998_v50, %s6350_s14  ;;  %v5573_v59 = vcombine.low %v8493_v63, %v8478_v41  ;;  %9433 = vst [vmem:[#allocation18_spill] sm:$0xff] %v8506_v37  ;;  %v5671_v23 = vcombine.high %v8506_v37, %v9270_v3 }
 0x3b4   : > { %5161 = vrot.lane.b32.xlu1 %v5065_v32, %s6353_s19 }
 0x3b5   : > { %v8501_v10 = vpop.permute.xlu0 %1555  ;;  %v8515_v50 = vrot.slane %v5573_v59, %v6541_v58 }
 0x3b6   : > { %9432 = vst [vmem:[#allocation53_spill] sm:$0xff] %v8501_v10  ;;  %v3333_v14 = vpop.permute.xlu1 %3332  ;;  %v9436_v10 = vld [vmem:[#allocation70_spill] sm:$0xff] }
 0x3b7   : > { %5133 = vrot.lane.b32.xlu0 %v4999_v45, %s6353_s19  ;;  %9434 = vst [vmem:[#allocation98_spill] sm:$0xff] %v8515_v50  ;;  %v9437_v45 = vld [vmem:[#allocation26_spill] sm:$0xff]  ;;  %v5605_v4 = vcombine.high %v8515_v50, %v9270_v3  ;;  %v9444_v50 = vld [vmem:[#allocation29_spill] sm:$0xff] }
 0x3b8   : > { %5165 = vrot.lane.b32.xlu1 %v8509_v44, %s6354_s25  ;;  %v4580_v53 = vsel %vm392_vm2, %v9437_v45, %v9436_v10  ;;  %v8539_v10 = vrot.slane %v5049_v9, %v6541_v58  ;;  %v9440_v45 = vld [vmem:[#allocation76_spill] sm:$0xff] }
 0x3b9   : > { %v2155_v32 = vpop.permute.xlu0 %2154 }
 0x3ba   : > { %v2223_v22 = vsel %vm392_vm2, %v9435_v1, %v2155_v32  ;;  %v8520_v43 = vpop.permute.xlu1 %3931  ;;  %v4581_v32 = vsel %vm989_vm5, %v4580_v53, %v9438_v25  ;;  %v9443_v25 = vld [vmem:[#allocation5_spill] sm:$0xff] }
 0x3bb   : > { %5137 = vrot.lane.b32.xlu0 %v4990_v5, %s6354_s25  ;;  %v2224_v21 = vsel %vm989_vm5, %v2223_v22, %v8102_v40  ;;  %v9441_v40 = vld [vmem:[#allocation63_spill] sm:$0xff] }
 0x3bc   : > { %5760 = vrot.lane.b32.xlu1 %v5671_v23, %s6350_s14  ;;  %v3391_v23 = vsel %vm392_vm2, %v9440_v45, %v8136_v28  ;;  %v4582_v22 = vsel %vm991_vm6, %v4581_v32, %v9441_v40  ;;  %v9445_v28 = vld [vmem:[#allocation27_spill] sm:$0xff] }
 0x3bd   : > { %v2163_v59 = vpop.permute.xlu0 %2162 }
 0x3be   : > { %v8536_v1 = vsel %vm991_vm6, %v2224_v21, %v2163_v59  ;;  %v3940_v37 = vpop.permute.xlu1 %3939  ;;  %v3211_v59 = vcombine.high %v8380_v36, %v9270_v3  ;;  %v9442_v21 = vld [vmem:[#allocation55_spill] sm:$0xff]  ;;  %v9446_v36 = vld [vmem:[#allocation37_spill] sm:$0xff] }
 0x3bf   : > { %9439 = vst [vmem:[#allocation89_spill] sm:$0xff] %v8536_v1  ;;  %5732 = vrot.lane.b32.xlu0 %v5605_v4, %s6350_s14  ;;  %v4573_v9 = vsel %vm392_vm2, %v9443_v25, %v9442_v21  ;;  %v3392_v1 = vsel %vm989_vm5, %v3391_v23, %v9444_v50  ;;  %v3998_v40 = vsel %vm392_vm2, %v9446_v36, %v8240_v56  ;;  %v9447_v50 = vld [vmem:[#allocation64_spill] sm:$0xff]  ;;  %v8612_v36 = vld [vmem:[%s6433_s16 + $0x20] sm:$0xff] }
 0x3c0   : > { %5173 = vrot.lane.b32.xlu1 %v8539_v10, %s6355_s26  ;;  %v3393_v32 = vsel %vm991_vm6, %v3392_v1, %v8181_v47  ;;  %v4583_v23 = vsel %vm993_vm7, %v4582_v22, %v9447_v50  ;;  %v9448_v47 = vld [vmem:[#allocation25_spill] sm:$0xff]  ;;  %v3818_v22 = vcombine.high %v8437_v13, %v9270_v3 }
 0x3c1   : > { %v3309_v53 = vpop.permute.xlu0 %3308  ;;  %v4574_v1 = vsel %vm989_vm5, %v4573_v9, %v9448_v47  ;;  %v3278_v9 = vcombine.high %v8401_v17, %v9270_v3 }
 0x3c2   : > { %v3398_v4 = vsel %vm392_vm2, %v9445_v28, %v3309_v53  ;;  %v8558_v45 = vpop.permute.xlu1 %5113  ;;  %v3394_v53 = vsel %vm993_vm7, %v3393_v32, %v8215_v39  ;;  %v3999_v39 = vsel %vm989_vm5, %v3998_v40, %v7954_v2  ;;  %v9450_v28 = vld [vmem:[#allocation71_spill] sm:$0xff] }
 0x3c3   : > { %v3399_v21 = vsel %vm989_vm5, %v3398_v4, %v8149_v26  ;;  %3352 = vrot.lane.b32.xlu0 %v3211_v59, %s6351_s15  ;;  %v3395_v56 = vsel %vm995_vm8, %v3394_v53, %v8393_v38  ;;  %v4000_v13 = vsel %vm991_vm6, %v3999_v39, %v8277_v42  ;;  %v8661_v39 = vld [vmem:[%s6433_s16 + $0x28] sm:$0xff] }
 0x3c4   : > { %v3400_v62 = vsel %vm991_vm6, %v3399_v21, %v8335_v34  ;;  %3380 = vrot.lane.b32.xlu1 %v3277_v16, %s6351_s15  ;;  %v9449_v34 = vld [vmem:[#allocation90_spill] sm:$0xff]  ;;  %v4001_v32 = vsel %vm993_vm7, %v4000_v13, %v8296_v8  ;;  %v3396_v17 = vsel %vm997_vm9, %v3395_v56, %v8263_v51  ;;  %v5000_v51 = vcombine.high %v4990_v5, %v9270_v3 }
 0x3c5   : > { %v3401_v26 = vsel %vm993_vm7, %v3400_v62, %v8349_v20  ;;  %v3916_v59 = vpop.permute.xlu0 %3915  ;;  %v4584_v20 = vsel %vm995_vm8, %v4583_v23, %v9450_v28  ;;  %v9453_v23 = vld [vmem:[#allocation65_spill] sm:$0xff]  ;;  %v5066_v13 = vcombine.high %v8509_v44, %v9270_v3 }
 0x3c6   : > { %v4005_v16 = vsel %vm392_vm2, %v9449_v34, %v3916_v59  ;;  %v8589_v25 = vpop.permute.xlu1 %1575  ;;  %v3402_v38 = vsel %vm995_vm8, %v3401_v26, %v3325_v48  ;;  %v4585_v5 = vsel %vm997_vm9, %v4584_v20, %v9453_v23  ;;  %v9454_v62 = vld [vmem:[#allocation61_spill] sm:$0xff]  ;;  %v9456_v59 = vld [vmem:[#allocation20_spill] sm:$0xff] }
 0x3c7   : > { %v4006_v4 = vsel %vm989_vm5, %v4005_v16, %v8190_v11  ;;  %3959 = vrot.lane.b32.xlu0 %v3818_v22, %s6351_s15  ;;  %v3403_v2 = vsel %vm997_vm9, %v3402_v38, %v8366_v54  ;;  %v3397_v11 = vsel %vm999_vm10, %v3396_v17, %v8407_v33  ;;  %v4002_v54 = vsel %vm995_vm8, %v4001_v32, %v8418_v61  ;;  %v9461_v17 = vld [vmem:[#allocation23_spill] sm:$0xff] }
 0x3c8   : > { %v4007_v48 = vsel %vm991_vm6, %v4006_v4, %v8384_v12  ;;  %3388 = vrot.lane.b32.xlu1 %v3278_v9, %s6352_s17  ;;  %v3404_v42 = vsel %vm999_vm10, %v3403_v2, %v3333_v14  ;;  %v9451_v12 = vld [vmem:[#allocation56_spill] sm:$0xff]  ;;  %v3884_v33 = vcombine.high %v8427_v52, %v9270_v3  ;;  %v9460_v9 = vld [vmem:[#allocation62_spill] sm:$0xff]  ;;  %v5574_v2 = vcombine.high %v8493_v63, %v8478_v41  ;;  %v9464_v41 = vld [vmem:[#allocation43_spill] sm:$0xff] }
 0x3c9   : > { %v4008_v8 = vsel %vm993_vm7, %v4007_v48, %v8398_v49  ;;  %v8620_v40 = vpop.permute.xlu0 %5097  ;;  %6142 = vmatprep.subr.msk.mxu0 %vm1027_vm11, %v3404_v42  ;;  %v4575_v14 = vsel %vm991_vm6, %v4574_v1, %v9451_v12  ;;  %v9452_v49 = vld [vmem:[#allocation57_spill] sm:$0xff]  ;;  %v4983_v1 = vcombine.high %v8489_v19, %v8474_v31  ;;  %v9459_v31 = vld [vmem:[#allocation58_spill] sm:$0xff]  ;;  %v8690_v4 = vld [vmem:[%s6433_s16 + $0x30] sm:$0xff] }
 0x3ca   : > { %v8626_v21 = vpop.permute.xlu1 %1583  ;;  %6143 = vmatpush1.msk.msra.mxu0 %vm1027_vm11, %v3397_v11  ;;  %v4009_v61 = vsel %vm995_vm8, %v4008_v8, %v8520_v43  ;;  %v4576_v50 = vsel %vm993_vm7, %v4575_v14, %v9452_v49  ;;  %v4003_v43 = vsel %vm997_vm9, %v4002_v54, %v8311_v0  ;;  %v9462_v48 = vld [vmem:[#allocation24_spill] sm:$0xff]  ;;  %v5067_v54 = vcombine.high %v8539_v10, %v9270_v3  ;;  %v9465_v14 = vld [vmem:[#allocation45_spill] sm:$0xff]  ;;  %v9467_v49 = vld [vmem:[#allocation22_spill] sm:$0xff] }
 0x3cb   : > { %5141 = vrot.lane.b32.xlu0 %v5000_v51, %s6351_s15  ;;  %6144 = vmatmul.mubr.msk.f32.vlgmr.msra.gmra.mxu0 %vm1023_vm12, %v8612_v36  ;;  %v4010_v53 = vsel %vm997_vm9, %v4009_v61, %v8409_v35  ;;  %v4577_v52 = vsel %vm995_vm8, %v4576_v50, %v9454_v62  ;;  %v4004_v56 = vsel %vm999_vm10, %v4003_v43, %v8434_v57  ;;  %v9455_v35 = vld [vmem:[#allocation19_spill] sm:$0xff]  ;;  %v9466_v10 = vld [vmem:[#allocation21_spill] sm:$0xff] }
 0x3cc   : > { %3987 = vrot.lane.b32.xlu1 %v3884_v33, %s6351_s15  ;;  %v4011_v47 = vsel %vm999_vm10, %v4010_v53, %v3940_v37  ;;  %4107 = vmatprep.mubr.f32.mxu0 %v9270_v3  ;;  %v9457_v0 = vcombine.high %v9455_v35, %v9456_v59  ;;  %v9458_v37 = vld [vmem:[#allocation72_spill] sm:$0xff]  ;;  %v3885_v57 = vcombine.high %v8447_v7, %v9270_v3 }
 0x3cd   : > { %v8653_v26 = vpop.permute.xlu0 %5704  ;;  %6149 = vmatprep.subr.msk.mxu0 %vm1027_vm11, %v4011_v47  ;;  %v4586_v34 = vsel %vm999_vm10, %v4585_v5, %v9458_v37  ;;  %v4578_v19 = vsel %vm997_vm9, %v4577_v52, %v9459_v31  ;;  %v4997_v7 = vrot.slane %v4983_v1, %v6541_v58  ;;  %v9463_v42 = vcombine.high %v9461_v17, %v9462_v48  ;;  %v9468_v47 = vld [vmem:[#allocation8_spill] sm:$0xff] }
 0x3ce   : > { %v4865_v22 = vrot.slane %v9457_v0, %v6541_v58  ;;  %v8665_v16 = vpop.permute.xlu1 %2182  ;;  %6150 = vmatpush1.msk.msra.mxu0 %vm1027_vm11, %v4004_v56  ;;  %v4579_v38 = vsel %vm999_vm10, %v4578_v19, %v9460_v9  ;;  %v5588_v63 = vrot.slane %v5574_v2, %v6541_v58  ;;  %v5492_v51 = vcombine.high %v9464_v41, %v9270_v3 }
 0x3cf   : > { %6156 = vmatprep.subr.msk.mxu0 %vm1027_vm11, %v4586_v34  ;;  %6151 = vmatmul.mubr.msk.f32.vlgmr.msra.gmra.mxu0 %vm1023_vm12, %v8661_v39  ;;  %v5456_v11 = vrot.slane %v9463_v42, %v6541_v58  ;;  %v5540_v33 = vcombine.high %v9465_v14, %v9270_v3  ;;  %v5477_v61 = vcombine.high %v9466_v10, %v9270_v3 }
 0x3d0   : > { %5089 = vrot.lane.b32.xlu0 %v4865_v22, %s6355_s26  ;;  %3995 = vrot.lane.b32.xlu1 %v3885_v57, %s6352_s17  ;;  %v5426_v50 = vcombine.high %v9467_v49, %v9270_v3  ;;  %v4869_v5 = vcombine.high %v4865_v22, %v9270_v3  ;;  %v8729_v53 = vrot.slane %v5492_v51, %v6521_v46 }
 0x3d1   : > { %6157 = vmatpush1.msk.msra.mxu0 %vm1027_vm11, %v4579_v38  ;;  %v8680_v28 = vpop.permute.xlu0 %1563  ;;  %4682 = vmatprep.mubr.f32.mxu0 %v9270_v3  ;;  %v5624_v62 = vcombine.high %v9412_v55, %v9270_v3  ;;  %v5672_v43 = vcombine.high %v8321_v60, %v9270_v3  ;;  %v5411_v1 = vcombine.high %v9468_v47, %v9270_v3 }
 0x3d2   : > { %v8684_v20 = vpop.permute.xlu1 %2190  ;;  %v8741_v56 = vrot.slane %v5477_v61, %v6521_v46  ;;  %v5609_v35 = vcombine.high %v9414_v24, %v9270_v3  ;;  %v8747_v55 = vrot.slane %v5426_v50, %v6521_v46  ;;  %v5558_v59 = vcombine.high %v9430_v6, %v9270_v3  ;;  %v9470_v61 = vld [vmem:[#allocation91_spill] sm:$0xff] }
 0x3d3   : > { %6158 = vmatmul.mubr.msk.f32.vlgmr.msra.gmra.mxu0 %vm1023_vm12, %v8690_v4  ;;  %v5474_v0 = vcombine.high %v5456_v11, %v9270_v3  ;;  %v8757_v37 = vrot.slane %v5624_v62, %v6521_v46  ;;  %v5001_v24 = vcombine.high %v4997_v7, %v9270_v3  ;;  %v5425_v57 = vrot.slane %v5411_v1, %v6521_v46 }
 0x3d4   : > { %5145 = vrot.lane.b32.xlu0 %v4997_v7, %s6355_s26  ;;  %5169 = vrot.lane.b32.xlu1 %v5066_v13, %s6351_s15  ;;  %v5523_v22 = vcombine.low %v8741_v56, %v8729_v53  ;;  %v5543_v31 = vcombine.high %v9431_v18, %v9270_v3  ;;  %v5623_v6 = vrot.slane %v5609_v35, %v6521_v46 }
 0x3d5   : > { %v8697_v32 = vpop.permute.xlu0 %1571  ;;  %5289 = vmatprep.mubr.f32.mxu0 %v9270_v3  ;;  %v5457_v19 = vcombine.low %v5425_v57, %v8747_v55  ;;  %v8770_v9 = vrot.slane %v5558_v59, %v6521_v46  ;;  %v5606_v13 = vcombine.high %v5588_v63, %v9270_v3  ;;  %v1623_v49 = vsel %vm392_vm2, %v9470_v61, %v8589_v25  ;;  %v9471_v25 = vld [vmem:[#allocation95_spill] sm:$0xff]  ;;  %v9472_v59 = vld [vmem:[#allocation68_spill] sm:$0xff] }
 0x3d6   : > { %v8704_v44 = vpop.permute.xlu1 %1591  ;;  %v5655_v7 = vcombine.low %v5623_v6, %v8757_v37  ;;  %v5531_v18 = vrot.slane %v5523_v22, %v6541_v58  ;;  %v8778_v17 = vrot.slane %v5543_v31, %v6521_v46  ;;  %v5187_v46 = vsel %vm392_vm2, %v7928_v15, %v8620_v40  ;;  %v9469_v15 = vld [vmem:[#allocation17_spill] sm:$0xff] }
 0x3d7   : > { %v5188_v14 = vsel %vm989_vm5, %v5187_v46, %v8222_v30  ;;  %v1616_v40 = vsel %vm392_vm2, %v9469_v15, %v8480_v29  ;;  %v5524_v62 = vcombine.high %v8741_v56, %v8729_v53  ;;  %v5458_v1 = vcombine.high %v5425_v57, %v8747_v55  ;;  %v9473_v56 = vld [vmem:[#allocation53_spill] sm:$0xff]  ;;  %v9478_v46 = vld [vmem:[#allocation51_spill] sm:$0xff]  ;;  %v9480_v15 = vld [vmem:[#allocation82_spill] sm:$0xff] }
 0x3d8   : > { %5680 = vrot.lane.b32.xlu0 %v5456_v11, %s6349_s13  ;;  %5177 = vrot.lane.b32.xlu1 %v5067_v54, %s6352_s17  ;;  %v5589_v48 = vcombine.low %v8778_v17, %v8770_v9  ;;  %v5465_v11 = vrot.slane %v5457_v19, %v6541_v58  ;;  %v5541_v10 = vcombine.high %v5531_v18, %v9270_v3 }
 0x3d9   : > { %v8710_v8 = vpop.permute.xlu0 %1579  ;;  %v5189_v50 = vsel %vm991_vm6, %v5188_v14, %v8424_v27  ;;  %v5656_v27 = vcombine.high %v5623_v6, %v8757_v37  ;;  %v1617_v35 = vsel %vm989_vm5, %v1616_v40, %v9471_v25  ;;  %v5538_v57 = vrot.slane %v5524_v62, %v6541_v58 }
 0x3da   : > { %v8715_v12 = vpop.permute.xlu1 %1599  ;;  %v5597_v51 = vrot.slane %v5589_v48, %v6541_v58  ;;  %v5190_v53 = vsel %vm993_vm7, %v5189_v50, %v9472_v59  ;;  %v5472_v6 = vrot.slane %v5458_v1, %v6541_v58  ;;  %v5590_v19 = vcombine.high %v8778_v17, %v8770_v9  ;;  %v9481_v50 = vld [vmem:[#allocation97_spill] sm:$0xff] }
 0x3db   : > { %v5191_v31 = vsel %vm995_vm8, %v5190_v53, %v8558_v45  ;;  %v9485_v53 = vld [vmem:[#allocation33_spill] sm:$0xff] }
 0x3dc   : > { %5736 = vrot.lane.b32.xlu0 %v5588_v63, %s6349_s13  ;;  %5712 = vrot.lane.b32.xlu1 %v5540_v33, %s6353_s19  ;;  %v5663_v63 = vrot.slane %v5655_v7, %v6541_v58  ;;  %v5607_v55 = vcombine.high %v5597_v51, %v9270_v3 }
 0x3dd   : > { %v8725_v23 = vpop.permute.xlu0 %2170 }
 0x3de   : > { %v8733_v52 = vpop.permute.xlu1 %2198  ;;  %v5673_v29 = vcombine.high %v5663_v63, %v9270_v3 }
 0x3e0   : > { %5093 = vrot.lane.b32.xlu0 %v4869_v5, %s6352_s17  ;;  %5768 = vrot.lane.b32.xlu1 %v5672_v43, %s6353_s19  ;;  %v5475_v5 = vcombine.high %v5465_v11, %v9270_v3  ;;  %v1624_v43 = vsel %vm989_vm5, %v1623_v49, %v8710_v8  ;;  %v1618_v8 = vsel %vm991_vm6, %v1617_v35, %v9473_v56 }
 0x3e1   : > { %v8751_v60 = vpop.permute.xlu0 %2178  ;;  %v1625_v22 = vsel %vm991_vm6, %v1624_v43, %v8626_v21  ;;  %v9475_v21 = vld [vmem:[#allocation39_spill] sm:$0xff]  ;;  %v9482_v43 = vld [vmem:[#allocation36_spill] sm:$0xff] }
 0x3e2   : > { %v8759_v34 = vpop.permute.xlu1 %2206 }
 0x3e4   : > { %5684 = vrot.lane.b32.xlu0 %v5474_v0, %s6353_s19  ;;  %5149 = vrot.lane.b32.xlu1 %v5001_v24, %s6352_s17 }
 0x3e5   : > { %v2187_v38 = vpop.permute.xlu0 %2186 }
 0x3e6   : > { %v8774_v2 = vpop.permute.xlu1 %3368 }
 0x3e8   : > { %5740 = vrot.lane.b32.xlu0 %v5606_v13, %s6353_s19  ;;  %5716 = vrot.lane.b32.xlu1 %v5531_v18, %s6354_s25  ;;  %v9474_v13 = vld [vmem:[#allocation34_spill] sm:$0xff]  ;;  %v9476_v18 = vld [vmem:[#allocation47_spill] sm:$0xff] }
 0x3e9   : > { %v8784_v42 = vpop.permute.xlu0 %3340  ;;  %v2798_v7 = vsel %vm392_vm2, %v9475_v21, %v9474_v13  ;;  %v1619_v48 = vsel %vm993_vm7, %v1618_v8, %v9476_v18  ;;  %v9486_v8 = vld [vmem:[#allocation85_spill] sm:$0xff]  ;;  %v9490_v13 = vld [vmem:[#allocation74_spill] sm:$0xff] }
 0x3ea   : > { %v8787_v54 = vpop.permute.xlu1 %3975  ;;  %v1620_v9 = vsel %vm995_vm8, %v1619_v48, %v8680_v28 }
 0x3ec   : > { %5688 = vrot.lane.b32.xlu0 %v5465_v11, %s6354_s25  ;;  %5772 = vrot.lane.b32.xlu1 %v5663_v63, %s6354_s25  ;;  %v5670_v11 = vrot.slane %v5656_v27, %v6541_v58  ;;  %v9477_v63 = vld [vmem:[#allocation46_spill] sm:$0xff]  ;;  %v9484_v27 = vld [vmem:[#allocation7_spill] sm:$0xff] }
 0x3ed   : > { %v8795_v41 = vpop.permute.xlu0 %3947  ;;  %v2805_v45 = vsel %vm392_vm2, %v9478_v46, %v9477_v63  ;;  %v5476_v63 = vcombine.high %v5472_v6, %v9270_v3  ;;  %v9492_v46 = vld [vmem:[#allocation79_spill] sm:$0xff] }
 0x3ee   : > { %v8800_v33 = vpop.permute.xlu1 %3360  ;;  %v2806_v40 = vsel %vm989_vm5, %v2805_v45, %v9480_v15 }
 0x3ef   : > { %v2807_v25 = vsel %vm991_vm6, %v2806_v40, %v9484_v27  ;;  %v9495_v40 = vld [vmem:[#allocation75_spill] sm:$0xff] }
 0x3f0   : > { %5744 = vrot.lane.b32.xlu0 %v5597_v51, %s6354_s25  ;;  %5720 = vrot.lane.b32.xlu1 %v5541_v10, %s6351_s15  ;;  %v9479_v51 = vld [vmem:[#allocation93_spill] sm:$0xff] }
 0x3f1   : > { %v8813_v30 = vpop.permute.xlu0 %5129  ;;  %v2230_v14 = vsel %vm392_vm2, %v9479_v51, %v8665_v16 }
 0x3f2   : > { %v8820_v47 = vpop.permute.xlu1 %3967  ;;  %v2231_v61 = vsel %vm989_vm5, %v2230_v14, %v2187_v38  ;;  %v5604_v38 = vrot.slane %v5590_v19, %v6541_v58  ;;  %v2808_v58 = vsel %vm993_vm7, %v2807_v25, %v9486_v8 }
 0x3f3   : > { %v2232_v59 = vsel %vm991_vm6, %v2231_v61, %v8684_v20  ;;  %v9489_v20 = vld [vmem:[#allocation13_spill] sm:$0xff] }
 0x3f4   : > { %5692 = vrot.lane.b32.xlu0 %v5475_v5, %s6351_s15  ;;  %5776 = vrot.lane.b32.xlu1 %v5673_v29, %s6351_s15  ;;  %v5192_v5 = vsel %vm997_vm9, %v5191_v31, %v9481_v50  ;;  %v9483_v29 = vld [vmem:[#allocation69_spill] sm:$0xff] }
 0x3f5   : > { %v1588_v0 = vpop.permute.xlu0 %1587  ;;  %v2799_v1 = vsel %vm989_vm5, %v2798_v7, %v9483_v29 }
 0x3f6   : > { %v1626_v24 = vsel %vm993_vm7, %v1625_v22, %v1588_v0  ;;  %v8837_v37 = vpop.permute.xlu1 %5157  ;;  %v2800_v56 = vsel %vm991_vm6, %v2799_v1, %v9485_v53 }
 0x3f7   : > { %v1627_v10 = vsel %vm995_vm8, %v1626_v24, %v8704_v44  ;;  %v1621_v44 = vsel %vm997_vm9, %v1620_v9, %v9482_v43  ;;  %v9488_v24 = vld [vmem:[#allocation89_spill] sm:$0xff]  ;;  %v2801_v21 = vsel %vm993_vm7, %v2800_v56, %v9490_v13 }
 0x3f8   : > { %5748 = vrot.lane.b32.xlu0 %v5607_v55, %s6351_s15  ;;  %5724 = vrot.lane.b32.xlu1 %v5538_v57, %s6355_s26  ;;  %v1622_v35 = vsel %vm999_vm10, %v1621_v44, %v8697_v32  ;;  %v5542_v55 = vcombine.high %v5538_v57, %v9270_v3  ;;  %v9487_v32 = vld [vmem:[#allocation30_spill] sm:$0xff]  ;;  %v9491_v57 = vld [vmem:[#allocation35_spill] sm:$0xff]  ;;  %v2802_v45 = vsel %vm995_vm8, %v2801_v21, %v9492_v46  ;;  %v9499_v44 = vld [vmem:[#allocation4_spill] sm:$0xff] }
 0x3f9   : > { %v1596_v17 = vpop.permute.xlu0 %1595  ;;  %v2226_v31 = vsel %vm993_vm7, %v9488_v24, %v9487_v32  ;;  %v2809_v7 = vsel %vm995_vm8, %v2808_v58, %v9491_v57  ;;  %v2803_v61 = vsel %vm997_vm9, %v2802_v45, %v9495_v40  ;;  %v9501_v21 = vld [vmem:[#allocation59_spill] sm:$0xff]  ;;  %v9504_v40 = vld [vmem:[#allocation50_spill] sm:$0xff] }
 0x3fa   : > { %v1628_v49 = vsel %vm997_vm9, %v1627_v10, %v1596_v17  ;;  %v5122_v62 = vpop.permute.xlu1 %5121  ;;  %v2227_v19 = vsel %vm995_vm8, %v2226_v31, %v8725_v23  ;;  %v9493_v23 = vld [vmem:[#allocation87_spill] sm:$0xff]  ;;  %v5674_v17 = vcombine.high %v5670_v11, %v9270_v3  ;;  %v9494_v10 = vld [vmem:[#allocation44_spill] sm:$0xff] }
 0x3fb   : > { %v5193_v16 = vsel %vm999_vm10, %v5192_v5, %v5122_v62  ;;  %v1629_v28 = vsel %vm999_vm10, %v1628_v49, %v8715_v12  ;;  %v2810_v51 = vsel %vm997_vm9, %v2809_v7, %v9493_v23  ;;  %v2228_v15 = vsel %vm997_vm9, %v2227_v19, %v9494_v10  ;;  %v9497_v5 = vld [vmem:[#allocation80_spill] sm:$0xff]  ;;  %v9500_v19 = vld [vmem:[#allocation18_spill] sm:$0xff] }
 0x3fc   : > { %5696 = vrot.lane.b32.xlu0 %v5472_v6, %s6355_s26  ;;  %5780 = vrot.lane.b32.xlu1 %v5670_v11, %s6355_s26  ;;  %v2229_v6 = vsel %vm999_vm10, %v2228_v15, %v8751_v60  ;;  %v9496_v11 = vld [vmem:[#allocation86_spill] sm:$0xff]  ;;  %v2804_v62 = vsel %vm999_vm10, %v2803_v61, %v9497_v5  ;;  %v5608_v60 = vcombine.high %v5604_v38, %v9270_v3 }
 0x3fd   : > { %6163 = vmatprep.subr.msk.mxu0 %vm1027_vm11, %v5193_v16  ;;  %6124 = vmatprep.subr.msk.mxu1 %vm1027_vm11, %v1629_v28  ;;  %v2195_v12 = vpop.permute.xlu0 %2194  ;;  %v2811_v50 = vsel %vm999_vm10, %v2810_v51, %v9496_v11  ;;  %v9498_v16 = vld [vmem:[#allocation28_spill] sm:$0xff]  ;;  %v9505_v11 = vld [vmem:[#allocation9_spill] sm:$0xff] }
 0x3fe   : > { %v2233_v0 = vsel %vm993_vm7, %v2232_v59, %v2195_v12  ;;  %6125 = vmatpush1.msk.msra.mxu1 %vm1027_vm11, %v1622_v35  ;;  %v5765_v22 = vpop.permute.xlu1 %5764 }
 0x3ff   : > { %6126 = vmatmul.mubr.msk.f32.vlgmr.msra.gmra.mxu1 %vm1023_vm12, %v9489_v20  ;;  %v2234_v48 = vsel %vm995_vm8, %v2233_v0, %v8733_v52 }
 0x400   : > { %5752 = vrot.lane.b32.xlu0 %v5604_v38, %s6355_s26  ;;  %5728 = vrot.lane.b32.xlu1 %v5542_v55, %s6352_s17 }
 0x401   : > { %2389 = vmatprep.mubr.f32.mxu1 %v9270_v3  ;;  %v2203_v18 = vpop.permute.xlu0 %2202 }
 0x402   : > { %v2235_v14 = vsel %vm997_vm9, %v2234_v48, %v2203_v18  ;;  %v3365_v9 = vpop.permute.xlu1 %3364  ;;  %v9502_v18 = vld [vmem:[#allocation32_spill] sm:$0xff] }
 0x403   : > { %v2236_v52 = vsel %vm999_vm10, %v2235_v14, %v8759_v34  ;;  %v3412_v48 = vsel %vm392_vm2, %v9502_v18, %v3365_v9 }
 0x404   : > { %5700 = vrot.lane.b32.xlu0 %v5476_v63, %s6352_s17  ;;  %5784 = vrot.lane.b32.xlu1 %v5674_v17, %s6352_s17  ;;  %v3413_v23 = vsel %vm989_vm5, %v3412_v48, %v8774_v2  ;;  %v9513_v48 = vld [vmem:[#allocation31_spill] sm:$0xff] }
 0x405   : > { %6131 = vmatprep.subr.msk.mxu1 %vm1027_vm11, %v2236_v52  ;;  %v3337_v49 = vpop.permute.xlu0 %3336 }
 0x406   : > { %6132 = vmatpush1.msk.msra.mxu1 %vm1027_vm11, %v2229_v6  ;;  %v3373_v34 = vpop.permute.xlu1 %3372  ;;  %v3405_v57 = vsel %vm392_vm2, %v9501_v21, %v3337_v49  ;;  %v9503_v6 = vld [vmem:[#allocation16_spill] sm:$0xff] }
 0x407   : > { %6138 = vmatprep.subr.msk.mxu1 %vm1027_vm11, %v2811_v50  ;;  %6133 = vmatmul.mubr.msk.f32.vlgmr.msra.gmra.mxu1 %vm1023_vm12, %v9498_v16  ;;  %v3406_v45 = vsel %vm989_vm5, %v3405_v57, %v8784_v42  ;;  %v3414_v14 = vsel %vm991_vm6, %v3413_v23, %v3373_v34  ;;  %v9506_v50 = vld [vmem:[#allocation49_spill] sm:$0xff]  ;;  %v9508_v16 = vld [vmem:[#allocation54_spill] sm:$0xff] }
 0x408   : > { %6139 = vmatpush1.msk.msra.mxu1 %vm1027_vm11, %v2804_v62  ;;  %2964 = vmatprep.mubr.f32.mxu1 %v9270_v3  ;;  %v4587_v5 = vsel %vm392_vm2, %v9506_v50, %v9505_v11 }
 0x409   : > { %5756 = vrot.lane.b32.xlu1 %v5608_v60, %s6352_s17  ;;  %v3345_v28 = vpop.permute.xlu0 %3344  ;;  %v9507_v60 = vld [vmem:[#allocation78_spill] sm:$0xff] }
 0x40a   : > { %v3377_v43 = vpop.permute.xlu1 %3376  ;;  %v3407_v51 = vsel %vm991_vm6, %v3406_v45, %v3345_v28  ;;  %v4594_v28 = vsel %vm392_vm2, %v9508_v16, %v9507_v60  ;;  %v9521_v60 = vld [vmem:[#allocation42_spill] sm:$0xff] }
 0x40b   : > { %6140 = vmatmul.mubr.msk.f32.vlgmr.msra.gmra.mxu1 %vm1023_vm12, %v9499_v44  ;;  %v3415_v10 = vsel %vm993_vm7, %v3414_v14, %v3377_v43 }
 0x40c   : > { %3571 = vmatprep.mubr.f32.mxu1 %v9270_v3 }
 0x40d   : > { %v3349_v29 = vpop.permute.xlu0 %3348 }
 0x40e   : > { %v3972_v1 = vpop.permute.xlu1 %3971 }
 0x40f   : > { %v4019_v2 = vsel %vm392_vm2, %v9504_v40, %v3972_v1  ;;  %v9518_v40 = vld [vmem:[#allocation77_spill] sm:$0xff] }
 0x411   : > { %v3944_v27 = vpop.permute.xlu0 %3943 }
 0x412   : > { %v3385_v38 = vpop.permute.xlu1 %3384  ;;  %v4012_v42 = vsel %vm392_vm2, %v9503_v6, %v3944_v27 }
 0x413   : > { %v4013_v43 = vsel %vm989_vm5, %v4012_v42, %v8795_v41 }
 0x415   : > { %v3357_v25 = vpop.permute.xlu0 %3356 }
 0x416   : > { %v3980_v35 = vpop.permute.xlu1 %3979 }
 0x419   : > { %v3952_v12 = vpop.permute.xlu0 %3951 }
 0x41a   : > { %v3984_v59 = vpop.permute.xlu1 %3983  ;;  %v4014_v1 = vsel %vm991_vm6, %v4013_v43, %v3952_v12  ;;  %v9511_v12 = vld [vmem:[#allocation38_spill] sm:$0xff] }
 0x41b   : > { %v4595_v21 = vsel %vm989_vm5, %v4594_v28, %v9511_v12  ;;  %v9522_v28 = vld [vmem:[#allocation66_spill] sm:$0xff]  ;;  %v9528_v12 = vld [vmem:[#allocation96_spill] sm:$0xff] }
 0x41c   : > { %v4596_v45 = vsel %vm991_vm6, %v4595_v21, %v9513_v48  ;;  %v9523_v43 = vld [vmem:[#allocation10_spill] sm:$0xff] }
 0x41d   : > { %v3956_v53 = vpop.permute.xlu0 %3955 }
 0x41e   : > { %v3992_v56 = vpop.permute.xlu1 %3991 }
 0x421   : > { %v3964_v8 = vpop.permute.xlu0 %3963 }
 0x422   : > { %v5154_v58 = vpop.permute.xlu1 %5153 }
 0x425   : > { %v8943_v0 = vpop.permute.xlu0 %5125 }
 0x426   : > { %v8945_v55 = vpop.permute.xlu1 %5161 }
 0x429   : > { %v8947_v32 = vpop.permute.xlu0 %5133 }
 0x42a   : > { %v8949_v24 = vpop.permute.xlu1 %5165 }
 0x42d   : > { %v8951_v31 = vpop.permute.xlu0 %5137 }
 0x42e   : > { %v5761_v20 = vpop.permute.xlu1 %5760 }
 0x42f   : > { %v5808_v13 = vsel %vm392_vm2, %v9500_v19, %v5761_v20  ;;  %v4015_v19 = vsel %vm993_vm7, %v4014_v1, %v3956_v53  ;;  %v9524_v1 = vld [vmem:[#allocation94_spill] sm:$0xff] }
 0x430   : > { %v8958_v7 = vsel %vm989_vm5, %v5808_v13, %v5765_v22  ;;  %v3408_v22 = vsel %vm993_vm7, %v3407_v51, %v3349_v29  ;;  %v4020_v29 = vsel %vm989_vm5, %v4019_v2, %v8787_v54  ;;  %v9510_v13 = vld [vmem:[#allocation6_spill] sm:$0xff]  ;;  %v9514_v51 = vld [vmem:[#allocation81_spill] sm:$0xff] }
 0x431   : > { %v8962_v63 = vpop.permute.xlu0 %5732  ;;  %v4021_v20 = vsel %vm991_vm6, %v4020_v29, %v3980_v35  ;;  %v9512_v35 = vld [vmem:[#allocation11_spill] sm:$0xff]  ;;  %v4597_v14 = vsel %vm993_vm7, %v4596_v45, %v9514_v51 }
 0x432   : > { %v8964_v46 = vpop.permute.xlu1 %5173  ;;  %v4022_v57 = vsel %vm993_vm7, %v4021_v20, %v3984_v59  ;;  %v9515_v59 = vld [vmem:[#allocation84_spill] sm:$0xff] }
 0x435   : > { %v3353_v17 = vpop.permute.xlu0 %3352 }
 0x436   : > { %v3409_v9 = vsel %vm995_vm8, %v3408_v22, %v3353_v17  ;;  %v3381_v15 = vpop.permute.xlu1 %3380  ;;  %v9516_v17 = vld [vmem:[#allocation88_spill] sm:$0xff] }
 0x437   : > { %v3416_v52 = vsel %vm995_vm8, %v3415_v10, %v3381_v15  ;;  %v3410_v61 = vsel %vm997_vm9, %v3409_v9, %v3357_v25  ;;  %v4598_v10 = vsel %vm995_vm8, %v4597_v14, %v9516_v17 }
 0x438   : > { %v3417_v62 = vsel %vm997_vm9, %v3416_v52, %v3385_v38  ;;  %v3411_v27 = vsel %vm999_vm10, %v3410_v61, %v8800_v33  ;;  %v9509_v38 = vld [vmem:[#allocation73_spill] sm:$0xff] }
 0x439   : > { %v3960_v49 = vpop.permute.xlu0 %3959  ;;  %v4588_v25 = vsel %vm989_vm5, %v4587_v5, %v9509_v38 }
 0x43a   : > { %v3389_v34 = vpop.permute.xlu1 %3388  ;;  %v4589_v54 = vsel %vm991_vm6, %v4588_v25, %v9510_v13  ;;  %v4016_v33 = vsel %vm995_vm8, %v4015_v19, %v3960_v49  ;;  %v9519_v49 = vld [vmem:[#allocation83_spill] sm:$0xff]  ;;  %v9526_v13 = vld [vmem:[#allocation41_spill] sm:$0xff] }
 0x43b   : > { %v3418_v44 = vsel %vm999_vm10, %v3417_v62, %v3389_v34  ;;  %v4590_v53 = vsel %vm993_vm7, %v4589_v54, %v9512_v35  ;;  %v4017_v15 = vsel %vm997_vm9, %v4016_v33, %v3964_v8  ;;  %v4599_v11 = vsel %vm997_vm9, %v4598_v10, %v9519_v49  ;;  %v9525_v25 = vld [vmem:[#allocation15_spill] sm:$0xff]  ;;  %v9527_v54 = vld [vmem:[#allocation52_spill] sm:$0xff] }
 0x43c   : > { %6145 = vmatprep.subr.msk.mxu1 %vm1027_vm11, %v3418_v44  ;;  %v4591_v22 = vsel %vm995_vm8, %v4590_v53, %v9515_v59  ;;  %v4018_v8 = vsel %vm999_vm10, %v4017_v15, %v8820_v47 }
 0x43d   : > { %6146 = vmatpush1.msk.msra.mxu1 %vm1027_vm11, %v3411_v27  ;;  %v9002_v41 = vpop.permute.xlu0 %5141  ;;  %v4592_v2 = vsel %vm997_vm9, %v4591_v22, %v9518_v40 }
 0x43e   : > { %v3988_v18 = vpop.permute.xlu1 %3987  ;;  %6147 = vmatmul.mubr.msk.f32.vlgmr.msra.gmra.mxu1 %vm1023_vm12, %v8612_v36  ;;  %v9517_v36 = vld [vmem:[#allocation48_spill] sm:$0xff]  ;;  %v4593_v47 = vsel %vm999_vm10, %v4592_v2, %v9521_v60 }
 0x43f   : > { %v4023_v23 = vsel %vm995_vm8, %v4022_v57, %v3988_v18  ;;  %4178 = vmatprep.mubr.f32.mxu1 %v9270_v3  ;;  %v5201_v9 = vsel %vm392_vm2, %v9517_v36, %v5154_v58  ;;  %v9520_v58 = vld [vmem:[#allocation40_spill] sm:$0xff]  ;;  %v6162_v18 = vld [vmem:[%s6433_s16 + $0x38] sm:$0xff] }
 0x440   : > { %v4024_v6 = vsel %vm997_vm9, %v4023_v23, %v3992_v56  ;;  %v5202_v50 = vsel %vm989_vm5, %v5201_v9, %v8837_v37  ;;  %v4600_v56 = vsel %vm999_vm10, %v4599_v11, %v9520_v58  ;;  %v9530_v2 = vld [vmem:[#allocation12_spill] sm:$0xff] }
 0x441   : > { %v5203_v5 = vsel %vm991_vm6, %v5202_v50, %v8945_v55  ;;  %v9532_v50 = vld [vmem:[#allocation14_spill] sm:$0xff] }
 0x442   : > { %v5090_v52 = vpop.permute.xlu0 %5089  ;;  %v3996_v42 = vpop.permute.xlu1 %3995  ;;  %v5204_v34 = vsel %vm993_vm7, %v5203_v5, %v8949_v24  ;;  %v5180_v24 = vsel %vm392_vm2, %v9523_v43, %v9522_v28  ;;  %v9533_v43 = vld [vmem:[#allocation98_spill] sm:$0xff] }
 0x443   : > { %v4025_v61 = vsel %vm999_vm10, %v4024_v6, %v3996_v42  ;;  %v5181_v27 = vsel %vm989_vm5, %v5180_v24, %v9524_v1  ;;  %v9529_v6 = vld [vmem:[#allocation92_spill] sm:$0xff]  ;;  %v5801_v24 = vsel %vm392_vm2, %v9533_v43, %v8962_v63 }
 0x444   : > { %6152 = vmatprep.subr.msk.mxu1 %vm1027_vm11, %v4025_v61  ;;  %v5182_v20 = vsel %vm991_vm6, %v5181_v27, %v9525_v25  ;;  %v5794_v42 = vsel %vm392_vm2, %v9529_v6, %v8653_v26 }
 0x445   : > { %6153 = vmatpush1.msk.msra.mxu1 %vm1027_vm11, %v4018_v8  ;;  %v5795_v61 = vsel %vm989_vm5, %v5794_v42, %v9530_v2 }
 0x446   : > { %v5146_v62 = vpop.permute.xlu0 %5145  ;;  %6159 = vmatprep.subr.msk.mxu1 %vm1027_vm11, %v4600_v56  ;;  %v5170_v37 = vpop.permute.xlu1 %5169  ;;  %6154 = vmatmul.mubr.msk.f32.vlgmr.msra.gmra.mxu1 %vm1023_vm12, %v8661_v39 }
 0x447   : > { %v5205_v16 = vsel %vm995_vm8, %v5204_v34, %v5170_v37  ;;  %6160 = vmatpush1.msk.msra.mxu1 %vm1027_vm11, %v4593_v47  ;;  %4753 = vmatprep.mubr.f32.mxu1 %v9270_v3 }
 0x448   : > { %v5206_v44 = vsel %vm997_vm9, %v5205_v16, %v8964_v46  ;;  %v5183_v46 = vsel %vm993_vm7, %v5182_v20, %v9526_v13 }
 0x449   : > { %v5184_v21 = vsel %vm995_vm8, %v5183_v46, %v9528_v12  ;;  %v1106_v12 = vpop.f32.mrf.mxu1 }
 0x44a   : > { %v5681_v55 = vpop.permute.xlu0 %5680  ;;  %v5178_v29 = vpop.permute.xlu1 %5177  ;;  %6161 = vmatmul.mubr.msk.f32.vlgmr.msra.gmra.mxu1 %vm1023_vm12, %v8690_v4  ;;  %v5194_v4 = vsel %vm392_vm2, %v9527_v54, %v8943_v0  ;;  %v5185_v57 = vsel %vm997_vm9, %v5184_v21, %v5090_v52 }
 0x44b   : > { %v5207_v39 = vsel %vm999_vm10, %v5206_v44, %v5178_v29  ;;  %5360 = vmatprep.mubr.f32.mxu1 %v9270_v3  ;;  %v5195_v35 = vsel %vm989_vm5, %v5194_v4, %v8813_v30  ;;  %v1108_v21 = vpop.f32.mrf.mxu1 }
 0x44c   : > { %6166 = vmatprep.subr.msk.mxu1 %vm1027_vm11, %v5207_v39  ;;  %v5196_v45 = vsel %vm991_vm6, %v5195_v35, %v8947_v32 }
 0x44d   : > { %v5197_v0 = vsel %vm993_vm7, %v5196_v45, %v8951_v31 }
 0x44e   : > { %v5737_v38 = vpop.permute.xlu0 %5736  ;;  %v5713_v19 = vpop.permute.xlu1 %5712  ;;  %v5198_v23 = vsel %vm995_vm8, %v5197_v0, %v9002_v41 }
 0x44f   : > { %v5199_v30 = vsel %vm997_vm9, %v5198_v23, %v5146_v62  ;;  %v5796_v11 = vsel %vm991_vm6, %v5795_v61, %v5713_v19  ;;  %v5802_v1 = vsel %vm989_vm5, %v5801_v24, %v5737_v38 }
 0x452   : > { %v5094_v33 = vpop.permute.xlu0 %5093  ;;  %v5769_v48 = vpop.permute.xlu1 %5768 }
 0x453   : > { %v5186_v53 = vsel %vm999_vm10, %v5185_v57, %v5094_v33  ;;  %v5810_v60 = vsel %vm991_vm6, %v8958_v7, %v5769_v48  ;;  %v6169_v7 = vld [vmem:[%s6433_s16 + $0x40] sm:$0xff]  ;;  %v1177_v57 = vpop.f32.mrf.mxu1  ;;  %v1713_v33 = vpop.f32.mrf.mxu0 }
 0x454   : > { %6164 = vmatpush1.msk.msra.mxu0 %vm1027_vm11, %v5186_v53 }
 0x455   : > { %6165 = vmatmul.mubr.msk.f32.vlgmr.msra.gmra.mxu0 %vm1023_vm12, %v6162_v18  ;;  %v1715_v35 = vpop.f32.mrf.mxu0 }
 0x456   : > { %v5685_v51 = vpop.permute.xlu0 %5684  ;;  %5896 = vmatprep.mubr.f32.mxu0 %v9270_v3  ;;  %v5150_v14 = vpop.permute.xlu1 %5149 }
 0x457   : > { %v5200_v59 = vsel %vm999_vm10, %v5199_v30, %v5150_v14  ;;  %v2320_v48 = vpop.f32.mrf.mxu0 }
 0x458   : > { %6167 = vmatpush1.msk.msra.mxu1 %vm1027_vm11, %v5200_v59 }
 0x459   : > { %6168 = vmatmul.mubr.msk.f32.vlgmr.msra.gmra.mxu1 %vm1023_vm12, %v6162_v18  ;;  %v1179_v18 = vpop.f32.mrf.mxu1  ;;  %v2322_v0 = vpop.f32.mrf.mxu0 }
 0x45a   : > { %v5741_v32 = vpop.permute.xlu0 %5740  ;;  %v5717_v22 = vpop.permute.xlu1 %5716  ;;  %5967 = vmatprep.mubr.f32.mxu1 %v9270_v3  ;;  %v9531_v3 = vld [vmem:[#allocation67_spill] sm:$0xff] }
 0x45b   : > { %v5787_v8 = vsel %vm392_vm2, %v9532_v50, %v9531_v3  ;;  %v5797_v58 = vsel %vm993_vm7, %v5796_v11, %v5717_v22  ;;  %v5803_v19 = vsel %vm991_vm6, %v5802_v1, %v5741_v32  ;;  %v600_v32 = vld [vmem:[#allocation3 + $0x10] sm:$0xff]  ;;  %v601_v22 = vld [vmem:[#allocation3] sm:$0xff] }
 0x45c   : > { %v5788_v56 = vsel %vm989_vm5, %v5787_v8, %v5681_v55 }
 0x45d   : > { %v5789_v26 = vsel %vm991_vm6, %v5788_v56, %v5685_v51  ;;  %v2895_v51 = vpop.f32.mrf.mxu0 }
 0x45e   : > { %v5689_v31 = vpop.permute.xlu0 %5688  ;;  %v5773_v17 = vpop.permute.xlu1 %5772 }
 0x45f   : > { %v5790_v47 = vsel %vm993_vm7, %v5789_v26, %v5689_v31  ;;  %v5811_v28 = vsel %vm993_vm7, %v5810_v60, %v5773_v17  ;;  %v2897_v14 = vpop.f32.mrf.mxu0  ;;  %v1182_v17 = vadd.f32 %v1106_v12, %v600_v32 }
 0x462   : > { %v5745_v10 = vpop.permute.xlu0 %5744  ;;  %v5721_v41 = vpop.permute.xlu1 %5720 }
 0x463   : > { %v5798_v5 = vsel %vm995_vm8, %v5797_v58, %v5721_v41  ;;  %v5804_v63 = vsel %vm993_vm7, %v5803_v19, %v5745_v10  ;;  %v1183_v41 = vadd.f32 %v1108_v21, %v601_v22 }
 0x466   : > { %v5693_v36 = vpop.permute.xlu0 %5692  ;;  %v5777_v9 = vpop.permute.xlu1 %5776 }
 0x467   : > { %v5791_v55 = vsel %vm995_vm8, %v5790_v47, %v5693_v36  ;;  %v5812_v44 = vsel %vm995_vm8, %v5811_v28, %v5777_v9  ;;  %v602_v36 = vld [vmem:[#allocation3 + $0x18] sm:$0xff] }
 0x468   : > { %v1184_v42 = vadd.f32 %v1177_v57, %v602_v36 }
 0x46a   : > { %v5749_v15 = vpop.permute.xlu0 %5748  ;;  %v5725_v52 = vpop.permute.xlu1 %5724 }
 0x46b   : > { %v5799_v34 = vsel %vm997_vm9, %v5798_v5, %v5725_v52  ;;  %v5805_v46 = vsel %vm995_vm8, %v5804_v63, %v5749_v15  ;;  %v1789_v15 = vadd.f32 %v1713_v33, %v1182_v17  ;;  %v603_v52 = vld [vmem:[#allocation3 + $0x8] sm:$0xff] }
 0x46c   : > { %v1185_v2 = vadd.f32 %v1179_v18, %v603_v52 }
 0x46e   : > { %v5697_v40 = vpop.permute.xlu0 %5696  ;;  %v5781_v49 = vpop.permute.xlu1 %5780 }
 0x46f   : > { %v5792_v29 = vsel %vm997_vm9, %v5791_v55, %v5697_v40  ;;  %v5813_v27 = vsel %vm997_vm9, %v5812_v44, %v5781_v49  ;;  %v1790_v40 = vadd.f32 %v1715_v35, %v1183_v41  ;;  %v2396_v49 = vadd.f32 %v2320_v48, %v1789_v15 }
 0x471   : > { %v2397_v50 = vadd.f32 %v2322_v0, %v1790_v40  ;;  %v2971_v56 = vadd.f32 %v2895_v51, %v2396_v49 }
 0x472   : > { %v5753_v62 = vpop.permute.xlu0 %5752  ;;  %v5729_v37 = vpop.permute.xlu1 %5728 }
 0x473   : > { %v5800_v16 = vsel %vm999_vm10, %v5799_v34, %v5729_v37  ;;  %v5806_v38 = vsel %vm997_vm9, %v5805_v46, %v5753_v62  ;;  %v2972_v26 = vadd.f32 %v2897_v14, %v2397_v50 }
 0x474   : > { %6170 = vmatprep.subr.msk.mxu0 %vm1027_vm11, %v5800_v16 }
 0x476   : > { %v5701_v39 = vpop.permute.xlu0 %5700  ;;  %v5785_v20 = vpop.permute.xlu1 %5784 }
 0x477   : > { %v5793_v25 = vsel %vm999_vm10, %v5792_v29, %v5701_v39  ;;  %v5814_v13 = vsel %vm999_vm10, %v5813_v27, %v5785_v20 }
 0x478   : > { %6171 = vmatpush1.msk.msra.mxu0 %vm1027_vm11, %v5793_v25  ;;  %6173 = vmatprep.subr.msk.mxu1 %vm1027_vm11, %v5814_v13 }
 0x479   : > { %6172 = vmatmul.mubr.msk.f32.vlgmr.msra.gmra.mxu0 %vm1023_vm12, %v6169_v7 }
 0x47b   : > { %v5757_v54 = vpop.permute.xlu1 %5756 }
 0x47c   : > { %v5807_v4 = vsel %vm999_vm10, %v5806_v38, %v5757_v54 }
 0x47d   : > { %6174 = vmatpush1.msk.msra.mxu1 %vm1027_vm11, %v5807_v4 }
 0x47e   : > { %6175 = vmatmul.mubr.msk.f32.vlgmr.msra.gmra.mxu1 %vm1023_vm12, %v6169_v7 }
 0x48b   : > { %v3502_v31 = vpop.f32.mrf.mxu0 }
 0x48c   : > { %v3578_v60 = vadd.f32 %v3502_v31, %v2971_v56 }
 0x48d   : > { %v3504_v9 = vpop.f32.mrf.mxu0 }
 0x48e   : > { %v3579_v28 = vadd.f32 %v3504_v9, %v2972_v26 }
 0x48f   : > { %v4109_v61 = vpop.f32.mrf.mxu0 }
 0x490   : > { %v4185_v24 = vadd.f32 %v4109_v61, %v3578_v60 }
 0x491   : > { %v4111_v58 = vpop.f32.mrf.mxu0 }
 0x492   : > { %v4186_v39 = vadd.f32 %v4111_v58, %v3579_v28 }
 0x493   : > { %v4684_v37 = vpop.f32.mrf.mxu0 }
 0x494   : > { %v4760_v27 = vadd.f32 %v4684_v37, %v4185_v24 }
 0x495   : > { %v4686_v43 = vpop.f32.mrf.mxu0 }
 0x496   : > { %v4761_v19 = vadd.f32 %v4686_v43, %v4186_v39 }
 0x4bf   : > { %v1784_v53 = vpop.f32.mrf.mxu1 }
 0x4c0   : > { %v1791_v3 = vadd.f32 %v1784_v53, %v1184_v42 }
 0x4c1   : > { %v1786_v45 = vpop.f32.mrf.mxu1 }
 0x4c2   : > { %v1792_v8 = vadd.f32 %v1786_v45, %v1185_v2 }
 0x4c7   : > { %v2391_v23 = vpop.f32.mrf.mxu1 }
 0x4c8   : > { %v2398_v62 = vadd.f32 %v2391_v23, %v1791_v3 }
 0x4c9   : > { %v2393_v30 = vpop.f32.mrf.mxu1 }
 0x4ca   : > { %v2399_v34 = vadd.f32 %v2393_v30, %v1792_v8 }
 0x4cb   : > { %v2966_v59 = vpop.f32.mrf.mxu1 }
 0x4cc   : > { %v2973_v16 = vadd.f32 %v2966_v59, %v2398_v62 }
 0x4cd   : > { %v2968_v10 = vpop.f32.mrf.mxu1 }
 0x4ce   : > { %v2974_v55 = vadd.f32 %v2968_v10, %v2399_v34 }
 0x4fe   : > { %v3573_v6 = vpop.f32.mrf.mxu1 }
 0x4ff   : > { %v3580_v29 = vadd.f32 %v3573_v6, %v2973_v16 }
 0x500   : > { %v3575_v11 = vpop.f32.mrf.mxu1 }
 0x501   : > { %v3581_v7 = vadd.f32 %v3575_v11, %v2974_v55 }
 0x506   : > { %v4180_v5 = vpop.f32.mrf.mxu1 }
 0x507   : > { %v4187_v20 = vadd.f32 %v4180_v5, %v3580_v29 }
 0x508   : > { %v4182_v47 = vpop.f32.mrf.mxu1 }
 0x509   : > { %v4188_v13 = vadd.f32 %v4182_v47, %v3581_v7 }
 0x50a   : > { %v4755_v44 = vpop.f32.mrf.mxu1 }
 0x50b   : > { %v4762_v54 = vadd.f32 %v4755_v44, %v4187_v20 }
 0x50c   : > { %v4757_v25 = vpop.f32.mrf.mxu1 }
 0x50d   : > { %v4763_v57 = vadd.f32 %v4757_v25, %v4188_v13 }
 0x515   : > { %v5291_v1 = vpop.f32.mrf.mxu0 }
 0x516   : > { %v5367_v46 = vadd.f32 %v5291_v1, %v4760_v27 }
 0x517   : > { %v5293_v63 = vpop.f32.mrf.mxu0 }
 0x518   : > { %v5368_v12 = vadd.f32 %v5293_v63, %v4761_v19 }
 0x519   : > { %v5362_v38 = vpop.f32.mrf.mxu1 }
 0x51a   : > { %v5369_v53 = vadd.f32 %v5362_v38, %v4762_v54 }
 0x51b   : > { %v5364_v18 = vpop.f32.mrf.mxu1 }
 0x51c   : > { %v5370_v45 = vadd.f32 %v5364_v18, %v4763_v57 }
 0x539   : > { %v5898_v4 = vpop.f32.mrf.mxu0 }
 0x53a   : > { %v5974_v21 = vadd.f32 %v5898_v4, %v5367_v46 }
 0x53b   : > { %v5900_v33 = vpop.f32.mrf.mxu0 }
 0x53c   : > { %5978 = vst [vmem:[#allocation3 + $0x10] sm:$0xff] %v5974_v21  ;;  %v5975_v35 = vadd.f32 %v5900_v33, %v5368_v12 }
 0x53e   : > { %5979 = vst [vmem:[#allocation3] sm:$0xff] %v5975_v35  ;;  %v5969_v48 = vpop.f32.mrf.mxu1 }
 0x53f   : > { %v5976_v0 = vadd.f32 %v5969_v48, %v5369_v53  ;;  %5985 = sbr.rel (%p6176_p9) target bundleno = 1478 (0x5c6), region = 48 }
 0x540   : > { %v5971_v23 = vpop.f32.mrf.mxu1 }
 0x541   : > { %5980 = vst [vmem:[#allocation3 + $0x18] sm:$0xff] %v5976_v0  ;;  %v5977_v51 = vadd.f32 %v5971_v23, %v5370_v45 }
 0x543   : > { %5981 = vst [vmem:[#allocation3 + $0x8] sm:$0xff] %v5977_v51 }
 0x544   : > { %v5986_v30 = vld [vmem:[%s9161_s4] sm:$0xff]  ;;  %v6356_v14 = vmov 0  }
 0x545   : > { %6301 = vset.pattern.permute.xlu0 %v6356_v14 }
 0x546   : > { %5989 = vperm.xlu0 %6301, %v5986_v30  }
 0x5c1   : > { %v5990_v59 = vpop.permute.xlu0 %5989 }
 0x5c2   : > { %v5992_v32 = vadd.f32 %v5990_v59, %v5974_v21  ;;  %v5993_v22 = vadd.f32 %v5990_v59, %v5975_v35  ;;  %v5994_v31 = vadd.f32 %v5990_v59, %v5976_v0  ;;  %v5995_v17 = vadd.f32 %v5990_v59, %v5977_v51 }
 0x5c4   : > { %5996 = vst [vmem:[%s6424_s6] sm:$0xff] %v5992_v32  ;;  %5997 = vst [vmem:[%s6424_s6 + $0x8] sm:$0xff] %v5993_v22 }
 0x5c5   : > { %5998 = vst [vmem:[%s6424_s6 + $0x10] sm:$0xff] %v5994_v31  ;;  %5999 = vst [vmem:[%s6424_s6 + $0x18] sm:$0xff] %v5995_v17 }
 0x5c6 PF: > { %s15_s22 = sadd.s32 1, %s6340_s22   ;;  %s9534_s18 = smov %s6332_s20 }
 0x5c7   : > { %p12_p10 = scmp.ge.s32.totalorder %s15_s22, 6   ;;  %s9535_s19 = smov %s6336_s21 }
 0x5c8   : > { %s9536_s20 = smov %s9539_s23  ;;  %s9537_s21 = smov %s9543_s24 }
 0x5c9   :  { %14 = sbr.rel (!%p12_p10) target bundleno = 3 (0x3), region = 89 }

</bundles_post_ra>
